<compile_context>
chip_gen: v7x
topology: tpu7x:2x2x1
jax: 0.10.0
libtpu: 0.0.40
codegen_flags: <defaults>
</compile_context>

<pallas_src>
import functools

import jax
import jax.numpy as jnp
from jax import lax
from jax.experimental import pallas as pl
from jax.experimental.pallas import tpu as pltpu

_EPS = 1e-5                       # PyTorch nn.LayerNorm default eps
_INV_SQRT2 = 0.7071067811865476
_GELU_TANH_C = 0.7978845608028654  # sqrt(2/pi)

# True  -> tanh-approx GELU (EUP slot, ~1e-3 abs deviation from erf)
# False -> exact erf GELU (bit-parity with nn.GELU default)
_USE_TANH_GELU = True


# ----------------------------- in-kernel helpers -----------------------------
def _bf16(v):
    return v.astype(jnp.bfloat16)


def _layer_norm(x, w, b):
    mu = jnp.mean(x, axis=-1, keepdims=True)
    var = jnp.mean(jnp.square(x - mu), axis=-1, keepdims=True)
    return (x - mu) * lax.rsqrt(var + _EPS) * w + b


def _gelu(x):
    if _USE_TANH_GELU:
        return 0.5 * x * (1.0 + jnp.tanh(_GELU_TANH_C * (x + 0.044715 * x * x * x)))
    return 0.5 * x * (1.0 + lax.erf(x * _INV_SQRT2))


def _softmax_last(a):
    a = a - jnp.max(a, axis=-1, keepdims=True)
    e = jnp.exp(a)
    # Exact reciprocal: the denominator is only an (N, 1) column, so this is
    # cheap, and it removes the approx-rcp error the review flagged.
    return e * pl.reciprocal(jnp.sum(e, axis=-1, keepdims=True), approx=False)


def _adapter(x, nw, nb, dw, db, uw, ub):
    # AdapterBlock: x + up(gelu(down(LN(x))))   (adds its own residual)
    h = _layer_norm(x, nw, nb)
    h = jnp.dot(_bf16(h), dw, preferred_element_type=jnp.float32) + db
    h = _gelu(h)
    h = jnp.dot(_bf16(h), uw, preferred_element_type=jnp.float32) + ub
    return x + h


def _attn_heads(qkv_bf, base, num_heads, head_dim, scale, scr_ref, scr_base):
    """Per-head softmax attention for one branch (main or shadow).

    Heads are processed in lane groups of up to 128 output columns: Q/K/V group
    slabs are sliced once per group and the group's concatenated output is
    written to the bf16 scratch with a single lane-dense store (instead of one
    masked sub-128-lane store per head).
    # NOTE: the next step (per review) is a head-major (H, N, hd) layout with a
    # batched 'hnd,hmd->hnm' dot + lax.fori_loop; deferred because the required
    # minor-dim split reshape/transpose is a relayout whose Mosaic lowering is
    # not guaranteed at these shapes.
    """
    D = num_heads * head_dim
    if 128 % head_dim == 0:
        group = min(num_heads, max(1, 128 // head_dim))
    else:
        group = 1
    for g0 in range(0, num_heads, group):
        gh = min(group, num_heads - g0)
        w = gh * head_dim
        off = g0 * head_dim
        q_g = qkv_bf[:, base + off: base + off + w]
        k_g = qkv_bf[:, base + D + off: base + D + off + w]
        v_g = qkv_bf[:, base + 2 * D + off: base + 2 * D + off + w]
        outs = []
        for j in range(gh):
            lo, hi = j * head_dim, (j + 1) * head_dim
            logits = lax.dot_general(
                q_g[:, lo:hi], k_g[:, lo:hi], (((1,), (1,)), ((), ())),
                preferred_element_type=jnp.float32) * scale
            p = _softmax_last(logits)
            outs.append(jnp.dot(_bf16(p), v_g[:, lo:hi],
                                preferred_element_type=jnp.float32))
        slab = outs[0] if gh == 1 else jnp.concatenate(outs, axis=-1)
        scr_ref[:, scr_base + off: scr_base + off + w] = _bf16(slab)


# --------------------------------- kernel ------------------------------------
def _block_kernel(x_ref, *refs, num_heads, head_dim, shadow_head_dim, scale):
    heads_scr = refs[-1]          # bf16 VMEM scratch (N, C+S): stacked head outs
    o_ref = refs[-2]
    (n1w, n1b, qkvw, qkvb, projw, projb,
     n2w, n2b, m1w, m1b, m2w, m2b,
     a1nw, a1nb, a1dw, a1db, a1uw, a1ub,
     a2nw, a2nb, a2dw, a2db, a2uw, a2ub) = refs[:-2]

    x0 = x_ref[0]                                   # (N, C) f32
    D = num_heads * head_dim                        # == C
    S = num_heads * shadow_head_dim                 # shadow_dim

    # ----- attention sub-block -----
    x_ln = _layer_norm(x0, n1w[...], n1b[...])
    # fused QKV for main + shadow branches: (N, 3C + 3S), bf16 in / f32 acc
    qkv = jnp.dot(_bf16(x_ln), qkvw[...],
                  preferred_element_type=jnp.float32) + qkvb[...]
    qkv_bf = _bf16(qkv)                             # single full-width cast

    # main heads -> scratch columns [0, D); shadow heads -> [D, D+S)
    # (the module uses the MAIN head_dim scale for BOTH branches)
    _attn_heads(qkv_bf, 0, num_heads, head_dim, scale, heads_scr, 0)
    _attn_heads(qkv_bf, 3 * D, num_heads, shadow_head_dim, scale, heads_scr, D)

    # single fused (C+S)-K output projection; branch-fusion softmax weights were
    # folded into projw / projb in the wrapper (exact: it is a linear op).
    x_att = jnp.dot(heads_scr[...], projw[...],
                    preferred_element_type=jnp.float32) + projb[...]

    # x = x + adapter1(x)   (adapter adds its own residual internally)
    x_att = x_att + _adapter(x_att, a1nw[...], a1nb[...], a1dw[...], a1db[...],
                             a1uw[...], a1ub[...])
    x1 = x0 + x_att                                 # residual (drop_path=Identity)

    # ----- MLP sub-block -----
    hn = _layer_norm(x1, n2w[...], n2b[...])
    g = _gelu(jnp.dot(_bf16(hn), m1w[...],
                      preferred_element_type=jnp.float32) + m1b[...])
    y = jnp.dot(_bf16(g), m2w[...],
                preferred_element_type=jnp.float32) + m2b[...]
    y = y + _adapter(y, a2nw[...], a2nb[...], a2dw[...], a2db[...],
                     a2uw[...], a2ub[...])
    o_ref[0] = (x1 + y).astype(o_ref.dtype)


# ----------------------- wrapper: parameter packing ---------------------------
def _pad_adapter(dw, db, uw):
    """Zero-pad the adapter hidden dim to a multiple of 128 lanes (exact)."""
    a = dw.shape[1]
    ap = ((a + 127) // 128) * 128
    if ap != a:
        dw = jnp.pad(dw, ((0, 0), (0, ap - a)))
        db = jnp.pad(db, ((0, 0), (0, ap - a)))
        uw = jnp.pad(uw, ((0, ap - a), (0, 0)))
    return dw, db, uw


def _pack_params(params):
    """Fuse/fold module parameters into the kernel's packed layout (done once)."""
    (n1w, n1b, qkv_w, qkv_b, proj_w, proj_b,
     sqkv_w, sqkv_b, sproj_w, sproj_b, fusion,
     n2w, n2b, m1w, m1b, m2w, m2b,
     a1nw, a1nb, a1dw, a1db, a1uw, a1ub,
     a2nw, a2nb, a2dw, a2db, a2uw, a2ub) = params
    f32, bf16 = jnp.float32, jnp.bfloat16

    # branch-fusion softmax is parameter-only -> fold into the fused projection.
    fw = jax.nn.softmax(fusion.reshape(-1).astype(f32))               # (2,)
    qkvw_f = jnp.concatenate([qkv_w, sqkv_w], axis=1).astype(bf16)    # (C, 3C+3S)
    qkvb_f = jnp.concatenate([qkv_b, sqkv_b], axis=1).astype(f32)     # (1, 3C+3S)
    projw_f = jnp.concatenate([fw[0] * proj_w, fw[1] * sproj_w],
                              axis=0).astype(bf16)                    # (C+S, C)
    projb_f = (fw[0] * proj_b + fw[1] * sproj_b).astype(f32)          # (1, C)

    a1dw, a1db, a1uw = _pad_adapter(a1dw, a1db, a1uw)
    a2dw, a2db, a2uw = _pad_adapter(a2dw, a2db, a2uw)

    return [
        n1w.astype(f32), n1b.astype(f32),
        qkvw_f, qkvb_f, projw_f, projb_f,
        n2w.astype(f32), n2b.astype(f32),
        m1w.astype(bf16), m1b.astype(f32), m2w.astype(bf16), m2b.astype(f32),
        a1nw.astype(f32), a1nb.astype(f32), a1dw.astype(bf16), a1db.astype(f32),
        a1uw.astype(bf16), a1ub.astype(f32),
        a2nw.astype(f32), a2nb.astype(f32), a2dw.astype(bf16), a2db.astype(f32),
        a2uw.astype(bf16), a2ub.astype(f32),
    ]


def _chip_vmem_cap_bytes():
    try:
        return int(pltpu.get_tpu_info().vmem_capacity_bytes)
    except Exception:
        return 64 * 2 ** 20        # conservative default (v7x per-TC VMEM)


def adapter_shadow_block(x, params, num_heads, out_dtype=None):
    B, N, C = x.shape
    shadow_dim = params[6].shape[1] // 3            # sqkv_w is (C, 3*shadow_dim)
    head_dim = C // num_heads
    shadow_head_dim = shadow_dim // num_heads
    mlp_hidden = params[13].shape[1]
    out_dtype = x.dtype if out_dtype is None else out_dtype   # bf16 optional

    packed = _pack_params(params)

    kernel = functools.partial(
        _block_kernel,
        num_heads=num_heads,
        head_dim=head_dim,
        shadow_head_dim=shadow_head_dim,
        scale=head_dim ** -0.5)     # main head_dim scale for BOTH branches

    # Working-set estimate (weights + double-buffered act slabs + bf16 scratch +
    # temporaries), clamped to the chip's physical VMEM minus headroom.
    w_bytes = sum(int(p.size) * p.dtype.itemsize for p in packed)
    slab_bytes = N * C * 4
    scr_bytes = N * (C + shadow_dim) * 2
    tmp_bytes = (N * (3 * (C + shadow_dim) * 6 + mlp_hidden * 6 + 8 * C * 4)
                 + N * N * 8 + 128 * N * 4)
    cap = _chip_vmem_cap_bytes()

    # TODO(synk): for v7x with B == 1, add a second parallel grid axis over
    # query tiles of N so both TensorCores get work (requires splitting the
    # fused QKV/proj across q-tiles); skipped here to keep the single fused pass.
    def build_and_call(single_buffer_weights):
        in_specs = [pl.BlockSpec((1, N, C), lambda b: (b, 0, 0))]
        for p in packed:
            idx = lambda b, nd=p.ndim: (0,) * nd
            if single_buffer_weights:
                in_specs.append(
                    pl.BlockSpec(p.shape, idx, pipeline_mode=pl.Buffered(1)))
            else:
                in_specs.append(pl.BlockSpec(p.shape, idx))

        wf = 1 if single_buffer_weights else 2
        est = wf * w_bytes + 4 * slab_bytes + scr_bytes + tmp_bytes
        vmem_limit = int(max(32 * 2 ** 20,
                             min(cap - 8 * 2 ** 20, int(1.3 * est))))

        grid_spec = pltpu.PrefetchScalarGridSpec(
            num_scalar_prefetch=0,
            grid=(B,),
            in_specs=in_specs,
            out_specs=pl.BlockSpec((1, N, C), lambda b: (b, 0, 0)),
            scratch_shapes=[pltpu.VMEM((N, C + shadow_dim), jnp.bfloat16)])

        return pl.pallas_call(
            kernel,
            out_shape=jax.ShapeDtypeStruct((B, N, C), out_dtype),
            grid_spec=grid_spec,
            compiler_params=pltpu.CompilerParams(
                dimension_semantics=("parallel",),
                vmem_limit_bytes=vmem_limit),
        )(x, *packed)

    try:
        return build_and_call(True)
    except Exception:
        # pipeline_mode=pl.Buffered(1) unsupported on this jax version ->
        # rebuild with default (double-buffered) weight specs.
        return build_and_call(False)


# ------------------------- pure-JAX reference (check) --------------------------
def _reference(x, params, num_heads):
    (n1w, n1b, qkv_w, qkv_b, proj_w, proj_b,
     sqkv_w, sqkv_b, sproj_w, sproj_b, fusion,
     n2w, n2b, m1w, m1b, m2w, m2b,
     a1nw, a1nb, a1dw, a1db, a1uw, a1ub,
     a2nw, a2nb, a2dw, a2db, a2uw, a2ub) = params
    B, N, C = x.shape
    head_dim = C // num_heads
    shadow_dim = sqkv_w.shape[1] // 3
    scale = head_dim ** -0.5

    def ln(v, w, b):
        mu = jnp.mean(v, -1, keepdims=True)
        var = jnp.mean(jnp.square(v - mu), -1, keepdims=True)
        return (v - mu) * lax.rsqrt(var + _EPS) * w + b

    def gelu(v):  # exact erf GELU (nn.GELU default)
        return 0.5 * v * (1.0 + lax.erf(v * _INV_SQRT2))

    def attn(xl, wqkv, bqkv, wproj, bproj, d):
        hd = d // num_heads
        qkv = xl @ wqkv + bqkv
        q, k, v = qkv[..., :d], qkv[..., d:2 * d], qkv[..., 2 * d:]
        split = lambda t: t.reshape(B, N, num_heads, hd).transpose(0, 2, 1, 3)
        q, k, v = split(q), split(k), split(v)
        a = jax.nn.softmax(jnp.einsum('bhnd,bhmd->bhnm', q, k) * scale, -1)
        o = jnp.einsum('bhnm,bhmd->bhnd', a, v).transpose(0, 2, 1, 3).reshape(B, N, d)
        return o @ wproj + bproj

    def adapter(v, nw, nb, dw, db, uw, ub):
        h = ln(v, nw, nb) @ dw + db
        h = gelu(h) @ uw + ub
        return v + h

    xl = ln(x, n1w, n1b)
    xm = attn(xl, qkv_w, qkv_b, proj_w, proj_b, C)
    xs = attn(xl, sqkv_w, sqkv_b, sproj_w, sproj_b, shadow_dim)
    fw = jax.nn.softmax(fusion[0])
    xa = fw[0] * xm + fw[1] * xs
    xa = xa + adapter(xa, a1nw, a1nb, a1dw, a1db, a1uw, a1ub)
    x1 = x + xa
    h = ln(x1, n2w, n2b)
    h = gelu(h @ m1w + m1b) @ m2w + m2b
    h = h + adapter(h, a2nw, a2nb, a2dw, a2db, a2uw, a2ub)
    return x1 + h


# ----------------------------------- main --------------------------------------
if __name__ == "__main__":
    B, N, C = 2, 8, 32
    H = 4                        # num_heads
    S = int(C * 0.25)            # shadow_dim = 8 (mb_ratio=0.25)
    MLP = int(C * 4.0)           # mlp hidden = 128
    A = 16                       # adapter_dim

    key = jax.random.PRNGKey(0)
    ks = iter(jax.random.split(key, 40))

    def nrm(shape, std):
        return (std * jax.random.normal(next(ks), shape)).astype(jnp.float32)

    ones = lambda s: jnp.ones(s, jnp.float32)
    zeros = lambda s: jnp.zeros(s, jnp.float32)

    params = [
        ones((1, C)), zeros((1, C)),                    # norm1 w, b
        nrm((C, 3 * C), 0.02), nrm((1, 3 * C), 0.02),   # qkv W (in,out), b
        nrm((C, C), 0.02), nrm((1, C), 0.02),           # proj W, b
        nrm((C, 3 * S), 0.02), nrm((1, 3 * S), 0.02),   # shadow_qkv W, b
        nrm((S, C), 0.02), nrm((1, C), 0.02),           # shadow_proj W, b
        ones((1, 2)),                                   # branch_fusion (init = ones(2))
        ones((1, C)), zeros((1, C)),                    # norm2 w, b
        nrm((C, MLP), 0.02), nrm((1, MLP), 0.02),       # mlp fc1 W, b
        nrm((MLP, C), 0.02), nrm((1, C), 0.02),         # mlp fc2 W, b
        # adapter1: LN ones/zeros, down/up std=0.001, zero biases
        ones((1, C)), zeros((1, C)),
        nrm((C, A), 0.001), zeros((1, A)),
        nrm((A, C), 0.001), zeros((1, C)),
        # adapter2
        ones((1, C)), zeros((1, C)),
        nrm((C, A), 0.001), zeros((1, A)),
        nrm((A, C), 0.001), zeros((1, C)),
    ]

    x = jax.random.normal(next(ks), (B, N, C), jnp.float32)

    out = adapter_shadow_block(x, params, num_heads=H)
    out = jax.block_until_ready(out)

    ref = _reference(x, params, H)
    assert out.shape == (B, N, C)
    err = float(jnp.max(jnp.abs(out - ref)))
    # bf16 MXU inputs (+ tanh-approx GELU in the kernel) -> bf16-level tolerance
    assert jnp.allclose(out, ref, atol=2e-2, rtol=2e-2), f"max abs err={err}"

    print("KERNEL_OK")
</pallas_src>

<mosaic_0001>
module attributes {stable_mosaic.version = 11 : i64} {
  func.func @_block_kernel(%arg0: i32, %arg1: memref<1x8x32xf32, #tpu.memory_space<vmem>>, %arg2: memref<1x32xf32, #tpu.memory_space<vmem>>, %arg3: memref<1x32xf32, #tpu.memory_space<vmem>>, %arg4: memref<32x120xbf16, #tpu.memory_space<vmem>>, %arg5: memref<1x120xf32, #tpu.memory_space<vmem>>, %arg6: memref<40x32xbf16, #tpu.memory_space<vmem>>, %arg7: memref<1x32xf32, #tpu.memory_space<vmem>>, %arg8: memref<1x32xf32, #tpu.memory_space<vmem>>, %arg9: memref<1x32xf32, #tpu.memory_space<vmem>>, %arg10: memref<32x128xbf16, #tpu.memory_space<vmem>>, %arg11: memref<1x128xf32, #tpu.memory_space<vmem>>, %arg12: memref<128x32xbf16, #tpu.memory_space<vmem>>, %arg13: memref<1x32xf32, #tpu.memory_space<vmem>>, %arg14: memref<1x32xf32, #tpu.memory_space<vmem>>, %arg15: memref<1x32xf32, #tpu.memory_space<vmem>>, %arg16: memref<32x128xbf16, #tpu.memory_space<vmem>>, %arg17: memref<1x128xf32, #tpu.memory_space<vmem>>, %arg18: memref<128x32xbf16, #tpu.memory_space<vmem>>, %arg19: memref<1x32xf32, #tpu.memory_space<vmem>>, %arg20: memref<1x32xf32, #tpu.memory_space<vmem>>, %arg21: memref<1x32xf32, #tpu.memory_space<vmem>>, %arg22: memref<32x128xbf16, #tpu.memory_space<vmem>>, %arg23: memref<1x128xf32, #tpu.memory_space<vmem>>, %arg24: memref<128x32xbf16, #tpu.memory_space<vmem>>, %arg25: memref<1x32xf32, #tpu.memory_space<vmem>>, %arg26: memref<1x8x32xf32, #tpu.memory_space<vmem>>, %arg27: memref<8x40xbf16, #tpu.memory_space<vmem>>) attributes {dimension_semantics = [#tpu.dimension_semantics<parallel>], iteration_bounds = array<i64: 2>, scalar_prefetch = 0 : i64, scratch_operands = 1 : i64, tpu.core_type = #tpu.core_type<tc>, window_params = [{transform_indices = @transform_0, window_bounds = array<i64: 1, 8, 32>}, {pipeline_mode = #tpu.pipeline_mode<synchronous>, transform_indices = @transform_1, window_bounds = array<i64: 1, 32>}, {pipeline_mode = #tpu.pipeline_mode<synchronous>, transform_indices = @transform_2, window_bounds = array<i64: 1, 32>}, {pipeline_mode = #tpu.pipeline_mode<synchronous>, transform_indices = @transform_3, window_bounds = array<i64: 32, 120>}, {pipeline_mode = #tpu.pipeline_mode<synchronous>, transform_indices = @transform_4, window_bounds = array<i64: 1, 120>}, {pipeline_mode = #tpu.pipeline_mode<synchronous>, transform_indices = @transform_5, window_bounds = array<i64: 40, 32>}, {pipeline_mode = #tpu.pipeline_mode<synchronous>, transform_indices = @transform_6, window_bounds = array<i64: 1, 32>}, {pipeline_mode = #tpu.pipeline_mode<synchronous>, transform_indices = @transform_7, window_bounds = array<i64: 1, 32>}, {pipeline_mode = #tpu.pipeline_mode<synchronous>, transform_indices = @transform_8, window_bounds = array<i64: 1, 32>}, {pipeline_mode = #tpu.pipeline_mode<synchronous>, transform_indices = @transform_9, window_bounds = array<i64: 32, 128>}, {pipeline_mode = #tpu.pipeline_mode<synchronous>, transform_indices = @transform_10, window_bounds = array<i64: 1, 128>}, {pipeline_mode = #tpu.pipeline_mode<synchronous>, transform_indices = @transform_11, window_bounds = array<i64: 128, 32>}, {pipeline_mode = #tpu.pipeline_mode<synchronous>, transform_indices = @transform_12, window_bounds = array<i64: 1, 32>}, {pipeline_mode = #tpu.pipeline_mode<synchronous>, transform_indices = @transform_13, window_bounds = array<i64: 1, 32>}, {pipeline_mode = #tpu.pipeline_mode<synchronous>, transform_indices = @transform_14, window_bounds = array<i64: 1, 32>}, {pipeline_mode = #tpu.pipeline_mode<synchronous>, transform_indices = @transform_15, window_bounds = array<i64: 32, 128>}, {pipeline_mode = #tpu.pipeline_mode<synchronous>, transform_indices = @transform_16, window_bounds = array<i64: 1, 128>}, {pipeline_mode = #tpu.pipeline_mode<synchronous>, transform_indices = @transform_17, window_bounds = array<i64: 128, 32>}, {pipeline_mode = #tpu.pipeline_mode<synchronous>, transform_indices = @transform_18, window_bounds = array<i64: 1, 32>}, {pipeline_mode = #tpu.pipeline_mode<synchronous>, transform_indices = @transform_19, window_bounds = array<i64: 1, 32>}, {pipeline_mode = #tpu.pipeline_mode<synchronous>, transform_indices = @transform_20, window_bounds = array<i64: 1, 32>}, {pipeline_mode = #tpu.pipeline_mode<synchronous>, transform_indices = @transform_21, window_bounds = array<i64: 32, 128>}, {pipeline_mode = #tpu.pipeline_mode<synchronous>, transform_indices = @transform_22, window_bounds = array<i64: 1, 128>}, {pipeline_mode = #tpu.pipeline_mode<synchronous>, transform_indices = @transform_23, window_bounds = array<i64: 128, 32>}, {pipeline_mode = #tpu.pipeline_mode<synchronous>, transform_indices = @transform_24, window_bounds = array<i64: 1, 32>}, {transform_indices = @transform_25, window_bounds = array<i64: 1, 8, 32>}]} {
    %c0 = arith.constant 0 : index
    %c0_0 = arith.constant 0 : index
    %c0_1 = arith.constant 0 : index
    %0 = vector.load %arg1[%c0, %c0_0, %c0_1] : memref<1x8x32xf32, #tpu.memory_space<vmem>>, vector<1x8x32xf32>
    %1 = vector.shape_cast %0 : vector<1x8x32xf32> to vector<8x32xf32>
    %c0_2 = arith.constant 0 : index
    %c0_3 = arith.constant 0 : index
    %2 = vector.load %arg2[%c0_2, %c0_3] : memref<1x32xf32, #tpu.memory_space<vmem>>, vector<1x32xf32>
    %c0_4 = arith.constant 0 : index
    %c0_5 = arith.constant 0 : index
    %3 = vector.load %arg3[%c0_4, %c0_5] : memref<1x32xf32, #tpu.memory_space<vmem>>, vector<1x32xf32>
    %cst = arith.constant dense<0.000000e+00> : vector<8xf32>
    %4 = vector.multi_reduction <add>, %1, %cst [1] : vector<8x32xf32> to vector<8xf32>
    %5 = vector.shape_cast %4 : vector<8xf32> to vector<8x1xf32>
    %cst_6 = arith.constant 3.200000e+01 : f32
    %6 = vector.broadcast %cst_6 : f32 to vector<8x1xf32>
    %7 = arith.divf %5, %6 : vector<8x1xf32>
    %8 = vector.broadcast %7 : vector<8x1xf32> to vector<8x32xf32>
    %9 = arith.subf %1, %8 : vector<8x32xf32>
    %10 = arith.mulf %9, %9 : vector<8x32xf32>
    %cst_7 = arith.constant dense<0.000000e+00> : vector<8xf32>
    %11 = vector.multi_reduction <add>, %10, %cst_7 [1] : vector<8x32xf32> to vector<8xf32>
    %12 = vector.shape_cast %11 : vector<8xf32> to vector<8x1xf32>
    %cst_8 = arith.constant 3.200000e+01 : f32
    %13 = vector.broadcast %cst_8 : f32 to vector<8x1xf32>
    %14 = arith.divf %12, %13 : vector<8x1xf32>
    %15 = vector.broadcast %7 : vector<8x1xf32> to vector<8x32xf32>
    %16 = arith.subf %1, %15 : vector<8x32xf32>
    %cst_9 = arith.constant 9.99999974E-6 : f32
    %17 = vector.broadcast %cst_9 : f32 to vector<8x1xf32>
    %18 = arith.addf %14, %17 : vector<8x1xf32>
    %19 = math.rsqrt %18 : vector<8x1xf32>
    %20 = vector.broadcast %19 : vector<8x1xf32> to vector<8x32xf32>
    %21 = arith.mulf %16, %20 : vector<8x32xf32>
    %22 = vector.broadcast %2 : vector<1x32xf32> to vector<8x32xf32>
    %23 = arith.mulf %21, %22 : vector<8x32xf32>
    %24 = vector.broadcast %3 : vector<1x32xf32> to vector<8x32xf32>
    %25 = arith.addf %23, %24 : vector<8x32xf32>
    %26 = arith.truncf %25 : vector<8x32xf32> to vector<8x32xbf16>
    %c0_10 = arith.constant 0 : index
    %c0_11 = arith.constant 0 : index
    %27 = vector.load %arg4[%c0_10, %c0_11] : memref<32x120xbf16, #tpu.memory_space<vmem>>, vector<32x120xbf16>
    %cst_12 = arith.constant dense<0.000000e+00> : vector<8x120xf32>
    %28 = tpu.matmul %26, %27, %cst_12 {dimension_numbers = #tpu.dot_dimension_numbers<[1], [0], [0], [1], [0, 0, 1, 1], [], []>} : vector<8x32xbf16>, vector<32x120xbf16>, vector<8x120xf32> -> vector<8x120xf32>
    %c0_13 = arith.constant 0 : index
    %c0_14 = arith.constant 0 : index
    %29 = vector.load %arg5[%c0_13, %c0_14] : memref<1x120xf32, #tpu.memory_space<vmem>>, vector<1x120xf32>
    %30 = vector.broadcast %29 : vector<1x120xf32> to vector<8x120xf32>
    %31 = arith.addf %28, %30 : vector<8x120xf32>
    %32 = arith.truncf %31 : vector<8x120xf32> to vector<8x120xbf16>
    %33 = vector.extract_strided_slice %32 {offsets = [0, 0], sizes = [8, 32], strides = [1, 1]} : vector<8x120xbf16> to vector<8x32xbf16>
    %34 = vector.extract_strided_slice %32 {offsets = [0, 32], sizes = [8, 32], strides = [1, 1]} : vector<8x120xbf16> to vector<8x32xbf16>
    %35 = vector.extract_strided_slice %32 {offsets = [0, 64], sizes = [8, 32], strides = [1, 1]} : vector<8x120xbf16> to vector<8x32xbf16>
    %36 = vector.extract_strided_slice %33 {offsets = [0, 0], sizes = [8, 8], strides = [1, 1]} : vector<8x32xbf16> to vector<8x8xbf16>
    %37 = vector.extract_strided_slice %34 {offsets = [0, 0], sizes = [8, 8], strides = [1, 1]} : vector<8x32xbf16> to vector<8x8xbf16>
    %cst_15 = arith.constant dense<0.000000e+00> : vector<8x8xf32>
    %38 = tpu.matmul %36, %37, %cst_15 {dimension_numbers = #tpu.dot_dimension_numbers<[1], [1], [0], [0], [0, 0, 1, 0], [], []>} : vector<8x8xbf16>, vector<8x8xbf16>, vector<8x8xf32> -> vector<8x8xf32>
    %cst_16 = arith.constant 0.353553385 : f32
    %39 = vector.broadcast %cst_16 : f32 to vector<8x8xf32>
    %40 = arith.mulf %38, %39 : vector<8x8xf32>
    %cst_17 = arith.constant dense<0xFF800000> : vector<8xf32>
    %41 = vector.multi_reduction <maximumf>, %40, %cst_17 [1] : vector<8x8xf32> to vector<8xf32>
    %42 = vector.shape_cast %41 : vector<8xf32> to vector<8x1xf32>
    %43 = vector.broadcast %42 : vector<8x1xf32> to vector<8x8xf32>
    %44 = arith.subf %40, %43 : vector<8x8xf32>
    %45 = math.exp %44 : vector<8x8xf32>
    %cst_18 = arith.constant dense<0.000000e+00> : vector<8xf32>
    %46 = vector.multi_reduction <add>, %45, %cst_18 [1] : vector<8x8xf32> to vector<8xf32>
    %47 = vector.shape_cast %46 : vector<8xf32> to vector<8x1xf32>
    %48 = tpu.reciprocal %47 : vector<8x1xf32> -> vector<8x1xf32>
    %49 = vector.broadcast %48 : vector<8x1xf32> to vector<8x8xf32>
    %50 = arith.mulf %45, %49 : vector<8x8xf32>
    %51 = arith.truncf %50 : vector<8x8xf32> to vector<8x8xbf16>
    %52 = vector.extract_strided_slice %35 {offsets = [0, 0], sizes = [8, 8], strides = [1, 1]} : vector<8x32xbf16> to vector<8x8xbf16>
    %cst_19 = arith.constant dense<0.000000e+00> : vector<8x8xf32>
    %53 = tpu.matmul %51, %52, %cst_19 {dimension_numbers = #tpu.dot_dimension_numbers<[1], [0], [0], [1], [0, 0, 1, 1], [], []>} : vector<8x8xbf16>, vector<8x8xbf16>, vector<8x8xf32> -> vector<8x8xf32>
    %54 = vector.extract_strided_slice %33 {offsets = [0, 8], sizes = [8, 8], strides = [1, 1]} : vector<8x32xbf16> to vector<8x8xbf16>
    %55 = vector.extract_strided_slice %34 {offsets = [0, 8], sizes = [8, 8], strides = [1, 1]} : vector<8x32xbf16> to vector<8x8xbf16>
    %cst_20 = arith.constant dense<0.000000e+00> : vector<8x8xf32>
    %56 = tpu.matmul %54, %55, %cst_20 {dimension_numbers = #tpu.dot_dimension_numbers<[1], [1], [0], [0], [0, 0, 1, 0], [], []>} : vector<8x8xbf16>, vector<8x8xbf16>, vector<8x8xf32> -> vector<8x8xf32>
    %cst_21 = arith.constant 0.353553385 : f32
    %57 = vector.broadcast %cst_21 : f32 to vector<8x8xf32>
    %58 = arith.mulf %56, %57 : vector<8x8xf32>
    %cst_22 = arith.constant dense<0xFF800000> : vector<8xf32>
    %59 = vector.multi_reduction <maximumf>, %58, %cst_22 [1] : vector<8x8xf32> to vector<8xf32>
    %60 = vector.shape_cast %59 : vector<8xf32> to vector<8x1xf32>
    %61 = vector.broadcast %60 : vector<8x1xf32> to vector<8x8xf32>
    %62 = arith.subf %58, %61 : vector<8x8xf32>
    %63 = math.exp %62 : vector<8x8xf32>
    %cst_23 = arith.constant dense<0.000000e+00> : vector<8xf32>
    %64 = vector.multi_reduction <add>, %63, %cst_23 [1] : vector<8x8xf32> to vector<8xf32>
    %65 = vector.shape_cast %64 : vector<8xf32> to vector<8x1xf32>
    %66 = tpu.reciprocal %65 : vector<8x1xf32> -> vector<8x1xf32>
    %67 = vector.broadcast %66 : vector<8x1xf32> to vector<8x8xf32>
    %68 = arith.mulf %63, %67 : vector<8x8xf32>
    %69 = arith.truncf %68 : vector<8x8xf32> to vector<8x8xbf16>
    %70 = vector.extract_strided_slice %35 {offsets = [0, 8], sizes = [8, 8], strides = [1, 1]} : vector<8x32xbf16> to vector<8x8xbf16>
    %cst_24 = arith.constant dense<0.000000e+00> : vector<8x8xf32>
    %71 = tpu.matmul %69, %70, %cst_24 {dimension_numbers = #tpu.dot_dimension_numbers<[1], [0], [0], [1], [0, 0, 1, 1], [], []>} : vector<8x8xbf16>, vector<8x8xbf16>, vector<8x8xf32> -> vector<8x8xf32>
    %72 = vector.extract_strided_slice %33 {offsets = [0, 16], sizes = [8, 8], strides = [1, 1]} : vector<8x32xbf16> to vector<8x8xbf16>
    %73 = vector.extract_strided_slice %34 {offsets = [0, 16], sizes = [8, 8], strides = [1, 1]} : vector<8x32xbf16> to vector<8x8xbf16>
    %cst_25 = arith.constant dense<0.000000e+00> : vector<8x8xf32>
    %74 = tpu.matmul %72, %73, %cst_25 {dimension_numbers = #tpu.dot_dimension_numbers<[1], [1], [0], [0], [0, 0, 1, 0], [], []>} : vector<8x8xbf16>, vector<8x8xbf16>, vector<8x8xf32> -> vector<8x8xf32>
    %cst_26 = arith.constant 0.353553385 : f32
    %75 = vector.broadcast %cst_26 : f32 to vector<8x8xf32>
    %76 = arith.mulf %74, %75 : vector<8x8xf32>
    %cst_27 = arith.constant dense<0xFF800000> : vector<8xf32>
    %77 = vector.multi_reduction <maximumf>, %76, %cst_27 [1] : vector<8x8xf32> to vector<8xf32>
    %78 = vector.shape_cast %77 : vector<8xf32> to vector<8x1xf32>
    %79 = vector.broadcast %78 : vector<8x1xf32> to vector<8x8xf32>
    %80 = arith.subf %76, %79 : vector<8x8xf32>
    %81 = math.exp %80 : vector<8x8xf32>
    %cst_28 = arith.constant dense<0.000000e+00> : vector<8xf32>
    %82 = vector.multi_reduction <add>, %81, %cst_28 [1] : vector<8x8xf32> to vector<8xf32>
    %83 = vector.shape_cast %82 : vector<8xf32> to vector<8x1xf32>
    %84 = tpu.reciprocal %83 : vector<8x1xf32> -> vector<8x1xf32>
    %85 = vector.broadcast %84 : vector<8x1xf32> to vector<8x8xf32>
    %86 = arith.mulf %81, %85 : vector<8x8xf32>
    %87 = arith.truncf %86 : vector<8x8xf32> to vector<8x8xbf16>
    %88 = vector.extract_strided_slice %35 {offsets = [0, 16], sizes = [8, 8], strides = [1, 1]} : vector<8x32xbf16> to vector<8x8xbf16>
    %cst_29 = arith.constant dense<0.000000e+00> : vector<8x8xf32>
    %89 = tpu.matmul %87, %88, %cst_29 {dimension_numbers = #tpu.dot_dimension_numbers<[1], [0], [0], [1], [0, 0, 1, 1], [], []>} : vector<8x8xbf16>, vector<8x8xbf16>, vector<8x8xf32> -> vector<8x8xf32>
    %90 = vector.extract_strided_slice %33 {offsets = [0, 24], sizes = [8, 8], strides = [1, 1]} : vector<8x32xbf16> to vector<8x8xbf16>
    %91 = vector.extract_strided_slice %34 {offsets = [0, 24], sizes = [8, 8], strides = [1, 1]} : vector<8x32xbf16> to vector<8x8xbf16>
    %cst_30 = arith.constant dense<0.000000e+00> : vector<8x8xf32>
    %92 = tpu.matmul %90, %91, %cst_30 {dimension_numbers = #tpu.dot_dimension_numbers<[1], [1], [0], [0], [0, 0, 1, 0], [], []>} : vector<8x8xbf16>, vector<8x8xbf16>, vector<8x8xf32> -> vector<8x8xf32>
    %cst_31 = arith.constant 0.353553385 : f32
    %93 = vector.broadcast %cst_31 : f32 to vector<8x8xf32>
    %94 = arith.mulf %92, %93 : vector<8x8xf32>
    %cst_32 = arith.constant dense<0xFF800000> : vector<8xf32>
    %95 = vector.multi_reduction <maximumf>, %94, %cst_32 [1] : vector<8x8xf32> to vector<8xf32>
    %96 = vector.shape_cast %95 : vector<8xf32> to vector<8x1xf32>
    %97 = vector.broadcast %96 : vector<8x1xf32> to vector<8x8xf32>
    %98 = arith.subf %94, %97 : vector<8x8xf32>
    %99 = math.exp %98 : vector<8x8xf32>
    %cst_33 = arith.constant dense<0.000000e+00> : vector<8xf32>
    %100 = vector.multi_reduction <add>, %99, %cst_33 [1] : vector<8x8xf32> to vector<8xf32>
    %101 = vector.shape_cast %100 : vector<8xf32> to vector<8x1xf32>
    %102 = tpu.reciprocal %101 : vector<8x1xf32> -> vector<8x1xf32>
    %103 = vector.broadcast %102 : vector<8x1xf32> to vector<8x8xf32>
    %104 = arith.mulf %99, %103 : vector<8x8xf32>
    %105 = arith.truncf %104 : vector<8x8xf32> to vector<8x8xbf16>
    %106 = vector.extract_strided_slice %35 {offsets = [0, 24], sizes = [8, 8], strides = [1, 1]} : vector<8x32xbf16> to vector<8x8xbf16>
    %cst_34 = arith.constant dense<0.000000e+00> : vector<8x8xf32>
    %107 = tpu.matmul %105, %106, %cst_34 {dimension_numbers = #tpu.dot_dimension_numbers<[1], [0], [0], [1], [0, 0, 1, 1], [], []>} : vector<8x8xbf16>, vector<8x8xbf16>, vector<8x8xf32> -> vector<8x8xf32>
    %108 = tpu.concatenate %53, %71, %89, %107 in 1 : vector<8x8xf32>, vector<8x8xf32>, vector<8x8xf32>, vector<8x8xf32> -> vector<8x32xf32>
    %109 = arith.truncf %108 : vector<8x32xf32> to vector<8x32xbf16>
    %c0_35 = arith.constant 0 : index
    %c0_36 = arith.constant 0 : index
    %110 = vector.load %arg27[%c0_35, %c0_36] : memref<8x40xbf16, #tpu.memory_space<vmem>>, vector<8x32xbf16>
    tpu.vector_store %arg27[%c0_35, %c0_36], %109 {strides = array<i32>} : memref<8x40xbf16, #tpu.memory_space<vmem>>, vector<8x32xbf16>,
    %111 = vector.extract_strided_slice %32 {offsets = [0, 96], sizes = [8, 8], strides = [1, 1]} : vector<8x120xbf16> to vector<8x8xbf16>
    %112 = vector.extract_strided_slice %32 {offsets = [0, 104], sizes = [8, 8], strides = [1, 1]} : vector<8x120xbf16> to vector<8x8xbf16>
    %113 = vector.extract_strided_slice %32 {offsets = [0, 112], sizes = [8, 8], strides = [1, 1]} : vector<8x120xbf16> to vector<8x8xbf16>
    %114 = vector.extract_strided_slice %111 {offsets = [0, 0], sizes = [8, 2], strides = [1, 1]} : vector<8x8xbf16> to vector<8x2xbf16>
    %115 = vector.extract_strided_slice %112 {offsets = [0, 0], sizes = [8, 2], strides = [1, 1]} : vector<8x8xbf16> to vector<8x2xbf16>
    %cst_37 = arith.constant dense<0.000000e+00> : vector<8x8xf32>
    %116 = tpu.matmul %114, %115, %cst_37 {dimension_numbers = #tpu.dot_dimension_numbers<[1], [1], [0], [0], [0, 0, 1, 0], [], []>} : vector<8x2xbf16>, vector<8x2xbf16>, vector<8x8xf32> -> vector<8x8xf32>
    %cst_38 = arith.constant 0.353553385 : f32
    %117 = vector.broadcast %cst_38 : f32 to vector<8x8xf32>
    %118 = arith.mulf %116, %117 : vector<8x8xf32>
    %cst_39 = arith.constant dense<0xFF800000> : vector<8xf32>
    %119 = vector.multi_reduction <maximumf>, %118, %cst_39 [1] : vector<8x8xf32> to vector<8xf32>
    %120 = vector.shape_cast %119 : vector<8xf32> to vector<8x1xf32>
    %121 = vector.broadcast %120 : vector<8x1xf32> to vector<8x8xf32>
    %122 = arith.subf %118, %121 : vector<8x8xf32>
    %123 = math.exp %122 : vector<8x8xf32>
    %cst_40 = arith.constant dense<0.000000e+00> : vector<8xf32>
    %124 = vector.multi_reduction <add>, %123, %cst_40 [1] : vector<8x8xf32> to vector<8xf32>
    %125 = vector.shape_cast %124 : vector<8xf32> to vector<8x1xf32>
    %126 = tpu.reciprocal %125 : vector<8x1xf32> -> vector<8x1xf32>
    %127 = vector.broadcast %126 : vector<8x1xf32> to vector<8x8xf32>
    %128 = arith.mulf %123, %127 : vector<8x8xf32>
    %129 = arith.truncf %128 : vector<8x8xf32> to vector<8x8xbf16>
    %130 = vector.extract_strided_slice %113 {offsets = [0, 0], sizes = [8, 2], strides = [1, 1]} : vector<8x8xbf16> to vector<8x2xbf16>
    %cst_41 = arith.constant dense<0.000000e+00> : vector<8x2xf32>
    %131 = tpu.matmul %129, %130, %cst_41 {dimension_numbers = #tpu.dot_dimension_numbers<[1], [0], [0], [1], [0, 0, 1, 1], [], []>} : vector<8x8xbf16>, vector<8x2xbf16>, vector<8x2xf32> -> vector<8x2xf32>
    %132 = vector.extract_strided_slice %111 {offsets = [0, 2], sizes = [8, 2], strides = [1, 1]} : vector<8x8xbf16> to vector<8x2xbf16>
    %133 = vector.extract_strided_slice %112 {offsets = [0, 2], sizes = [8, 2], strides = [1, 1]} : vector<8x8xbf16> to vector<8x2xbf16>
    %cst_42 = arith.constant dense<0.000000e+00> : vector<8x8xf32>
    %134 = tpu.matmul %132, %133, %cst_42 {dimension_numbers = #tpu.dot_dimension_numbers<[1], [1], [0], [0], [0, 0, 1, 0], [], []>} : vector<8x2xbf16>, vector<8x2xbf16>, vector<8x8xf32> -> vector<8x8xf32>
    %cst_43 = arith.constant 0.353553385 : f32
    %135 = vector.broadcast %cst_43 : f32 to vector<8x8xf32>
    %136 = arith.mulf %134, %135 : vector<8x8xf32>
    %cst_44 = arith.constant dense<0xFF800000> : vector<8xf32>
    %137 = vector.multi_reduction <maximumf>, %136, %cst_44 [1] : vector<8x8xf32> to vector<8xf32>
    %138 = vector.shape_cast %137 : vector<8xf32> to vector<8x1xf32>
    %139 = vector.broadcast %138 : vector<8x1xf32> to vector<8x8xf32>
    %140 = arith.subf %136, %139 : vector<8x8xf32>
    %141 = math.exp %140 : vector<8x8xf32>
    %cst_45 = arith.constant dense<0.000000e+00> : vector<8xf32>
    %142 = vector.multi_reduction <add>, %141, %cst_45 [1] : vector<8x8xf32> to vector<8xf32>
    %143 = vector.shape_cast %142 : vector<8xf32> to vector<8x1xf32>
    %144 = tpu.reciprocal %143 : vector<8x1xf32> -> vector<8x1xf32>
    %145 = vector.broadcast %144 : vector<8x1xf32> to vector<8x8xf32>
    %146 = arith.mulf %141, %145 : vector<8x8xf32>
    %147 = arith.truncf %146 : vector<8x8xf32> to vector<8x8xbf16>
    %148 = vector.extract_strided_slice %113 {offsets = [0, 2], sizes = [8, 2], strides = [1, 1]} : vector<8x8xbf16> to vector<8x2xbf16>
    %cst_46 = arith.constant dense<0.000000e+00> : vector<8x2xf32>
    %149 = tpu.matmul %147, %148, %cst_46 {dimension_numbers = #tpu.dot_dimension_numbers<[1], [0], [0], [1], [0, 0, 1, 1], [], []>} : vector<8x8xbf16>, vector<8x2xbf16>, vector<8x2xf32> -> vector<8x2xf32>
    %150 = vector.extract_strided_slice %111 {offsets = [0, 4], sizes = [8, 2], strides = [1, 1]} : vector<8x8xbf16> to vector<8x2xbf16>
    %151 = vector.extract_strided_slice %112 {offsets = [0, 4], sizes = [8, 2], strides = [1, 1]} : vector<8x8xbf16> to vector<8x2xbf16>
    %cst_47 = arith.constant dense<0.000000e+00> : vector<8x8xf32>
    %152 = tpu.matmul %150, %151, %cst_47 {dimension_numbers = #tpu.dot_dimension_numbers<[1], [1], [0], [0], [0, 0, 1, 0], [], []>} : vector<8x2xbf16>, vector<8x2xbf16>, vector<8x8xf32> -> vector<8x8xf32>
    %cst_48 = arith.constant 0.353553385 : f32
    %153 = vector.broadcast %cst_48 : f32 to vector<8x8xf32>
    %154 = arith.mulf %152, %153 : vector<8x8xf32>
    %cst_49 = arith.constant dense<0xFF800000> : vector<8xf32>
    %155 = vector.multi_reduction <maximumf>, %154, %cst_49 [1] : vector<8x8xf32> to vector<8xf32>
    %156 = vector.shape_cast %155 : vector<8xf32> to vector<8x1xf32>
    %157 = vector.broadcast %156 : vector<8x1xf32> to vector<8x8xf32>
    %158 = arith.subf %154, %157 : vector<8x8xf32>
    %159 = math.exp %158 : vector<8x8xf32>
    %cst_50 = arith.constant dense<0.000000e+00> : vector<8xf32>
    %160 = vector.multi_reduction <add>, %159, %cst_50 [1] : vector<8x8xf32> to vector<8xf32>
    %161 = vector.shape_cast %160 : vector<8xf32> to vector<8x1xf32>
    %162 = tpu.reciprocal %161 : vector<8x1xf32> -> vector<8x1xf32>
    %163 = vector.broadcast %162 : vector<8x1xf32> to vector<8x8xf32>
    %164 = arith.mulf %159, %163 : vector<8x8xf32>
    %165 = arith.truncf %164 : vector<8x8xf32> to vector<8x8xbf16>
    %166 = vector.extract_strided_slice %113 {offsets = [0, 4], sizes = [8, 2], strides = [1, 1]} : vector<8x8xbf16> to vector<8x2xbf16>
    %cst_51 = arith.constant dense<0.000000e+00> : vector<8x2xf32>
    %167 = tpu.matmul %165, %166, %cst_51 {dimension_numbers = #tpu.dot_dimension_numbers<[1], [0], [0], [1], [0, 0, 1, 1], [], []>} : vector<8x8xbf16>, vector<8x2xbf16>, vector<8x2xf32> -> vector<8x2xf32>
    %168 = vector.extract_strided_slice %111 {offsets = [0, 6], sizes = [8, 2], strides = [1, 1]} : vector<8x8xbf16> to vector<8x2xbf16>
    %169 = vector.extract_strided_slice %112 {offsets = [0, 6], sizes = [8, 2], strides = [1, 1]} : vector<8x8xbf16> to vector<8x2xbf16>
    %cst_52 = arith.constant dense<0.000000e+00> : vector<8x8xf32>
    %170 = tpu.matmul %168, %169, %cst_52 {dimension_numbers = #tpu.dot_dimension_numbers<[1], [1], [0], [0], [0, 0, 1, 0], [], []>} : vector<8x2xbf16>, vector<8x2xbf16>, vector<8x8xf32> -> vector<8x8xf32>
    %cst_53 = arith.constant 0.353553385 : f32
    %171 = vector.broadcast %cst_53 : f32 to vector<8x8xf32>
    %172 = arith.mulf %170, %171 : vector<8x8xf32>
    %cst_54 = arith.constant dense<0xFF800000> : vector<8xf32>
    %173 = vector.multi_reduction <maximumf>, %172, %cst_54 [1] : vector<8x8xf32> to vector<8xf32>
    %174 = vector.shape_cast %173 : vector<8xf32> to vector<8x1xf32>
    %175 = vector.broadcast %174 : vector<8x1xf32> to vector<8x8xf32>
    %176 = arith.subf %172, %175 : vector<8x8xf32>
    %177 = math.exp %176 : vector<8x8xf32>
    %cst_55 = arith.constant dense<0.000000e+00> : vector<8xf32>
    %178 = vector.multi_reduction <add>, %177, %cst_55 [1] : vector<8x8xf32> to vector<8xf32>
    %179 = vector.shape_cast %178 : vector<8xf32> to vector<8x1xf32>
    %180 = tpu.reciprocal %179 : vector<8x1xf32> -> vector<8x1xf32>
    %181 = vector.broadcast %180 : vector<8x1xf32> to vector<8x8xf32>
    %182 = arith.mulf %177, %181 : vector<8x8xf32>
    %183 = arith.truncf %182 : vector<8x8xf32> to vector<8x8xbf16>
    %184 = vector.extract_strided_slice %113 {offsets = [0, 6], sizes = [8, 2], strides = [1, 1]} : vector<8x8xbf16> to vector<8x2xbf16>
    %cst_56 = arith.constant dense<0.000000e+00> : vector<8x2xf32>
    %185 = tpu.matmul %183, %184, %cst_56 {dimension_numbers = #tpu.dot_dimension_numbers<[1], [0], [0], [1], [0, 0, 1, 1], [], []>} : vector<8x8xbf16>, vector<8x2xbf16>, vector<8x2xf32> -> vector<8x2xf32>
    %186 = tpu.concatenate %131, %149, %167, %185 in 1 : vector<8x2xf32>, vector<8x2xf32>, vector<8x2xf32>, vector<8x2xf32> -> vector<8x8xf32>
    %187 = arith.truncf %186 : vector<8x8xf32> to vector<8x8xbf16>
    %c0_57 = arith.constant 0 : index
    %c32 = arith.constant 32 : index
    %188 = vector.load %arg27[%c0_57, %c32] : memref<8x40xbf16, #tpu.memory_space<vmem>>, vector<8x8xbf16>
    tpu.vector_store %arg27[%c0_57, %c32], %187 {strides = array<i32>} : memref<8x40xbf16, #tpu.memory_space<vmem>>, vector<8x8xbf16>,
    %c0_58 = arith.constant 0 : index
    %c0_59 = arith.constant 0 : index
    %189 = vector.load %arg27[%c0_58, %c0_59] : memref<8x40xbf16, #tpu.memory_space<vmem>>, vector<8x40xbf16>
    %c0_60 = arith.constant 0 : index
    %c0_61 = arith.constant 0 : index
    %190 = vector.load %arg6[%c0_60, %c0_61] : memref<40x32xbf16, #tpu.memory_space<vmem>>, vector<40x32xbf16>
    %cst_62 = arith.constant dense<0.000000e+00> : vector<8x32xf32>
    %191 = tpu.matmul %189, %190, %cst_62 {dimension_numbers = #tpu.dot_dimension_numbers<[1], [0], [0], [1], [0, 0, 1, 1], [], []>} : vector<8x40xbf16>, vector<40x32xbf16>, vector<8x32xf32> -> vector<8x32xf32>
    %c0_63 = arith.constant 0 : index
    %c0_64 = arith.constant 0 : index
    %192 = vector.load %arg7[%c0_63, %c0_64] : memref<1x32xf32, #tpu.memory_space<vmem>>, vector<1x32xf32>
    %193 = vector.broadcast %192 : vector<1x32xf32> to vector<8x32xf32>
    %194 = arith.addf %191, %193 : vector<8x32xf32>
    %c0_65 = arith.constant 0 : index
    %c0_66 = arith.constant 0 : index
    %195 = vector.load %arg14[%c0_65, %c0_66] : memref<1x32xf32, #tpu.memory_space<vmem>>, vector<1x32xf32>
    %c0_67 = arith.constant 0 : index
    %c0_68 = arith.constant 0 : index
    %196 = vector.load %arg15[%c0_67, %c0_68] : memref<1x32xf32, #tpu.memory_space<vmem>>, vector<1x32xf32>
    %c0_69 = arith.constant 0 : index
    %c0_70 = arith.constant 0 : index
    %197 = vector.load %arg16[%c0_69, %c0_70] : memref<32x128xbf16, #tpu.memory_space<vmem>>, vector<32x128xbf16>
    %c0_71 = arith.constant 0 : index
    %c0_72 = arith.constant 0 : index
    %198 = vector.load %arg17[%c0_71, %c0_72] : memref<1x128xf32, #tpu.memory_space<vmem>>, vector<1x128xf32>
    %c0_73 = arith.constant 0 : index
    %c0_74 = arith.constant 0 : index
    %199 = vector.load %arg18[%c0_73, %c0_74] : memref<128x32xbf16, #tpu.memory_space<vmem>>, vector<128x32xbf16>
    %c0_75 = arith.constant 0 : index
    %c0_76 = arith.constant 0 : index
    %200 = vector.load %arg19[%c0_75, %c0_76] : memref<1x32xf32, #tpu.memory_space<vmem>>, vector<1x32xf32>
    %cst_77 = arith.constant dense<0.000000e+00> : vector<8xf32>
    %201 = vector.multi_reduction <add>, %194, %cst_77 [1] : vector<8x32xf32> to vector<8xf32>
    %202 = vector.shape_cast %201 : vector<8xf32> to vector<8x1xf32>
    %cst_78 = arith.constant 3.200000e+01 : f32
    %203 = vector.broadcast %cst_78 : f32 to vector<8x1xf32>
    %204 = arith.divf %202, %203 : vector<8x1xf32>
    %205 = vector.broadcast %204 : vector<8x1xf32> to vector<8x32xf32>
    %206 = arith.subf %194, %205 : vector<8x32xf32>
    %207 = arith.mulf %206, %206 : vector<8x32xf32>
    %cst_79 = arith.constant dense<0.000000e+00> : vector<8xf32>
    %208 = vector.multi_reduction <add>, %207, %cst_79 [1] : vector<8x32xf32> to vector<8xf32>
    %209 = vector.shape_cast %208 : vector<8xf32> to vector<8x1xf32>
    %cst_80 = arith.constant 3.200000e+01 : f32
    %210 = vector.broadcast %cst_80 : f32 to vector<8x1xf32>
    %211 = arith.divf %209, %210 : vector<8x1xf32>
    %212 = vector.broadcast %204 : vector<8x1xf32> to vector<8x32xf32>
    %213 = arith.subf %194, %212 : vector<8x32xf32>
    %cst_81 = arith.constant 9.99999974E-6 : f32
    %214 = vector.broadcast %cst_81 : f32 to vector<8x1xf32>
    %215 = arith.addf %211, %214 : vector<8x1xf32>
    %216 = math.rsqrt %215 : vector<8x1xf32>
    %217 = vector.broadcast %216 : vector<8x1xf32> to vector<8x32xf32>
    %218 = arith.mulf %213, %217 : vector<8x32xf32>
    %219 = vector.broadcast %195 : vector<1x32xf32> to vector<8x32xf32>
    %220 = arith.mulf %218, %219 : vector<8x32xf32>
    %221 = vector.broadcast %196 : vector<1x32xf32> to vector<8x32xf32>
    %222 = arith.addf %220, %221 : vector<8x32xf32>
    %223 = arith.truncf %222 : vector<8x32xf32> to vector<8x32xbf16>
    %cst_82 = arith.constant dense<0.000000e+00> : vector<8x128xf32>
    %224 = tpu.matmul %223, %197, %cst_82 {dimension_numbers = #tpu.dot_dimension_numbers<[1], [0], [0], [1], [0, 0, 1, 1], [], []>} : vector<8x32xbf16>, vector<32x128xbf16>, vector<8x128xf32> -> vector<8x128xf32>
    %225 = vector.broadcast %198 : vector<1x128xf32> to vector<8x128xf32>
    %226 = arith.addf %224, %225 : vector<8x128xf32>
    %cst_83 = arith.constant 5.000000e-01 : f32
    %227 = vector.broadcast %cst_83 : f32 to vector<8x128xf32>
    %228 = arith.mulf %227, %226 : vector<8x128xf32>
    %cst_84 = arith.constant 4.471500e-02 : f32
    %229 = vector.broadcast %cst_84 : f32 to vector<8x128xf32>
    %230 = arith.mulf %229, %226 : vector<8x128xf32>
    %231 = arith.mulf %230, %226 : vector<8x128xf32>
    %232 = arith.mulf %231, %226 : vector<8x128xf32>
    %233 = arith.addf %226, %232 : vector<8x128xf32>
    %cst_85 = arith.constant 0.797884583 : f32
    %234 = vector.broadcast %cst_85 : f32 to vector<8x128xf32>
    %235 = arith.mulf %234, %233 : vector<8x128xf32>
    %236 = math.tanh %235 : vector<8x128xf32>
    %cst_86 = arith.constant 1.000000e+00 : f32
    %237 = vector.broadcast %cst_86 : f32 to vector<8x128xf32>
    %238 = arith.addf %237, %236 : vector<8x128xf32>
    %239 = arith.mulf %228, %238 : vector<8x128xf32>
    %240 = arith.truncf %239 : vector<8x128xf32> to vector<8x128xbf16>
    %cst_87 = arith.constant dense<0.000000e+00> : vector<8x32xf32>
    %241 = tpu.matmul %240, %199, %cst_87 {dimension_numbers = #tpu.dot_dimension_numbers<[1], [0], [0], [1], [0, 0, 1, 1], [], []>} : vector<8x128xbf16>, vector<128x32xbf16>, vector<8x32xf32> -> vector<8x32xf32>
    %242 = vector.broadcast %200 : vector<1x32xf32> to vector<8x32xf32>
    %243 = arith.addf %241, %242 : vector<8x32xf32>
    %244 = arith.addf %194, %243 : vector<8x32xf32>
    %245 = arith.addf %194, %244 : vector<8x32xf32>
    %246 = arith.addf %1, %245 : vector<8x32xf32>
    %c0_88 = arith.constant 0 : index
    %c0_89 = arith.constant 0 : index
    %247 = vector.load %arg8[%c0_88, %c0_89] : memref<1x32xf32, #tpu.memory_space<vmem>>, vector<1x32xf32>
    %c0_90 = arith.constant 0 : index
    %c0_91 = arith.constant 0 : index
    %248 = vector.load %arg9[%c0_90, %c0_91] : memref<1x32xf32, #tpu.memory_space<vmem>>, vector<1x32xf32>
    %cst_92 = arith.constant dense<0.000000e+00> : vector<8xf32>
    %249 = vector.multi_reduction <add>, %246, %cst_92 [1] : vector<8x32xf32> to vector<8xf32>
    %250 = vector.shape_cast %249 : vector<8xf32> to vector<8x1xf32>
    %cst_93 = arith.constant 3.200000e+01 : f32
    %251 = vector.broadcast %cst_93 : f32 to vector<8x1xf32>
    %252 = arith.divf %250, %251 : vector<8x1xf32>
    %253 = vector.broadcast %252 : vector<8x1xf32> to vector<8x32xf32>
    %254 = arith.subf %246, %253 : vector<8x32xf32>
    %255 = arith.mulf %254, %254 : vector<8x32xf32>
    %cst_94 = arith.constant dense<0.000000e+00> : vector<8xf32>
    %256 = vector.multi_reduction <add>, %255, %cst_94 [1] : vector<8x32xf32> to vector<8xf32>
    %257 = vector.shape_cast %256 : vector<8xf32> to vector<8x1xf32>
    %cst_95 = arith.constant 3.200000e+01 : f32
    %258 = vector.broadcast %cst_95 : f32 to vector<8x1xf32>
    %259 = arith.divf %257, %258 : vector<8x1xf32>
    %260 = vector.broadcast %252 : vector<8x1xf32> to vector<8x32xf32>
    %261 = arith.subf %246, %260 : vector<8x32xf32>
    %cst_96 = arith.constant 9.99999974E-6 : f32
    %262 = vector.broadcast %cst_96 : f32 to vector<8x1xf32>
    %263 = arith.addf %259, %262 : vector<8x1xf32>
    %264 = math.rsqrt %263 : vector<8x1xf32>
    %265 = vector.broadcast %264 : vector<8x1xf32> to vector<8x32xf32>
    %266 = arith.mulf %261, %265 : vector<8x32xf32>
    %267 = vector.broadcast %247 : vector<1x32xf32> to vector<8x32xf32>
    %268 = arith.mulf %266, %267 : vector<8x32xf32>
    %269 = vector.broadcast %248 : vector<1x32xf32> to vector<8x32xf32>
    %270 = arith.addf %268, %269 : vector<8x32xf32>
    %271 = arith.truncf %270 : vector<8x32xf32> to vector<8x32xbf16>
    %c0_97 = arith.constant 0 : index
    %c0_98 = arith.constant 0 : index
    %272 = vector.load %arg10[%c0_97, %c0_98] : memref<32x128xbf16, #tpu.memory_space<vmem>>, vector<32x128xbf16>
    %cst_99 = arith.constant dense<0.000000e+00> : vector<8x128xf32>
    %273 = tpu.matmul %271, %272, %cst_99 {dimension_numbers = #tpu.dot_dimension_numbers<[1], [0], [0], [1], [0, 0, 1, 1], [], []>} : vector<8x32xbf16>, vector<32x128xbf16>, vector<8x128xf32> -> vector<8x128xf32>
    %c0_100 = arith.constant 0 : index
    %c0_101 = arith.constant 0 : index
    %274 = vector.load %arg11[%c0_100, %c0_101] : memref<1x128xf32, #tpu.memory_space<vmem>>, vector<1x128xf32>
    %275 = vector.broadcast %274 : vector<1x128xf32> to vector<8x128xf32>
    %276 = arith.addf %273, %275 : vector<8x128xf32>
    %cst_102 = arith.constant 5.000000e-01 : f32
    %277 = vector.broadcast %cst_102 : f32 to vector<8x128xf32>
    %278 = arith.mulf %277, %276 : vector<8x128xf32>
    %cst_103 = arith.constant 4.471500e-02 : f32
    %279 = vector.broadcast %cst_103 : f32 to vector<8x128xf32>
    %280 = arith.mulf %279, %276 : vector<8x128xf32>
    %281 = arith.mulf %280, %276 : vector<8x128xf32>
    %282 = arith.mulf %281, %276 : vector<8x128xf32>
    %283 = arith.addf %276, %282 : vector<8x128xf32>
    %cst_104 = arith.constant 0.797884583 : f32
    %284 = vector.broadcast %cst_104 : f32 to vector<8x128xf32>
    %285 = arith.mulf %284, %283 : vector<8x128xf32>
    %286 = math.tanh %285 : vector<8x128xf32>
    %cst_105 = arith.constant 1.000000e+00 : f32
    %287 = vector.broadcast %cst_105 : f32 to vector<8x128xf32>
    %288 = arith.addf %287, %286 : vector<8x128xf32>
    %289 = arith.mulf %278, %288 : vector<8x128xf32>
    %290 = arith.truncf %289 : vector<8x128xf32> to vector<8x128xbf16>
    %c0_106 = arith.constant 0 : index
    %c0_107 = arith.constant 0 : index
    %291 = vector.load %arg12[%c0_106, %c0_107] : memref<128x32xbf16, #tpu.memory_space<vmem>>, vector<128x32xbf16>
    %cst_108 = arith.constant dense<0.000000e+00> : vector<8x32xf32>
    %292 = tpu.matmul %290, %291, %cst_108 {dimension_numbers = #tpu.dot_dimension_numbers<[1], [0], [0], [1], [0, 0, 1, 1], [], []>} : vector<8x128xbf16>, vector<128x32xbf16>, vector<8x32xf32> -> vector<8x32xf32>
    %c0_109 = arith.constant 0 : index
    %c0_110 = arith.constant 0 : index
    %293 = vector.load %arg13[%c0_109, %c0_110] : memref<1x32xf32, #tpu.memory_space<vmem>>, vector<1x32xf32>
    %294 = vector.broadcast %293 : vector<1x32xf32> to vector<8x32xf32>
    %295 = arith.addf %292, %294 : vector<8x32xf32>
    %c0_111 = arith.constant 0 : index
    %c0_112 = arith.constant 0 : index
    %296 = vector.load %arg20[%c0_111, %c0_112] : memref<1x32xf32, #tpu.memory_space<vmem>>, vector<1x32xf32>
    %c0_113 = arith.constant 0 : index
    %c0_114 = arith.constant 0 : index
    %297 = vector.load %arg21[%c0_113, %c0_114] : memref<1x32xf32, #tpu.memory_space<vmem>>, vector<1x32xf32>
    %c0_115 = arith.constant 0 : index
    %c0_116 = arith.constant 0 : index
    %298 = vector.load %arg22[%c0_115, %c0_116] : memref<32x128xbf16, #tpu.memory_space<vmem>>, vector<32x128xbf16>
    %c0_117 = arith.constant 0 : index
    %c0_118 = arith.constant 0 : index
    %299 = vector.load %arg23[%c0_117, %c0_118] : memref<1x128xf32, #tpu.memory_space<vmem>>, vector<1x128xf32>
    %c0_119 = arith.constant 0 : index
    %c0_120 = arith.constant 0 : index
    %300 = vector.load %arg24[%c0_119, %c0_120] : memref<128x32xbf16, #tpu.memory_space<vmem>>, vector<128x32xbf16>
    %c0_121 = arith.constant 0 : index
    %c0_122 = arith.constant 0 : index
    %301 = vector.load %arg25[%c0_121, %c0_122] : memref<1x32xf32, #tpu.memory_space<vmem>>, vector<1x32xf32>
    %cst_123 = arith.constant dense<0.000000e+00> : vector<8xf32>
    %302 = vector.multi_reduction <add>, %295, %cst_123 [1] : vector<8x32xf32> to vector<8xf32>
    %303 = vector.shape_cast %302 : vector<8xf32> to vector<8x1xf32>
    %cst_124 = arith.constant 3.200000e+01 : f32
    %304 = vector.broadcast %cst_124 : f32 to vector<8x1xf32>
    %305 = arith.divf %303, %304 : vector<8x1xf32>
    %306 = vector.broadcast %305 : vector<8x1xf32> to vector<8x32xf32>
    %307 = arith.subf %295, %306 : vector<8x32xf32>
    %308 = arith.mulf %307, %307 : vector<8x32xf32>
    %cst_125 = arith.constant dense<0.000000e+00> : vector<8xf32>
    %309 = vector.multi_reduction <add>, %308, %cst_125 [1] : vector<8x32xf32> to vector<8xf32>
    %310 = vector.shape_cast %309 : vector<8xf32> to vector<8x1xf32>
    %cst_126 = arith.constant 3.200000e+01 : f32
    %311 = vector.broadcast %cst_126 : f32 to vector<8x1xf32>
    %312 = arith.divf %310, %311 : vector<8x1xf32>
    %313 = vector.broadcast %305 : vector<8x1xf32> to vector<8x32xf32>
    %314 = arith.subf %295, %313 : vector<8x32xf32>
    %cst_127 = arith.constant 9.99999974E-6 : f32
    %315 = vector.broadcast %cst_127 : f32 to vector<8x1xf32>
    %316 = arith.addf %312, %315 : vector<8x1xf32>
    %317 = math.rsqrt %316 : vector<8x1xf32>
    %318 = vector.broadcast %317 : vector<8x1xf32> to vector<8x32xf32>
    %319 = arith.mulf %314, %318 : vector<8x32xf32>
    %320 = vector.broadcast %296 : vector<1x32xf32> to vector<8x32xf32>
    %321 = arith.mulf %319, %320 : vector<8x32xf32>
    %322 = vector.broadcast %297 : vector<1x32xf32> to vector<8x32xf32>
    %323 = arith.addf %321, %322 : vector<8x32xf32>
    %324 = arith.truncf %323 : vector<8x32xf32> to vector<8x32xbf16>
    %cst_128 = arith.constant dense<0.000000e+00> : vector<8x128xf32>
    %325 = tpu.matmul %324, %298, %cst_128 {dimension_numbers = #tpu.dot_dimension_numbers<[1], [0], [0], [1], [0, 0, 1, 1], [], []>} : vector<8x32xbf16>, vector<32x128xbf16>, vector<8x128xf32> -> vector<8x128xf32>
    %326 = vector.broadcast %299 : vector<1x128xf32> to vector<8x128xf32>
    %327 = arith.addf %325, %326 : vector<8x128xf32>
    %cst_129 = arith.constant 5.000000e-01 : f32
    %328 = vector.broadcast %cst_129 : f32 to vector<8x128xf32>
    %329 = arith.mulf %328, %327 : vector<8x128xf32>
    %cst_130 = arith.constant 4.471500e-02 : f32
    %330 = vector.broadcast %cst_130 : f32 to vector<8x128xf32>
    %331 = arith.mulf %330, %327 : vector<8x128xf32>
    %332 = arith.mulf %331, %327 : vector<8x128xf32>
    %333 = arith.mulf %332, %327 : vector<8x128xf32>
    %334 = arith.addf %327, %333 : vector<8x128xf32>
    %cst_131 = arith.constant 0.797884583 : f32
    %335 = vector.broadcast %cst_131 : f32 to vector<8x128xf32>
    %336 = arith.mulf %335, %334 : vector<8x128xf32>
    %337 = math.tanh %336 : vector<8x128xf32>
    %cst_132 = arith.constant 1.000000e+00 : f32
    %338 = vector.broadcast %cst_132 : f32 to vector<8x128xf32>
    %339 = arith.addf %338, %337 : vector<8x128xf32>
    %340 = arith.mulf %329, %339 : vector<8x128xf32>
    %341 = arith.truncf %340 : vector<8x128xf32> to vector<8x128xbf16>
    %cst_133 = arith.constant dense<0.000000e+00> : vector<8x32xf32>
    %342 = tpu.matmul %341, %300, %cst_133 {dimension_numbers = #tpu.dot_dimension_numbers<[1], [0], [0], [1], [0, 0, 1, 1], [], []>} : vector<8x128xbf16>, vector<128x32xbf16>, vector<8x32xf32> -> vector<8x32xf32>
    %343 = vector.broadcast %301 : vector<1x32xf32> to vector<8x32xf32>
    %344 = arith.addf %342, %343 : vector<8x32xf32>
    %345 = arith.addf %295, %344 : vector<8x32xf32>
    %346 = arith.addf %295, %345 : vector<8x32xf32>
    %347 = arith.addf %246, %346 : vector<8x32xf32>
    %c0_134 = arith.constant 0 : index
    %c0_135 = arith.constant 0 : index
    %c0_136 = arith.constant 0 : index
    %348 = vector.load %arg26[%c0_134, %c0_135, %c0_136] : memref<1x8x32xf32, #tpu.memory_space<vmem>>, vector<1x8x32xf32>
    %349 = vector.shape_cast %348 : vector<1x8x32xf32> to vector<8x32xf32>
    %350 = vector.shape_cast %347 : vector<8x32xf32> to vector<1x8x32xf32>
    tpu.vector_store %arg26[%c0_134, %c0_135, %c0_136], %350 {strides = array<i32>} : memref<1x8x32xf32, #tpu.memory_space<vmem>>, vector<1x8x32xf32>,
    return
  }
  func.func @transform_0(%arg0: i32) -> (i32, i32, i32) {
    %c0_i32 = arith.constant 0 : i32
    %c0_i32_0 = arith.constant 0 : i32
    %c0_i32_1 = arith.constant 0 : i32
    return %arg0, %c0_i32, %c0_i32_0 : i32, i32, i32
  }
  func.func @transform_1(%arg0: i32) -> (i32, i32) {
    %c0_i32 = arith.constant 0 : i32
    %c0_i32_0 = arith.constant 0 : i32
    %c0_i32_1 = arith.constant 0 : i32
    return %c0_i32, %c0_i32_0 : i32, i32
  }
  func.func @transform_2(%arg0: i32) -> (i32, i32) {
    %c0_i32 = arith.constant 0 : i32
    %c0_i32_0 = arith.constant 0 : i32
    %c0_i32_1 = arith.constant 0 : i32
    return %c0_i32, %c0_i32_0 : i32, i32
  }
  func.func @transform_3(%arg0: i32) -> (i32, i32) {
    %c0_i32 = arith.constant 0 : i32
    %c0_i32_0 = arith.constant 0 : i32
    %c0_i32_1 = arith.constant 0 : i32
    return %c0_i32, %c0_i32_0 : i32, i32
  }
  func.func @transform_4(%arg0: i32) -> (i32, i32) {
    %c0_i32 = arith.constant 0 : i32
    %c0_i32_0 = arith.constant 0 : i32
    %c0_i32_1 = arith.constant 0 : i32
    return %c0_i32, %c0_i32_0 : i32, i32
  }
  func.func @transform_5(%arg0: i32) -> (i32, i32) {
    %c0_i32 = arith.constant 0 : i32
    %c0_i32_0 = arith.constant 0 : i32
    %c0_i32_1 = arith.constant 0 : i32
    return %c0_i32, %c0_i32_0 : i32, i32
  }
  func.func @transform_6(%arg0: i32) -> (i32, i32) {
    %c0_i32 = arith.constant 0 : i32
    %c0_i32_0 = arith.constant 0 : i32
    %c0_i32_1 = arith.constant 0 : i32
    return %c0_i32, %c0_i32_0 : i32, i32
  }
  func.func @transform_7(%arg0: i32) -> (i32, i32) {
    %c0_i32 = arith.constant 0 : i32
    %c0_i32_0 = arith.constant 0 : i32
    %c0_i32_1 = arith.constant 0 : i32
    return %c0_i32, %c0_i32_0 : i32, i32
  }
  func.func @transform_8(%arg0: i32) -> (i32, i32) {
    %c0_i32 = arith.constant 0 : i32
    %c0_i32_0 = arith.constant 0 : i32
    %c0_i32_1 = arith.constant 0 : i32
    return %c0_i32, %c0_i32_0 : i32, i32
  }
  func.func @transform_9(%arg0: i32) -> (i32, i32) {
    %c0_i32 = arith.constant 0 : i32
    %c0_i32_0 = arith.constant 0 : i32
    %c0_i32_1 = arith.constant 0 : i32
    return %c0_i32, %c0_i32_0 : i32, i32
  }
  func.func @transform_10(%arg0: i32) -> (i32, i32) {
    %c0_i32 = arith.constant 0 : i32
    %c0_i32_0 = arith.constant 0 : i32
    %c0_i32_1 = arith.constant 0 : i32
    return %c0_i32, %c0_i32_0 : i32, i32
  }
  func.func @transform_11(%arg0: i32) -> (i32, i32) {
    %c0_i32 = arith.constant 0 : i32
    %c0_i32_0 = arith.constant 0 : i32
    %c0_i32_1 = arith.constant 0 : i32
    return %c0_i32, %c0_i32_0 : i32, i32
  }
  func.func @transform_12(%arg0: i32) -> (i32, i32) {
    %c0_i32 = arith.constant 0 : i32
    %c0_i32_0 = arith.constant 0 : i32
    %c0_i32_1 = arith.constant 0 : i32
    return %c0_i32, %c0_i32_0 : i32, i32
  }
  func.func @transform_13(%arg0: i32) -> (i32, i32) {
    %c0_i32 = arith.constant 0 : i32
    %c0_i32_0 = arith.constant 0 : i32
    %c0_i32_1 = arith.constant 0 : i32
    return %c0_i32, %c0_i32_0 : i32, i32
  }
  func.func @transform_14(%arg0: i32) -> (i32, i32) {
    %c0_i32 = arith.constant 0 : i32
    %c0_i32_0 = arith.constant 0 : i32
    %c0_i32_1 = arith.constant 0 : i32
    return %c0_i32, %c0_i32_0 : i32, i32
  }
  func.func @transform_15(%arg0: i32) -> (i32, i32) {
    %c0_i32 = arith.constant 0 : i32
    %c0_i32_0 = arith.constant 0 : i32
    %c0_i32_1 = arith.constant 0 : i32
    return %c0_i32, %c0_i32_0 : i32, i32
  }
  func.func @transform_16(%arg0: i32) -> (i32, i32) {
    %c0_i32 = arith.constant 0 : i32
    %c0_i32_0 = arith.constant 0 : i32
    %c0_i32_1 = arith.constant 0 : i32
    return %c0_i32, %c0_i32_0 : i32, i32
  }
  func.func @transform_17(%arg0: i32) -> (i32, i32) {
    %c0_i32 = arith.constant 0 : i32
    %c0_i32_0 = arith.constant 0 : i32
    %c0_i32_1 = arith.constant 0 : i32
    return %c0_i32, %c0_i32_0 : i32, i32
  }
  func.func @transform_18(%arg0: i32) -> (i32, i32) {
    %c0_i32 = arith.constant 0 : i32
    %c0_i32_0 = arith.constant 0 : i32
    %c0_i32_1 = arith.constant 0 : i32
    return %c0_i32, %c0_i32_0 : i32, i32
  }
  func.func @transform_19(%arg0: i32) -> (i32, i32) {
    %c0_i32 = arith.constant 0 : i32
    %c0_i32_0 = arith.constant 0 : i32
    %c0_i32_1 = arith.constant 0 : i32
    return %c0_i32, %c0_i32_0 : i32, i32
  }
  func.func @transform_20(%arg0: i32) -> (i32, i32) {
    %c0_i32 = arith.constant 0 : i32
    %c0_i32_0 = arith.constant 0 : i32
    %c0_i32_1 = arith.constant 0 : i32
    return %c0_i32, %c0_i32_0 : i32, i32
  }
  func.func @transform_21(%arg0: i32) -> (i32, i32) {
    %c0_i32 = arith.constant 0 : i32
    %c0_i32_0 = arith.constant 0 : i32
    %c0_i32_1 = arith.constant 0 : i32
    return %c0_i32, %c0_i32_0 : i32, i32
  }
  func.func @transform_22(%arg0: i32) -> (i32, i32) {
    %c0_i32 = arith.constant 0 : i32
    %c0_i32_0 = arith.constant 0 : i32
    %c0_i32_1 = arith.constant 0 : i32
    return %c0_i32, %c0_i32_0 : i32, i32
  }
  func.func @transform_23(%arg0: i32) -> (i32, i32) {
    %c0_i32 = arith.constant 0 : i32
    %c0_i32_0 = arith.constant 0 : i32
    %c0_i32_1 = arith.constant 0 : i32
    return %c0_i32, %c0_i32_0 : i32, i32
  }
  func.func @transform_24(%arg0: i32) -> (i32, i32) {
    %c0_i32 = arith.constant 0 : i32
    %c0_i32_0 = arith.constant 0 : i32
    %c0_i32_1 = arith.constant 0 : i32
    return %c0_i32, %c0_i32_0 : i32, i32
  }
  func.func @transform_25(%arg0: i32) -> (i32, i32, i32) {
    %c0_i32 = arith.constant 0 : i32
    %c0_i32_0 = arith.constant 0 : i32
    %c0_i32_1 = arith.constant 0 : i32
    return %arg0, %c0_i32, %c0_i32_0 : i32, i32, i32
  }
}

module attributes {stable_mosaic.version = 11 : i64} {
  func.func @_block_kernel(%arg0: i32, %arg1: memref<1x8x32xf32, #tpu.memory_space<vmem>>, %arg2: memref<1x32xf32, #tpu.memory_space<vmem>>, %arg3: memref<1x32xf32, #tpu.memory_space<vmem>>, %arg4: memref<32x120xbf16, #tpu.memory_space<vmem>>, %arg5: memref<1x120xf32, #tpu.memory_space<vmem>>, %arg6: memref<40x32xbf16, #tpu.memory_space<vmem>>, %arg7: memref<1x32xf32, #tpu.memory_space<vmem>>, %arg8: memref<1x32xf32, #tpu.memory_space<vmem>>, %arg9: memref<1x32xf32, #tpu.memory_space<vmem>>, %arg10: memref<32x128xbf16, #tpu.memory_space<vmem>>, %arg11: memref<1x128xf32, #tpu.memory_space<vmem>>, %arg12: memref<128x32xbf16, #tpu.memory_space<vmem>>, %arg13: memref<1x32xf32, #tpu.memory_space<vmem>>, %arg14: memref<1x32xf32, #tpu.memory_space<vmem>>, %arg15: memref<1x32xf32, #tpu.memory_space<vmem>>, %arg16: memref<32x128xbf16, #tpu.memory_space<vmem>>, %arg17: memref<1x128xf32, #tpu.memory_space<vmem>>, %arg18: memref<128x32xbf16, #tpu.memory_space<vmem>>, %arg19: memref<1x32xf32, #tpu.memory_space<vmem>>, %arg20: memref<1x32xf32, #tpu.memory_space<vmem>>, %arg21: memref<1x32xf32, #tpu.memory_space<vmem>>, %arg22: memref<32x128xbf16, #tpu.memory_space<vmem>>, %arg23: memref<1x128xf32, #tpu.memory_space<vmem>>, %arg24: memref<128x32xbf16, #tpu.memory_space<vmem>>, %arg25: memref<1x32xf32, #tpu.memory_space<vmem>>, %arg26: memref<1x8x32xf32, #tpu.memory_space<vmem>>, %arg27: memref<8x40xbf16, #tpu.memory_space<vmem>>) attributes {dimension_semantics = [#tpu.dimension_semantics<parallel>], iteration_bounds = array<i64: 2>, scalar_prefetch = 0 : i64, scratch_operands = 1 : i64, tpu.core_type = #tpu.core_type<tc>, window_params = [{transform_indices = @transform_0, window_bounds = array<i64: 1, 8, 32>}, {pipeline_mode = #tpu.pipeline_mode<synchronous>, transform_indices = @transform_1, window_bounds = array<i64: 1, 32>}, {pipeline_mode = #tpu.pipeline_mode<synchronous>, transform_indices = @transform_2, window_bounds = array<i64: 1, 32>}, {pipeline_mode = #tpu.pipeline_mode<synchronous>, transform_indices = @transform_3, window_bounds = array<i64: 32, 120>}, {pipeline_mode = #tpu.pipeline_mode<synchronous>, transform_indices = @transform_4, window_bounds = array<i64: 1, 120>}, {pipeline_mode = #tpu.pipeline_mode<synchronous>, transform_indices = @transform_5, window_bounds = array<i64: 40, 32>}, {pipeline_mode = #tpu.pipeline_mode<synchronous>, transform_indices = @transform_6, window_bounds = array<i64: 1, 32>}, {pipeline_mode = #tpu.pipeline_mode<synchronous>, transform_indices = @transform_7, window_bounds = array<i64: 1, 32>}, {pipeline_mode = #tpu.pipeline_mode<synchronous>, transform_indices = @transform_8, window_bounds = array<i64: 1, 32>}, {pipeline_mode = #tpu.pipeline_mode<synchronous>, transform_indices = @transform_9, window_bounds = array<i64: 32, 128>}, {pipeline_mode = #tpu.pipeline_mode<synchronous>, transform_indices = @transform_10, window_bounds = array<i64: 1, 128>}, {pipeline_mode = #tpu.pipeline_mode<synchronous>, transform_indices = @transform_11, window_bounds = array<i64: 128, 32>}, {pipeline_mode = #tpu.pipeline_mode<synchronous>, transform_indices = @transform_12, window_bounds = array<i64: 1, 32>}, {pipeline_mode = #tpu.pipeline_mode<synchronous>, transform_indices = @transform_13, window_bounds = array<i64: 1, 32>}, {pipeline_mode = #tpu.pipeline_mode<synchronous>, transform_indices = @transform_14, window_bounds = array<i64: 1, 32>}, {pipeline_mode = #tpu.pipeline_mode<synchronous>, transform_indices = @transform_15, window_bounds = array<i64: 32, 128>}, {pipeline_mode = #tpu.pipeline_mode<synchronous>, transform_indices = @transform_16, window_bounds = array<i64: 1, 128>}, {pipeline_mode = #tpu.pipeline_mode<synchronous>, transform_indices = @transform_17, window_bounds = array<i64: 128, 32>}, {pipeline_mode = #tpu.pipeline_mode<synchronous>, transform_indices = @transform_18, window_bounds = array<i64: 1, 32>}, {pipeline_mode = #tpu.pipeline_mode<synchronous>, transform_indices = @transform_19, window_bounds = array<i64: 1, 32>}, {pipeline_mode = #tpu.pipeline_mode<synchronous>, transform_indices = @transform_20, window_bounds = array<i64: 1, 32>}, {pipeline_mode = #tpu.pipeline_mode<synchronous>, transform_indices = @transform_21, window_bounds = array<i64: 32, 128>}, {pipeline_mode = #tpu.pipeline_mode<synchronous>, transform_indices = @transform_22, window_bounds = array<i64: 1, 128>}, {pipeline_mode = #tpu.pipeline_mode<synchronous>, transform_indices = @transform_23, window_bounds = array<i64: 128, 32>}, {pipeline_mode = #tpu.pipeline_mode<synchronous>, transform_indices = @transform_24, window_bounds = array<i64: 1, 32>}, {transform_indices = @transform_25, window_bounds = array<i64: 1, 8, 32>}]} {
    %c0 = arith.constant 0 : index
    %c0_0 = arith.constant 0 : index
    %c0_1 = arith.constant 0 : index
    %0 = vector.load %arg1[%c0, %c0_0, %c0_1] : memref<1x8x32xf32, #tpu.memory_space<vmem>>, vector<1x8x32xf32>
    %1 = vector.shape_cast %0 : vector<1x8x32xf32> to vector<8x32xf32>
    %c0_2 = arith.constant 0 : index
    %c0_3 = arith.constant 0 : index
    %2 = vector.load %arg2[%c0_2, %c0_3] : memref<1x32xf32, #tpu.memory_space<vmem>>, vector<1x32xf32>
    %c0_4 = arith.constant 0 : index
    %c0_5 = arith.constant 0 : index
    %3 = vector.load %arg3[%c0_4, %c0_5] : memref<1x32xf32, #tpu.memory_space<vmem>>, vector<1x32xf32>
    %cst = arith.constant dense<0.000000e+00> : vector<8xf32>
    %4 = vector.multi_reduction <add>, %1, %cst [1] : vector<8x32xf32> to vector<8xf32>
    %5 = vector.shape_cast %4 : vector<8xf32> to vector<8x1xf32>
    %cst_6 = arith.constant 3.200000e+01 : f32
    %6 = vector.broadcast %cst_6 : f32 to vector<8x1xf32>
    %7 = arith.divf %5, %6 : vector<8x1xf32>
    %8 = vector.broadcast %7 : vector<8x1xf32> to vector<8x32xf32>
    %9 = arith.subf %1, %8 : vector<8x32xf32>
    %10 = arith.mulf %9, %9 : vector<8x32xf32>
    %cst_7 = arith.constant dense<0.000000e+00> : vector<8xf32>
    %11 = vector.multi_reduction <add>, %10, %cst_7 [1] : vector<8x32xf32> to vector<8xf32>
    %12 = vector.shape_cast %11 : vector<8xf32> to vector<8x1xf32>
    %cst_8 = arith.constant 3.200000e+01 : f32
    %13 = vector.broadcast %cst_8 : f32 to vector<8x1xf32>
    %14 = arith.divf %12, %13 : vector<8x1xf32>
    %15 = vector.broadcast %7 : vector<8x1xf32> to vector<8x32xf32>
    %16 = arith.subf %1, %15 : vector<8x32xf32>
    %cst_9 = arith.constant 9.99999974E-6 : f32
    %17 = vector.broadcast %cst_9 : f32 to vector<8x1xf32>
    %18 = arith.addf %14, %17 : vector<8x1xf32>
    %19 = math.rsqrt %18 : vector<8x1xf32>
    %20 = vector.broadcast %19 : vector<8x1xf32> to vector<8x32xf32>
    %21 = arith.mulf %16, %20 : vector<8x32xf32>
    %22 = vector.broadcast %2 : vector<1x32xf32> to vector<8x32xf32>
    %23 = arith.mulf %21, %22 : vector<8x32xf32>
    %24 = vector.broadcast %3 : vector<1x32xf32> to vector<8x32xf32>
    %25 = arith.addf %23, %24 : vector<8x32xf32>
    %26 = arith.truncf %25 : vector<8x32xf32> to vector<8x32xbf16>
    %c0_10 = arith.constant 0 : index
    %c0_11 = arith.constant 0 : index
    %27 = vector.load %arg4[%c0_10, %c0_11] : memref<32x120xbf16, #tpu.memory_space<vmem>>, vector<32x120xbf16>
    %cst_12 = arith.constant dense<0.000000e+00> : vector<8x120xf32>
    %28 = tpu.matmul %26, %27, %cst_12 {dimension_numbers = #tpu.dot_dimension_numbers<[1], [0], [0], [1], [0, 0, 1, 1], [], []>} : vector<8x32xbf16>, vector<32x120xbf16>, vector<8x120xf32> -> vector<8x120xf32>
    %c0_13 = arith.constant 0 : index
    %c0_14 = arith.constant 0 : index
    %29 = vector.load %arg5[%c0_13, %c0_14] : memref<1x120xf32, #tpu.memory_space<vmem>>, vector<1x120xf32>
    %30 = vector.broadcast %29 : vector<1x120xf32> to vector<8x120xf32>
    %31 = arith.addf %28, %30 : vector<8x120xf32>
    %32 = arith.truncf %31 : vector<8x120xf32> to vector<8x120xbf16>
    %33 = vector.extract_strided_slice %32 {offsets = [0, 0], sizes = [8, 32], strides = [1, 1]} : vector<8x120xbf16> to vector<8x32xbf16>
    %34 = vector.extract_strided_slice %32 {offsets = [0, 32], sizes = [8, 32], strides = [1, 1]} : vector<8x120xbf16> to vector<8x32xbf16>
    %35 = vector.extract_strided_slice %32 {offsets = [0, 64], sizes = [8, 32], strides = [1, 1]} : vector<8x120xbf16> to vector<8x32xbf16>
    %36 = vector.extract_strided_slice %33 {offsets = [0, 0], sizes = [8, 8], strides = [1, 1]} : vector<8x32xbf16> to vector<8x8xbf16>
    %37 = vector.extract_strided_slice %34 {offsets = [0, 0], sizes = [8, 8], strides = [1, 1]} : vector<8x32xbf16> to vector<8x8xbf16>
    %cst_15 = arith.constant dense<0.000000e+00> : vector<8x8xf32>
    %38 = tpu.matmul %36, %37, %cst_15 {dimension_numbers = #tpu.dot_dimension_numbers<[1], [1], [0], [0], [0, 0, 1, 0], [], []>} : vector<8x8xbf16>, vector<8x8xbf16>, vector<8x8xf32> -> vector<8x8xf32>
    %cst_16 = arith.constant 0.353553385 : f32
    %39 = vector.broadcast %cst_16 : f32 to vector<8x8xf32>
    %40 = arith.mulf %38, %39 : vector<8x8xf32>
    %cst_17 = arith.constant dense<0xFF800000> : vector<8xf32>
    %41 = vector.multi_reduction <maximumf>, %40, %cst_17 [1] : vector<8x8xf32> to vector<8xf32>
    %42 = vector.shape_cast %41 : vector<8xf32> to vector<8x1xf32>
    %43 = vector.broadcast %42 : vector<8x1xf32> to vector<8x8xf32>
    %44 = arith.subf %40, %43 : vector<8x8xf32>
    %45 = math.exp %44 : vector<8x8xf32>
    %cst_18 = arith.constant dense<0.000000e+00> : vector<8xf32>
    %46 = vector.multi_reduction <add>, %45, %cst_18 [1] : vector<8x8xf32> to vector<8xf32>
    %47 = vector.shape_cast %46 : vector<8xf32> to vector<8x1xf32>
    %48 = tpu.reciprocal %47 : vector<8x1xf32> -> vector<8x1xf32>
    %49 = vector.broadcast %48 : vector<8x1xf32> to vector<8x8xf32>
    %50 = arith.mulf %45, %49 : vector<8x8xf32>
    %51 = arith.truncf %50 : vector<8x8xf32> to vector<8x8xbf16>
    %52 = vector.extract_strided_slice %35 {offsets = [0, 0], sizes = [8, 8], strides = [1, 1]} : vector<8x32xbf16> to vector<8x8xbf16>
    %cst_19 = arith.constant dense<0.000000e+00> : vector<8x8xf32>
    %53 = tpu.matmul %51, %52, %cst_19 {dimension_numbers = #tpu.dot_dimension_numbers<[1], [0], [0], [1], [0, 0, 1, 1], [], []>} : vector<8x8xbf16>, vector<8x8xbf16>, vector<8x8xf32> -> vector<8x8xf32>
    %54 = vector.extract_strided_slice %33 {offsets = [0, 8], sizes = [8, 8], strides = [1, 1]} : vector<8x32xbf16> to vector<8x8xbf16>
    %55 = vector.extract_strided_slice %34 {offsets = [0, 8], sizes = [8, 8], strides = [1, 1]} : vector<8x32xbf16> to vector<8x8xbf16>
    %cst_20 = arith.constant dense<0.000000e+00> : vector<8x8xf32>
    %56 = tpu.matmul %54, %55, %cst_20 {dimension_numbers = #tpu.dot_dimension_numbers<[1], [1], [0], [0], [0, 0, 1, 0], [], []>} : vector<8x8xbf16>, vector<8x8xbf16>, vector<8x8xf32> -> vector<8x8xf32>
    %cst_21 = arith.constant 0.353553385 : f32
    %57 = vector.broadcast %cst_21 : f32 to vector<8x8xf32>
    %58 = arith.mulf %56, %57 : vector<8x8xf32>
    %cst_22 = arith.constant dense<0xFF800000> : vector<8xf32>
    %59 = vector.multi_reduction <maximumf>, %58, %cst_22 [1] : vector<8x8xf32> to vector<8xf32>
    %60 = vector.shape_cast %59 : vector<8xf32> to vector<8x1xf32>
    %61 = vector.broadcast %60 : vector<8x1xf32> to vector<8x8xf32>
    %62 = arith.subf %58, %61 : vector<8x8xf32>
    %63 = math.exp %62 : vector<8x8xf32>
    %cst_23 = arith.constant dense<0.000000e+00> : vector<8xf32>
    %64 = vector.multi_reduction <add>, %63, %cst_23 [1] : vector<8x8xf32> to vector<8xf32>
    %65 = vector.shape_cast %64 : vector<8xf32> to vector<8x1xf32>
    %66 = tpu.reciprocal %65 : vector<8x1xf32> -> vector<8x1xf32>
    %67 = vector.broadcast %66 : vector<8x1xf32> to vector<8x8xf32>
    %68 = arith.mulf %63, %67 : vector<8x8xf32>
    %69 = arith.truncf %68 : vector<8x8xf32> to vector<8x8xbf16>
    %70 = vector.extract_strided_slice %35 {offsets = [0, 8], sizes = [8, 8], strides = [1, 1]} : vector<8x32xbf16> to vector<8x8xbf16>
    %cst_24 = arith.constant dense<0.000000e+00> : vector<8x8xf32>
    %71 = tpu.matmul %69, %70, %cst_24 {dimension_numbers = #tpu.dot_dimension_numbers<[1], [0], [0], [1], [0, 0, 1, 1], [], []>} : vector<8x8xbf16>, vector<8x8xbf16>, vector<8x8xf32> -> vector<8x8xf32>
    %72 = vector.extract_strided_slice %33 {offsets = [0, 16], sizes = [8, 8], strides = [1, 1]} : vector<8x32xbf16> to vector<8x8xbf16>
    %73 = vector.extract_strided_slice %34 {offsets = [0, 16], sizes = [8, 8], strides = [1, 1]} : vector<8x32xbf16> to vector<8x8xbf16>
    %cst_25 = arith.constant dense<0.000000e+00> : vector<8x8xf32>
    %74 = tpu.matmul %72, %73, %cst_25 {dimension_numbers = #tpu.dot_dimension_numbers<[1], [1], [0], [0], [0, 0, 1, 0], [], []>} : vector<8x8xbf16>, vector<8x8xbf16>, vector<8x8xf32> -> vector<8x8xf32>
    %cst_26 = arith.constant 0.353553385 : f32
    %75 = vector.broadcast %cst_26 : f32 to vector<8x8xf32>
    %76 = arith.mulf %74, %75 : vector<8x8xf32>
    %cst_27 = arith.constant dense<0xFF800000> : vector<8xf32>
    %77 = vector.multi_reduction <maximumf>, %76, %cst_27 [1] : vector<8x8xf32> to vector<8xf32>
    %78 = vector.shape_cast %77 : vector<8xf32> to vector<8x1xf32>
    %79 = vector.broadcast %78 : vector<8x1xf32> to vector<8x8xf32>
    %80 = arith.subf %76, %79 : vector<8x8xf32>
    %81 = math.exp %80 : vector<8x8xf32>
    %cst_28 = arith.constant dense<0.000000e+00> : vector<8xf32>
    %82 = vector.multi_reduction <add>, %81, %cst_28 [1] : vector<8x8xf32> to vector<8xf32>
    %83 = vector.shape_cast %82 : vector<8xf32> to vector<8x1xf32>
    %84 = tpu.reciprocal %83 : vector<8x1xf32> -> vector<8x1xf32>
    %85 = vector.broadcast %84 : vector<8x1xf32> to vector<8x8xf32>
    %86 = arith.mulf %81, %85 : vector<8x8xf32>
    %87 = arith.truncf %86 : vector<8x8xf32> to vector<8x8xbf16>
    %88 = vector.extract_strided_slice %35 {offsets = [0, 16], sizes = [8, 8], strides = [1, 1]} : vector<8x32xbf16> to vector<8x8xbf16>
    %cst_29 = arith.constant dense<0.000000e+00> : vector<8x8xf32>
    %89 = tpu.matmul %87, %88, %cst_29 {dimension_numbers = #tpu.dot_dimension_numbers<[1], [0], [0], [1], [0, 0, 1, 1], [], []>} : vector<8x8xbf16>, vector<8x8xbf16>, vector<8x8xf32> -> vector<8x8xf32>
    %90 = vector.extract_strided_slice %33 {offsets = [0, 24], sizes = [8, 8], strides = [1, 1]} : vector<8x32xbf16> to vector<8x8xbf16>
    %91 = vector.extract_strided_slice %34 {offsets = [0, 24], sizes = [8, 8], strides = [1, 1]} : vector<8x32xbf16> to vector<8x8xbf16>
    %cst_30 = arith.constant dense<0.000000e+00> : vector<8x8xf32>
    %92 = tpu.matmul %90, %91, %cst_30 {dimension_numbers = #tpu.dot_dimension_numbers<[1], [1], [0], [0], [0, 0, 1, 0], [], []>} : vector<8x8xbf16>, vector<8x8xbf16>, vector<8x8xf32> -> vector<8x8xf32>
    %cst_31 = arith.constant 0.353553385 : f32
    %93 = vector.broadcast %cst_31 : f32 to vector<8x8xf32>
    %94 = arith.mulf %92, %93 : vector<8x8xf32>
    %cst_32 = arith.constant dense<0xFF800000> : vector<8xf32>
    %95 = vector.multi_reduction <maximumf>, %94, %cst_32 [1] : vector<8x8xf32> to vector<8xf32>
    %96 = vector.shape_cast %95 : vector<8xf32> to vector<8x1xf32>
    %97 = vector.broadcast %96 : vector<8x1xf32> to vector<8x8xf32>
    %98 = arith.subf %94, %97 : vector<8x8xf32>
    %99 = math.exp %98 : vector<8x8xf32>
    %cst_33 = arith.constant dense<0.000000e+00> : vector<8xf32>
    %100 = vector.multi_reduction <add>, %99, %cst_33 [1] : vector<8x8xf32> to vector<8xf32>
    %101 = vector.shape_cast %100 : vector<8xf32> to vector<8x1xf32>
    %102 = tpu.reciprocal %101 : vector<8x1xf32> -> vector<8x1xf32>
    %103 = vector.broadcast %102 : vector<8x1xf32> to vector<8x8xf32>
    %104 = arith.mulf %99, %103 : vector<8x8xf32>
    %105 = arith.truncf %104 : vector<8x8xf32> to vector<8x8xbf16>
    %106 = vector.extract_strided_slice %35 {offsets = [0, 24], sizes = [8, 8], strides = [1, 1]} : vector<8x32xbf16> to vector<8x8xbf16>
    %cst_34 = arith.constant dense<0.000000e+00> : vector<8x8xf32>
    %107 = tpu.matmul %105, %106, %cst_34 {dimension_numbers = #tpu.dot_dimension_numbers<[1], [0], [0], [1], [0, 0, 1, 1], [], []>} : vector<8x8xbf16>, vector<8x8xbf16>, vector<8x8xf32> -> vector<8x8xf32>
    %108 = tpu.concatenate %53, %71, %89, %107 in 1 : vector<8x8xf32>, vector<8x8xf32>, vector<8x8xf32>, vector<8x8xf32> -> vector<8x32xf32>
    %109 = arith.truncf %108 : vector<8x32xf32> to vector<8x32xbf16>
    %c0_35 = arith.constant 0 : index
    %c0_36 = arith.constant 0 : index
    %110 = vector.load %arg27[%c0_35, %c0_36] : memref<8x40xbf16, #tpu.memory_space<vmem>>, vector<8x32xbf16>
    tpu.vector_store %arg27[%c0_35, %c0_36], %109 {strides = array<i32>} : memref<8x40xbf16, #tpu.memory_space<vmem>>, vector<8x32xbf16>,
    %111 = vector.extract_strided_slice %32 {offsets = [0, 96], sizes = [8, 8], strides = [1, 1]} : vector<8x120xbf16> to vector<8x8xbf16>
    %112 = vector.extract_strided_slice %32 {offsets = [0, 104], sizes = [8, 8], strides = [1, 1]} : vector<8x120xbf16> to vector<8x8xbf16>
    %113 = vector.extract_strided_slice %32 {offsets = [0, 112], sizes = [8, 8], strides = [1, 1]} : vector<8x120xbf16> to vector<8x8xbf16>
    %114 = vector.extract_strided_slice %111 {offsets = [0, 0], sizes = [8, 2], strides = [1, 1]} : vector<8x8xbf16> to vector<8x2xbf16>
    %115 = vector.extract_strided_slice %112 {offsets = [0, 0], sizes = [8, 2], strides = [1, 1]} : vector<8x8xbf16> to vector<8x2xbf16>
    %cst_37 = arith.constant dense<0.000000e+00> : vector<8x8xf32>
    %116 = tpu.matmul %114, %115, %cst_37 {dimension_numbers = #tpu.dot_dimension_numbers<[1], [1], [0], [0], [0, 0, 1, 0], [], []>} : vector<8x2xbf16>, vector<8x2xbf16>, vector<8x8xf32> -> vector<8x8xf32>
    %cst_38 = arith.constant 0.353553385 : f32
    %117 = vector.broadcast %cst_38 : f32 to vector<8x8xf32>
    %118 = arith.mulf %116, %117 : vector<8x8xf32>
    %cst_39 = arith.constant dense<0xFF800000> : vector<8xf32>
    %119 = vector.multi_reduction <maximumf>, %118, %cst_39 [1] : vector<8x8xf32> to vector<8xf32>
    %120 = vector.shape_cast %119 : vector<8xf32> to vector<8x1xf32>
    %121 = vector.broadcast %120 : vector<8x1xf32> to vector<8x8xf32>
    %122 = arith.subf %118, %121 : vector<8x8xf32>
    %123 = math.exp %122 : vector<8x8xf32>
    %cst_40 = arith.constant dense<0.000000e+00> : vector<8xf32>
    %124 = vector.multi_reduction <add>, %123, %cst_40 [1] : vector<8x8xf32> to vector<8xf32>
    %125 = vector.shape_cast %124 : vector<8xf32> to vector<8x1xf32>
    %126 = tpu.reciprocal %125 : vector<8x1xf32> -> vector<8x1xf32>
    %127 = vector.broadcast %126 : vector<8x1xf32> to vector<8x8xf32>
    %128 = arith.mulf %123, %127 : vector<8x8xf32>
    %129 = arith.truncf %128 : vector<8x8xf32> to vector<8x8xbf16>
    %130 = vector.extract_strided_slice %113 {offsets = [0, 0], sizes = [8, 2], strides = [1, 1]} : vector<8x8xbf16> to vector<8x2xbf16>
    %cst_41 = arith.constant dense<0.000000e+00> : vector<8x2xf32>
    %131 = tpu.matmul %129, %130, %cst_41 {dimension_numbers = #tpu.dot_dimension_numbers<[1], [0], [0], [1], [0, 0, 1, 1], [], []>} : vector<8x8xbf16>, vector<8x2xbf16>, vector<8x2xf32> -> vector<8x2xf32>
    %132 = vector.extract_strided_slice %111 {offsets = [0, 2], sizes = [8, 2], strides = [1, 1]} : vector<8x8xbf16> to vector<8x2xbf16>
    %133 = vector.extract_strided_slice %112 {offsets = [0, 2], sizes = [8, 2], strides = [1, 1]} : vector<8x8xbf16> to vector<8x2xbf16>
    %cst_42 = arith.constant dense<0.000000e+00> : vector<8x8xf32>
    %134 = tpu.matmul %132, %133, %cst_42 {dimension_numbers = #tpu.dot_dimension_numbers<[1], [1], [0], [0], [0, 0, 1, 0], [], []>} : vector<8x2xbf16>, vector<8x2xbf16>, vector<8x8xf32> -> vector<8x8xf32>
    %cst_43 = arith.constant 0.353553385 : f32
    %135 = vector.broadcast %cst_43 : f32 to vector<8x8xf32>
    %136 = arith.mulf %134, %135 : vector<8x8xf32>
    %cst_44 = arith.constant dense<0xFF800000> : vector<8xf32>
    %137 = vector.multi_reduction <maximumf>, %136, %cst_44 [1] : vector<8x8xf32> to vector<8xf32>
    %138 = vector.shape_cast %137 : vector<8xf32> to vector<8x1xf32>
    %139 = vector.broadcast %138 : vector<8x1xf32> to vector<8x8xf32>
    %140 = arith.subf %136, %139 : vector<8x8xf32>
    %141 = math.exp %140 : vector<8x8xf32>
    %cst_45 = arith.constant dense<0.000000e+00> : vector<8xf32>
    %142 = vector.multi_reduction <add>, %141, %cst_45 [1] : vector<8x8xf32> to vector<8xf32>
    %143 = vector.shape_cast %142 : vector<8xf32> to vector<8x1xf32>
    %144 = tpu.reciprocal %143 : vector<8x1xf32> -> vector<8x1xf32>
    %145 = vector.broadcast %144 : vector<8x1xf32> to vector<8x8xf32>
    %146 = arith.mulf %141, %145 : vector<8x8xf32>
    %147 = arith.truncf %146 : vector<8x8xf32> to vector<8x8xbf16>
    %148 = vector.extract_strided_slice %113 {offsets = [0, 2], sizes = [8, 2], strides = [1, 1]} : vector<8x8xbf16> to vector<8x2xbf16>
    %cst_46 = arith.constant dense<0.000000e+00> : vector<8x2xf32>
    %149 = tpu.matmul %147, %148, %cst_46 {dimension_numbers = #tpu.dot_dimension_numbers<[1], [0], [0], [1], [0, 0, 1, 1], [], []>} : vector<8x8xbf16>, vector<8x2xbf16>, vector<8x2xf32> -> vector<8x2xf32>
    %150 = vector.extract_strided_slice %111 {offsets = [0, 4], sizes = [8, 2], strides = [1, 1]} : vector<8x8xbf16> to vector<8x2xbf16>
    %151 = vector.extract_strided_slice %112 {offsets = [0, 4], sizes = [8, 2], strides = [1, 1]} : vector<8x8xbf16> to vector<8x2xbf16>
    %cst_47 = arith.constant dense<0.000000e+00> : vector<8x8xf32>
    %152 = tpu.matmul %150, %151, %cst_47 {dimension_numbers = #tpu.dot_dimension_numbers<[1], [1], [0], [0], [0, 0, 1, 0], [], []>} : vector<8x2xbf16>, vector<8x2xbf16>, vector<8x8xf32> -> vector<8x8xf32>
    %cst_48 = arith.constant 0.353553385 : f32
    %153 = vector.broadcast %cst_48 : f32 to vector<8x8xf32>
    %154 = arith.mulf %152, %153 : vector<8x8xf32>
    %cst_49 = arith.constant dense<0xFF800000> : vector<8xf32>
    %155 = vector.multi_reduction <maximumf>, %154, %cst_49 [1] : vector<8x8xf32> to vector<8xf32>
    %156 = vector.shape_cast %155 : vector<8xf32> to vector<8x1xf32>
    %157 = vector.broadcast %156 : vector<8x1xf32> to vector<8x8xf32>
    %158 = arith.subf %154, %157 : vector<8x8xf32>
    %159 = math.exp %158 : vector<8x8xf32>
    %cst_50 = arith.constant dense<0.000000e+00> : vector<8xf32>
    %160 = vector.multi_reduction <add>, %159, %cst_50 [1] : vector<8x8xf32> to vector<8xf32>
    %161 = vector.shape_cast %160 : vector<8xf32> to vector<8x1xf32>
    %162 = tpu.reciprocal %161 : vector<8x1xf32> -> vector<8x1xf32>
    %163 = vector.broadcast %162 : vector<8x1xf32> to vector<8x8xf32>
    %164 = arith.mulf %159, %163 : vector<8x8xf32>
    %165 = arith.truncf %164 : vector<8x8xf32> to vector<8x8xbf16>
    %166 = vector.extract_strided_slice %113 {offsets = [0, 4], sizes = [8, 2], strides = [1, 1]} : vector<8x8xbf16> to vector<8x2xbf16>
    %cst_51 = arith.constant dense<0.000000e+00> : vector<8x2xf32>
    %167 = tpu.matmul %165, %166, %cst_51 {dimension_numbers = #tpu.dot_dimension_numbers<[1], [0], [0], [1], [0, 0, 1, 1], [], []>} : vector<8x8xbf16>, vector<8x2xbf16>, vector<8x2xf32> -> vector<8x2xf32>
    %168 = vector.extract_strided_slice %111 {offsets = [0, 6], sizes = [8, 2], strides = [1, 1]} : vector<8x8xbf16> to vector<8x2xbf16>
    %169 = vector.extract_strided_slice %112 {offsets = [0, 6], sizes = [8, 2], strides = [1, 1]} : vector<8x8xbf16> to vector<8x2xbf16>
    %cst_52 = arith.constant dense<0.000000e+00> : vector<8x8xf32>
    %170 = tpu.matmul %168, %169, %cst_52 {dimension_numbers = #tpu.dot_dimension_numbers<[1], [1], [0], [0], [0, 0, 1, 0], [], []>} : vector<8x2xbf16>, vector<8x2xbf16>, vector<8x8xf32> -> vector<8x8xf32>
    %cst_53 = arith.constant 0.353553385 : f32
    %171 = vector.broadcast %cst_53 : f32 to vector<8x8xf32>
    %172 = arith.mulf %170, %171 : vector<8x8xf32>
    %cst_54 = arith.constant dense<0xFF800000> : vector<8xf32>
    %173 = vector.multi_reduction <maximumf>, %172, %cst_54 [1] : vector<8x8xf32> to vector<8xf32>
    %174 = vector.shape_cast %173 : vector<8xf32> to vector<8x1xf32>
    %175 = vector.broadcast %174 : vector<8x1xf32> to vector<8x8xf32>
    %176 = arith.subf %172, %175 : vector<8x8xf32>
    %177 = math.exp %176 : vector<8x8xf32>
    %cst_55 = arith.constant dense<0.000000e+00> : vector<8xf32>
    %178 = vector.multi_reduction <add>, %177, %cst_55 [1] : vector<8x8xf32> to vector<8xf32>
    %179 = vector.shape_cast %178 : vector<8xf32> to vector<8x1xf32>
    %180 = tpu.reciprocal %179 : vector<8x1xf32> -> vector<8x1xf32>
    %181 = vector.broadcast %180 : vector<8x1xf32> to vector<8x8xf32>
    %182 = arith.mulf %177, %181 : vector<8x8xf32>
    %183 = arith.truncf %182 : vector<8x8xf32> to vector<8x8xbf16>
    %184 = vector.extract_strided_slice %113 {offsets = [0, 6], sizes = [8, 2], strides = [1, 1]} : vector<8x8xbf16> to vector<8x2xbf16>
    %cst_56 = arith.constant dense<0.000000e+00> : vector<8x2xf32>
    %185 = tpu.matmul %183, %184, %cst_56 {dimension_numbers = #tpu.dot_dimension_numbers<[1], [0], [0], [1], [0, 0, 1, 1], [], []>} : vector<8x8xbf16>, vector<8x2xbf16>, vector<8x2xf32> -> vector<8x2xf32>
    %186 = tpu.concatenate %131, %149, %167, %185 in 1 : vector<8x2xf32>, vector<8x2xf32>, vector<8x2xf32>, vector<8x2xf32> -> vector<8x8xf32>
    %187 = arith.truncf %186 : vector<8x8xf32> to vector<8x8xbf16>
    %c0_57 = arith.constant 0 : index
    %c32 = arith.constant 32 : index
    %188 = vector.load %arg27[%c0_57, %c32] : memref<8x40xbf16, #tpu.memory_space<vmem>>, vector<8x8xbf16>
    tpu.vector_store %arg27[%c0_57, %c32], %187 {strides = array<i32>} : memref<8x40xbf16, #tpu.memory_space<vmem>>, vector<8x8xbf16>,
    %c0_58 = arith.constant 0 : index
    %c0_59 = arith.constant 0 : index
    %189 = vector.load %arg27[%c0_58, %c0_59] : memref<8x40xbf16, #tpu.memory_space<vmem>>, vector<8x40xbf16>
    %c0_60 = arith.constant 0 : index
    %c0_61 = arith.constant 0 : index
    %190 = vector.load %arg6[%c0_60, %c0_61] : memref<40x32xbf16, #tpu.memory_space<vmem>>, vector<40x32xbf16>
    %cst_62 = arith.constant dense<0.000000e+00> : vector<8x32xf32>
    %191 = tpu.matmul %189, %190, %cst_62 {dimension_numbers = #tpu.dot_dimension_numbers<[1], [0], [0], [1], [0, 0, 1, 1], [], []>} : vector<8x40xbf16>, vector<40x32xbf16>, vector<8x32xf32> -> vector<8x32xf32>
    %c0_63 = arith.constant 0 : index
    %c0_64 = arith.constant 0 : index
    %192 = vector.load %arg7[%c0_63, %c0_64] : memref<1x32xf32, #tpu.memory_space<vmem>>, vector<1x32xf32>
    %193 = vector.broadcast %192 : vector<1x32xf32> to vector<8x32xf32>
    %194 = arith.addf %191, %193 : vector<8x32xf32>
    %c0_65 = arith.constant 0 : index
    %c0_66 = arith.constant 0 : index
    %195 = vector.load %arg14[%c0_65, %c0_66] : memref<1x32xf32, #tpu.memory_space<vmem>>, vector<1x32xf32>
    %c0_67 = arith.constant 0 : index
    %c0_68 = arith.constant 0 : index
    %196 = vector.load %arg15[%c0_67, %c0_68] : memref<1x32xf32, #tpu.memory_space<vmem>>, vector<1x32xf32>
    %c0_69 = arith.constant 0 : index
    %c0_70 = arith.constant 0 : index
    %197 = vector.load %arg16[%c0_69, %c0_70] : memref<32x128xbf16, #tpu.memory_space<vmem>>, vector<32x128xbf16>
    %c0_71 = arith.constant 0 : index
    %c0_72 = arith.constant 0 : index
    %198 = vector.load %arg17[%c0_71, %c0_72] : memref<1x128xf32, #tpu.memory_space<vmem>>, vector<1x128xf32>
    %c0_73 = arith.constant 0 : index
    %c0_74 = arith.constant 0 : index
    %199 = vector.load %arg18[%c0_73, %c0_74] : memref<128x32xbf16, #tpu.memory_space<vmem>>, vector<128x32xbf16>
    %c0_75 = arith.constant 0 : index
    %c0_76 = arith.constant 0 : index
    %200 = vector.load %arg19[%c0_75, %c0_76] : memref<1x32xf32, #tpu.memory_space<vmem>>, vector<1x32xf32>
    %cst_77 = arith.constant dense<0.000000e+00> : vector<8xf32>
    %201 = vector.multi_reduction <add>, %194, %cst_77 [1] : vector<8x32xf32> to vector<8xf32>
    %202 = vector.shape_cast %201 : vector<8xf32> to vector<8x1xf32>
    %cst_78 = arith.constant 3.200000e+01 : f32
    %203 = vector.broadcast %cst_78 : f32 to vector<8x1xf32>
    %204 = arith.divf %202, %203 : vector<8x1xf32>
    %205 = vector.broadcast %204 : vector<8x1xf32> to vector<8x32xf32>
    %206 = arith.subf %194, %205 : vector<8x32xf32>
    %207 = arith.mulf %206, %206 : vector<8x32xf32>
    %cst_79 = arith.constant dense<0.000000e+00> : vector<8xf32>
    %208 = vector.multi_reduction <add>, %207, %cst_79 [1] : vector<8x32xf32> to vector<8xf32>
    %209 = vector.shape_cast %208 : vector<8xf32> to vector<8x1xf32>
    %cst_80 = arith.constant 3.200000e+01 : f32
    %210 = vector.broadcast %cst_80 : f32 to vector<8x1xf32>
    %211 = arith.divf %209, %210 : vector<8x1xf32>
    %212 = vector.broadcast %204 : vector<8x1xf32> to vector<8x32xf32>
    %213 = arith.subf %194, %212 : vector<8x32xf32>
    %cst_81 = arith.constant 9.99999974E-6 : f32
    %214 = vector.broadcast %cst_81 : f32 to vector<8x1xf32>
    %215 = arith.addf %211, %214 : vector<8x1xf32>
    %216 = math.rsqrt %215 : vector<8x1xf32>
    %217 = vector.broadcast %216 : vector<8x1xf32> to vector<8x32xf32>
    %218 = arith.mulf %213, %217 : vector<8x32xf32>
    %219 = vector.broadcast %195 : vector<1x32xf32> to vector<8x32xf32>
    %220 = arith.mulf %218, %219 : vector<8x32xf32>
    %221 = vector.broadcast %196 : vector<1x32xf32> to vector<8x32xf32>
    %222 = arith.addf %220, %221 : vector<8x32xf32>
    %223 = arith.truncf %222 : vector<8x32xf32> to vector<8x32xbf16>
    %cst_82 = arith.constant dense<0.000000e+00> : vector<8x128xf32>
    %224 = tpu.matmul %223, %197, %cst_82 {dimension_numbers = #tpu.dot_dimension_numbers<[1], [0], [0], [1], [0, 0, 1, 1], [], []>} : vector<8x32xbf16>, vector<32x128xbf16>, vector<8x128xf32> -> vector<8x128xf32>
    %225 = vector.broadcast %198 : vector<1x128xf32> to vector<8x128xf32>
    %226 = arith.addf %224, %225 : vector<8x128xf32>
    %cst_83 = arith.constant 5.000000e-01 : f32
    %227 = vector.broadcast %cst_83 : f32 to vector<8x128xf32>
    %228 = arith.mulf %227, %226 : vector<8x128xf32>
    %cst_84 = arith.constant 4.471500e-02 : f32
    %229 = vector.broadcast %cst_84 : f32 to vector<8x128xf32>
    %230 = arith.mulf %229, %226 : vector<8x128xf32>
    %231 = arith.mulf %230, %226 : vector<8x128xf32>
    %232 = arith.mulf %231, %226 : vector<8x128xf32>
    %233 = arith.addf %226, %232 : vector<8x128xf32>
    %cst_85 = arith.constant 0.797884583 : f32
    %234 = vector.broadcast %cst_85 : f32 to vector<8x128xf32>
    %235 = arith.mulf %234, %233 : vector<8x128xf32>
    %236 = math.tanh %235 : vector<8x128xf32>
    %cst_86 = arith.constant 1.000000e+00 : f32
    %237 = vector.broadcast %cst_86 : f32 to vector<8x128xf32>
    %238 = arith.addf %237, %236 : vector<8x128xf32>
    %239 = arith.mulf %228, %238 : vector<8x128xf32>
    %240 = arith.truncf %239 : vector<8x128xf32> to vector<8x128xbf16>
    %cst_87 = arith.constant dense<0.000000e+00> : vector<8x32xf32>
    %241 = tpu.matmul %240, %199, %cst_87 {dimension_numbers = #tpu.dot_dimension_numbers<[1], [0], [0], [1], [0, 0, 1, 1], [], []>} : vector<8x128xbf16>, vector<128x32xbf16>, vector<8x32xf32> -> vector<8x32xf32>
    %242 = vector.broadcast %200 : vector<1x32xf32> to vector<8x32xf32>
    %243 = arith.addf %241, %242 : vector<8x32xf32>
    %244 = arith.addf %194, %243 : vector<8x32xf32>
    %245 = arith.addf %194, %244 : vector<8x32xf32>
    %246 = arith.addf %1, %245 : vector<8x32xf32>
    %c0_88 = arith.constant 0 : index
    %c0_89 = arith.constant 0 : index
    %247 = vector.load %arg8[%c0_88, %c0_89] : memref<1x32xf32, #tpu.memory_space<vmem>>, vector<1x32xf32>
    %c0_90 = arith.constant 0 : index
    %c0_91 = arith.constant 0 : index
    %248 = vector.load %arg9[%c0_90, %c0_91] : memref<1x32xf32, #tpu.memory_space<vmem>>, vector<1x32xf32>
    %cst_92 = arith.constant dense<0.000000e+00> : vector<8xf32>
    %249 = vector.multi_reduction <add>, %246, %cst_92 [1] : vector<8x32xf32> to vector<8xf32>
    %250 = vector.shape_cast %249 : vector<8xf32> to vector<8x1xf32>
    %cst_93 = arith.constant 3.200000e+01 : f32
    %251 = vector.broadcast %cst_93 : f32 to vector<8x1xf32>
    %252 = arith.divf %250, %251 : vector<8x1xf32>
    %253 = vector.broadcast %252 : vector<8x1xf32> to vector<8x32xf32>
    %254 = arith.subf %246, %253 : vector<8x32xf32>
    %255 = arith.mulf %254, %254 : vector<8x32xf32>
    %cst_94 = arith.constant dense<0.000000e+00> : vector<8xf32>
    %256 = vector.multi_reduction <add>, %255, %cst_94 [1] : vector<8x32xf32> to vector<8xf32>
    %257 = vector.shape_cast %256 : vector<8xf32> to vector<8x1xf32>
    %cst_95 = arith.constant 3.200000e+01 : f32
    %258 = vector.broadcast %cst_95 : f32 to vector<8x1xf32>
    %259 = arith.divf %257, %258 : vector<8x1xf32>
    %260 = vector.broadcast %252 : vector<8x1xf32> to vector<8x32xf32>
    %261 = arith.subf %246, %260 : vector<8x32xf32>
    %cst_96 = arith.constant 9.99999974E-6 : f32
    %262 = vector.broadcast %cst_96 : f32 to vector<8x1xf32>
    %263 = arith.addf %259, %262 : vector<8x1xf32>
    %264 = math.rsqrt %263 : vector<8x1xf32>
    %265 = vector.broadcast %264 : vector<8x1xf32> to vector<8x32xf32>
    %266 = arith.mulf %261, %265 : vector<8x32xf32>
    %267 = vector.broadcast %247 : vector<1x32xf32> to vector<8x32xf32>
    %268 = arith.mulf %266, %267 : vector<8x32xf32>
    %269 = vector.broadcast %248 : vector<1x32xf32> to vector<8x32xf32>
    %270 = arith.addf %268, %269 : vector<8x32xf32>
    %271 = arith.truncf %270 : vector<8x32xf32> to vector<8x32xbf16>
    %c0_97 = arith.constant 0 : index
    %c0_98 = arith.constant 0 : index
    %272 = vector.load %arg10[%c0_97, %c0_98] : memref<32x128xbf16, #tpu.memory_space<vmem>>, vector<32x128xbf16>
    %cst_99 = arith.constant dense<0.000000e+00> : vector<8x128xf32>
    %273 = tpu.matmul %271, %272, %cst_99 {dimension_numbers = #tpu.dot_dimension_numbers<[1], [0], [0], [1], [0, 0, 1, 1], [], []>} : vector<8x32xbf16>, vector<32x128xbf16>, vector<8x128xf32> -> vector<8x128xf32>
    %c0_100 = arith.constant 0 : index
    %c0_101 = arith.constant 0 : index
    %274 = vector.load %arg11[%c0_100, %c0_101] : memref<1x128xf32, #tpu.memory_space<vmem>>, vector<1x128xf32>
    %275 = vector.broadcast %274 : vector<1x128xf32> to vector<8x128xf32>
    %276 = arith.addf %273, %275 : vector<8x128xf32>
    %cst_102 = arith.constant 5.000000e-01 : f32
    %277 = vector.broadcast %cst_102 : f32 to vector<8x128xf32>
    %278 = arith.mulf %277, %276 : vector<8x128xf32>
    %cst_103 = arith.constant 4.471500e-02 : f32
    %279 = vector.broadcast %cst_103 : f32 to vector<8x128xf32>
    %280 = arith.mulf %279, %276 : vector<8x128xf32>
    %281 = arith.mulf %280, %276 : vector<8x128xf32>
    %282 = arith.mulf %281, %276 : vector<8x128xf32>
    %283 = arith.addf %276, %282 : vector<8x128xf32>
    %cst_104 = arith.constant 0.797884583 : f32
    %284 = vector.broadcast %cst_104 : f32 to vector<8x128xf32>
    %285 = arith.mulf %284, %283 : vector<8x128xf32>
    %286 = math.tanh %285 : vector<8x128xf32>
    %cst_105 = arith.constant 1.000000e+00 : f32
    %287 = vector.broadcast %cst_105 : f32 to vector<8x128xf32>
    %288 = arith.addf %287, %286 : vector<8x128xf32>
    %289 = arith.mulf %278, %288 : vector<8x128xf32>
    %290 = arith.truncf %289 : vector<8x128xf32> to vector<8x128xbf16>
    %c0_106 = arith.constant 0 : index
    %c0_107 = arith.constant 0 : index
    %291 = vector.load %arg12[%c0_106, %c0_107] : memref<128x32xbf16, #tpu.memory_space<vmem>>, vector<128x32xbf16>
    %cst_108 = arith.constant dense<0.000000e+00> : vector<8x32xf32>
    %292 = tpu.matmul %290, %291, %cst_108 {dimension_numbers = #tpu.dot_dimension_numbers<[1], [0], [0], [1], [0, 0, 1, 1], [], []>} : vector<8x128xbf16>, vector<128x32xbf16>, vector<8x32xf32> -> vector<8x32xf32>
    %c0_109 = arith.constant 0 : index
    %c0_110 = arith.constant 0 : index
    %293 = vector.load %arg13[%c0_109, %c0_110] : memref<1x32xf32, #tpu.memory_space<vmem>>, vector<1x32xf32>
    %294 = vector.broadcast %293 : vector<1x32xf32> to vector<8x32xf32>
    %295 = arith.addf %292, %294 : vector<8x32xf32>
    %c0_111 = arith.constant 0 : index
    %c0_112 = arith.constant 0 : index
    %296 = vector.load %arg20[%c0_111, %c0_112] : memref<1x32xf32, #tpu.memory_space<vmem>>, vector<1x32xf32>
    %c0_113 = arith.constant 0 : index
    %c0_114 = arith.constant 0 : index
    %297 = vector.load %arg21[%c0_113, %c0_114] : memref<1x32xf32, #tpu.memory_space<vmem>>, vector<1x32xf32>
    %c0_115 = arith.constant 0 : index
    %c0_116 = arith.constant 0 : index
    %298 = vector.load %arg22[%c0_115, %c0_116] : memref<32x128xbf16, #tpu.memory_space<vmem>>, vector<32x128xbf16>
    %c0_117 = arith.constant 0 : index
    %c0_118 = arith.constant 0 : index
    %299 = vector.load %arg23[%c0_117, %c0_118] : memref<1x128xf32, #tpu.memory_space<vmem>>, vector<1x128xf32>
    %c0_119 = arith.constant 0 : index
    %c0_120 = arith.constant 0 : index
    %300 = vector.load %arg24[%c0_119, %c0_120] : memref<128x32xbf16, #tpu.memory_space<vmem>>, vector<128x32xbf16>
    %c0_121 = arith.constant 0 : index
    %c0_122 = arith.constant 0 : index
    %301 = vector.load %arg25[%c0_121, %c0_122] : memref<1x32xf32, #tpu.memory_space<vmem>>, vector<1x32xf32>
    %cst_123 = arith.constant dense<0.000000e+00> : vector<8xf32>
    %302 = vector.multi_reduction <add>, %295, %cst_123 [1] : vector<8x32xf32> to vector<8xf32>
    %303 = vector.shape_cast %302 : vector<8xf32> to vector<8x1xf32>
    %cst_124 = arith.constant 3.200000e+01 : f32
    %304 = vector.broadcast %cst_124 : f32 to vector<8x1xf32>
    %305 = arith.divf %303, %304 : vector<8x1xf32>
    %306 = vector.broadcast %305 : vector<8x1xf32> to vector<8x32xf32>
    %307 = arith.subf %295, %306 : vector<8x32xf32>
    %308 = arith.mulf %307, %307 : vector<8x32xf32>
    %cst_125 = arith.constant dense<0.000000e+00> : vector<8xf32>
    %309 = vector.multi_reduction <add>, %308, %cst_125 [1] : vector<8x32xf32> to vector<8xf32>
    %310 = vector.shape_cast %309 : vector<8xf32> to vector<8x1xf32>
    %cst_126 = arith.constant 3.200000e+01 : f32
    %311 = vector.broadcast %cst_126 : f32 to vector<8x1xf32>
    %312 = arith.divf %310, %311 : vector<8x1xf32>
    %313 = vector.broadcast %305 : vector<8x1xf32> to vector<8x32xf32>
    %314 = arith.subf %295, %313 : vector<8x32xf32>
    %cst_127 = arith.constant 9.99999974E-6 : f32
    %315 = vector.broadcast %cst_127 : f32 to vector<8x1xf32>
    %316 = arith.addf %312, %315 : vector<8x1xf32>
    %317 = math.rsqrt %316 : vector<8x1xf32>
    %318 = vector.broadcast %317 : vector<8x1xf32> to vector<8x32xf32>
    %319 = arith.mulf %314, %318 : vector<8x32xf32>
    %320 = vector.broadcast %296 : vector<1x32xf32> to vector<8x32xf32>
    %321 = arith.mulf %319, %320 : vector<8x32xf32>
    %322 = vector.broadcast %297 : vector<1x32xf32> to vector<8x32xf32>
    %323 = arith.addf %321, %322 : vector<8x32xf32>
    %324 = arith.truncf %323 : vector<8x32xf32> to vector<8x32xbf16>
    %cst_128 = arith.constant dense<0.000000e+00> : vector<8x128xf32>
    %325 = tpu.matmul %324, %298, %cst_128 {dimension_numbers = #tpu.dot_dimension_numbers<[1], [0], [0], [1], [0, 0, 1, 1], [], []>} : vector<8x32xbf16>, vector<32x128xbf16>, vector<8x128xf32> -> vector<8x128xf32>
    %326 = vector.broadcast %299 : vector<1x128xf32> to vector<8x128xf32>
    %327 = arith.addf %325, %326 : vector<8x128xf32>
    %cst_129 = arith.constant 5.000000e-01 : f32
    %328 = vector.broadcast %cst_129 : f32 to vector<8x128xf32>
    %329 = arith.mulf %328, %327 : vector<8x128xf32>
    %cst_130 = arith.constant 4.471500e-02 : f32
    %330 = vector.broadcast %cst_130 : f32 to vector<8x128xf32>
    %331 = arith.mulf %330, %327 : vector<8x128xf32>
    %332 = arith.mulf %331, %327 : vector<8x128xf32>
    %333 = arith.mulf %332, %327 : vector<8x128xf32>
    %334 = arith.addf %327, %333 : vector<8x128xf32>
    %cst_131 = arith.constant 0.797884583 : f32
    %335 = vector.broadcast %cst_131 : f32 to vector<8x128xf32>
    %336 = arith.mulf %335, %334 : vector<8x128xf32>
    %337 = math.tanh %336 : vector<8x128xf32>
    %cst_132 = arith.constant 1.000000e+00 : f32
    %338 = vector.broadcast %cst_132 : f32 to vector<8x128xf32>
    %339 = arith.addf %338, %337 : vector<8x128xf32>
    %340 = arith.mulf %329, %339 : vector<8x128xf32>
    %341 = arith.truncf %340 : vector<8x128xf32> to vector<8x128xbf16>
    %cst_133 = arith.constant dense<0.000000e+00> : vector<8x32xf32>
    %342 = tpu.matmul %341, %300, %cst_133 {dimension_numbers = #tpu.dot_dimension_numbers<[1], [0], [0], [1], [0, 0, 1, 1], [], []>} : vector<8x128xbf16>, vector<128x32xbf16>, vector<8x32xf32> -> vector<8x32xf32>
    %343 = vector.broadcast %301 : vector<1x32xf32> to vector<8x32xf32>
    %344 = arith.addf %342, %343 : vector<8x32xf32>
    %345 = arith.addf %295, %344 : vector<8x32xf32>
    %346 = arith.addf %295, %345 : vector<8x32xf32>
    %347 = arith.addf %246, %346 : vector<8x32xf32>
    %c0_134 = arith.constant 0 : index
    %c0_135 = arith.constant 0 : index
    %c0_136 = arith.constant 0 : index
    %348 = vector.load %arg26[%c0_134, %c0_135, %c0_136] : memref<1x8x32xf32, #tpu.memory_space<vmem>>, vector<1x8x32xf32>
    %349 = vector.shape_cast %348 : vector<1x8x32xf32> to vector<8x32xf32>
    %350 = vector.shape_cast %347 : vector<8x32xf32> to vector<1x8x32xf32>
    tpu.vector_store %arg26[%c0_134, %c0_135, %c0_136], %350 {strides = array<i32>} : memref<1x8x32xf32, #tpu.memory_space<vmem>>, vector<1x8x32xf32>,
    return
  }
  func.func @transform_0(%arg0: i32) -> (i32, i32, i32) {
    %c0_i32 = arith.constant 0 : i32
    %c0_i32_0 = arith.constant 0 : i32
    %c0_i32_1 = arith.constant 0 : i32
    return %arg0, %c0_i32, %c0_i32_0 : i32, i32, i32
  }
  func.func @transform_1(%arg0: i32) -> (i32, i32) {
    %c0_i32 = arith.constant 0 : i32
    %c0_i32_0 = arith.constant 0 : i32
    %c0_i32_1 = arith.constant 0 : i32
    return %c0_i32, %c0_i32_0 : i32, i32
  }
  func.func @transform_2(%arg0: i32) -> (i32, i32) {
    %c0_i32 = arith.constant 0 : i32
    %c0_i32_0 = arith.constant 0 : i32
    %c0_i32_1 = arith.constant 0 : i32
    return %c0_i32, %c0_i32_0 : i32, i32
  }
  func.func @transform_3(%arg0: i32) -> (i32, i32) {
    %c0_i32 = arith.constant 0 : i32
    %c0_i32_0 = arith.constant 0 : i32
    %c0_i32_1 = arith.constant 0 : i32
    return %c0_i32, %c0_i32_0 : i32, i32
  }
  func.func @transform_4(%arg0: i32) -> (i32, i32) {
    %c0_i32 = arith.constant 0 : i32
    %c0_i32_0 = arith.constant 0 : i32
    %c0_i32_1 = arith.constant 0 : i32
    return %c0_i32, %c0_i32_0 : i32, i32
  }
  func.func @transform_5(%arg0: i32) -> (i32, i32) {
    %c0_i32 = arith.constant 0 : i32
    %c0_i32_0 = arith.constant 0 : i32
    %c0_i32_1 = arith.constant 0 : i32
    return %c0_i32, %c0_i32_0 : i32, i32
  }
  func.func @transform_6(%arg0: i32) -> (i32, i32) {
    %c0_i32 = arith.constant 0 : i32
    %c0_i32_0 = arith.constant 0 : i32
    %c0_i32_1 = arith.constant 0 : i32
    return %c0_i32, %c0_i32_0 : i32, i32
  }
  func.func @transform_7(%arg0: i32) -> (i32, i32) {
    %c0_i32 = arith.constant 0 : i32
    %c0_i32_0 = arith.constant 0 : i32
    %c0_i32_1 = arith.constant 0 : i32
    return %c0_i32, %c0_i32_0 : i32, i32
  }
  func.func @transform_8(%arg0: i32) -> (i32, i32) {
    %c0_i32 = arith.constant 0 : i32
    %c0_i32_0 = arith.constant 0 : i32
    %c0_i32_1 = arith.constant 0 : i32
    return %c0_i32, %c0_i32_0 : i32, i32
  }
  func.func @transform_9(%arg0: i32) -> (i32, i32) {
    %c0_i32 = arith.constant 0 : i32
    %c0_i32_0 = arith.constant 0 : i32
    %c0_i32_1 = arith.constant 0 : i32
    return %c0_i32, %c0_i32_0 : i32, i32
  }
  func.func @transform_10(%arg0: i32) -> (i32, i32) {
    %c0_i32 = arith.constant 0 : i32
    %c0_i32_0 = arith.constant 0 : i32
    %c0_i32_1 = arith.constant 0 : i32
    return %c0_i32, %c0_i32_0 : i32, i32
  }
  func.func @transform_11(%arg0: i32) -> (i32, i32) {
    %c0_i32 = arith.constant 0 : i32
    %c0_i32_0 = arith.constant 0 : i32
    %c0_i32_1 = arith.constant 0 : i32
    return %c0_i32, %c0_i32_0 : i32, i32
  }
  func.func @transform_12(%arg0: i32) -> (i32, i32) {
    %c0_i32 = arith.constant 0 : i32
    %c0_i32_0 = arith.constant 0 : i32
    %c0_i32_1 = arith.constant 0 : i32
    return %c0_i32, %c0_i32_0 : i32, i32
  }
  func.func @transform_13(%arg0: i32) -> (i32, i32) {
    %c0_i32 = arith.constant 0 : i32
    %c0_i32_0 = arith.constant 0 : i32
    %c0_i32_1 = arith.constant 0 : i32
    return %c0_i32, %c0_i32_0 : i32, i32
  }
  func.func @transform_14(%arg0: i32) -> (i32, i32) {
    %c0_i32 = arith.constant 0 : i32
    %c0_i32_0 = arith.constant 0 : i32
    %c0_i32_1 = arith.constant 0 : i32
    return %c0_i32, %c0_i32_0 : i32, i32
  }
  func.func @transform_15(%arg0: i32) -> (i32, i32) {
    %c0_i32 = arith.constant 0 : i32
    %c0_i32_0 = arith.constant 0 : i32
    %c0_i32_1 = arith.constant 0 : i32
    return %c0_i32, %c0_i32_0 : i32, i32
  }
  func.func @transform_16(%arg0: i32) -> (i32, i32) {
    %c0_i32 = arith.constant 0 : i32
    %c0_i32_0 = arith.constant 0 : i32
    %c0_i32_1 = arith.constant 0 : i32
    return %c0_i32, %c0_i32_0 : i32, i32
  }
  func.func @transform_17(%arg0: i32) -> (i32, i32) {
    %c0_i32 = arith.constant 0 : i32
    %c0_i32_0 = arith.constant 0 : i32
    %c0_i32_1 = arith.constant 0 : i32
    return %c0_i32, %c0_i32_0 : i32, i32
  }
  func.func @transform_18(%arg0: i32) -> (i32, i32) {
    %c0_i32 = arith.constant 0 : i32
    %c0_i32_0 = arith.constant 0 : i32
    %c0_i32_1 = arith.constant 0 : i32
    return %c0_i32, %c0_i32_0 : i32, i32
  }
  func.func @transform_19(%arg0: i32) -> (i32, i32) {
    %c0_i32 = arith.constant 0 : i32
    %c0_i32_0 = arith.constant 0 : i32
    %c0_i32_1 = arith.constant 0 : i32
    return %c0_i32, %c0_i32_0 : i32, i32
  }
  func.func @transform_20(%arg0: i32) -> (i32, i32) {
    %c0_i32 = arith.constant 0 : i32
    %c0_i32_0 = arith.constant 0 : i32
    %c0_i32_1 = arith.constant 0 : i32
    return %c0_i32, %c0_i32_0 : i32, i32
  }
  func.func @transform_21(%arg0: i32) -> (i32, i32) {
    %c0_i32 = arith.constant 0 : i32
    %c0_i32_0 = arith.constant 0 : i32
    %c0_i32_1 = arith.constant 0 : i32
    return %c0_i32, %c0_i32_0 : i32, i32
  }
  func.func @transform_22(%arg0: i32) -> (i32, i32) {
    %c0_i32 = arith.constant 0 : i32
    %c0_i32_0 = arith.constant 0 : i32
    %c0_i32_1 = arith.constant 0 : i32
    return %c0_i32, %c0_i32_0 : i32, i32
  }
  func.func @transform_23(%arg0: i32) -> (i32, i32) {
    %c0_i32 = arith.constant 0 : i32
    %c0_i32_0 = arith.constant 0 : i32
    %c0_i32_1 = arith.constant 0 : i32
    return %c0_i32, %c0_i32_0 : i32, i32
  }
  func.func @transform_24(%arg0: i32) -> (i32, i32) {
    %c0_i32 = arith.constant 0 : i32
    %c0_i32_0 = arith.constant 0 : i32
    %c0_i32_1 = arith.constant 0 : i32
    return %c0_i32, %c0_i32_0 : i32, i32
  }
  func.func @transform_25(%arg0: i32) -> (i32, i32, i32) {
    %c0_i32 = arith.constant 0 : i32
    %c0_i32_0 = arith.constant 0 : i32
    %c0_i32_1 = arith.constant 0 : i32
    return %arg0, %c0_i32, %c0_i32_0 : i32, i32, i32
  }
}

</mosaic_0001>

<bundles_post_ra>
// kernel: tpu_custom_call.1
= control target key start
LH: loop header
LB: loop body
LE: loop exit
PB: predicated region body
PF: predicated region fallthrough
CT: control target
= control target key end

     0   :  { %s3854_s0 = inlined_call_operand.vmem [shape: f32[2,8,32], index: 0, kind: input, shape index: {}]   ;;  %s3855_s1 = inlined_call_operand.vmem [shape: f32[1,32], index: 1, kind: input, shape index: {}]   ;;  %s3856_s2 = inlined_call_operand.vmem [shape: f32[1,32], index: 2, kind: input, shape index: {}]   ;;  %s3857_s3 = inlined_call_operand.vmem [shape: bf16[32,120], index: 3, kind: input, shape index: {}]   ;;  %s3858_s4 = inlined_call_operand.vmem [shape: f32[1,120], index: 4, kind: input, shape index: {}]   ;;  %s3859_s5 = inlined_call_operand.vmem [shape: bf16[40,32], index: 5, kind: input, shape index: {}]   ;;  %s3860_s6 = inlined_call_operand.vmem [shape: f32[1,32], index: 6, kind: input, shape index: {}]   ;;  %s3861_s7 = inlined_call_operand.vmem [shape: f32[1,32], index: 7, kind: input, shape index: {}]   ;;  %s3862_s8 = inlined_call_operand.vmem [shape: f32[1,32], index: 8, kind: input, shape index: {}]   ;;  %s3863_s9 = inlined_call_operand.vmem [shape: bf16[32,128], index: 9, kind: input, shape index: {}]   ;;  %s3864_s10 = inlined_call_operand.vmem [shape: f32[1,128], index: 10, kind: input, shape index: {}]   ;;  %s3865_s11 = inlined_call_operand.vmem [shape: bf16[128,32], index: 11, kind: input, shape index: {}]   ;;  %s3866_s12 = inlined_call_operand.vmem [shape: f32[1,32], index: 12, kind: input, shape index: {}]   ;;  %s3867_s13 = inlined_call_operand.vmem [shape: f32[1,32], index: 13, kind: input, shape index: {}]   ;;  %s3868_s14 = inlined_call_operand.vmem [shape: f32[1,32], index: 14, kind: input, shape index: {}]   ;;  %s3869_s15 = inlined_call_operand.vmem [shape: bf16[32,128], index: 15, kind: input, shape index: {}]   ;;  %s3870_s16 = inlined_call_operand.vmem [shape: f32[1,128], index: 16, kind: input, shape index: {}]   ;;  %s3871_s17 = inlined_call_operand.vmem [shape: bf16[128,32], index: 17, kind: input, shape index: {}]   ;;  %s3872_s18 = inlined_call_operand.vmem [shape: f32[1,32], index: 18, kind: input, shape index: {}]   ;;  %s3873_s19 = inlined_call_operand.vmem [shape: f32[1,32], index: 19, kind: input, shape index: {}]   ;;  %s3874_s20 = inlined_call_operand.vmem [shape: f32[1,32], index: 20, kind: input, shape index: {}]   ;;  %s3875_s21 = inlined_call_operand.vmem [shape: bf16[32,128], index: 21, kind: input, shape index: {}]   ;;  %s3876_s22 = inlined_call_operand.vmem [shape: f32[1,128], index: 22, kind: input, shape index: {}]   ;;  %s3877_s23 = inlined_call_operand.vmem [shape: bf16[128,32], index: 23, kind: input, shape index: {}]   ;;  %s3878_s24 = inlined_call_operand.vmem [shape: f32[1,32], index: 24, kind: input, shape index: {}]   ;;  %s3879_s25 = inlined_call_operand.hbm [shape: f32[2,8,32], index: 25, kind: output, shape index: {}]  }
   0x1   :  { %3890 = sst [smem:[#allocation10_spill]] %s3854_s0 }
   0x2   :  { %3891 = sst [smem:[#allocation11_spill]] %s3855_s1 }
   0x3   :  { %3892 = sst [smem:[#allocation12_spill]] %s3856_s2 }
   0x4   :  { %3893 = sst [smem:[#allocation13_spill]] %s3857_s3 }
   0x5   :  { %3894 = sst [smem:[#allocation14_spill]] %s3858_s4 }
   0x6   :  { %3895 = sst [smem:[#allocation15_spill]] %s3859_s5 }
   0x7   :  { %3896 = sst [smem:[#allocation16_spill]] %s3860_s6 }
   0x8   :  { %3897 = sst [smem:[#allocation17_spill]] %s3861_s7 }
   0x9   :  { %3898 = sst [smem:[#allocation18_spill]] %s3862_s8 }
   0xa   :  { %3899 = sst [smem:[#allocation19_spill]] %s3863_s9 }
   0xb   :  { %3900 = sst [smem:[#allocation20_spill]] %s3864_s10 }
   0xc   :  { %3901 = sst [smem:[#allocation21_spill]] %s3865_s11 }
   0xd   :  { %30 = vsyncpa [#allocation4], 0 }
   0xe   :  { %32 = vsyncpa [#allocation4 + $0x1], 0  ;;  %s3334_s29 = smov 0   ;;  %s3336_s2 = smov 0  }
   0xf   :  { %s3338_s6 = smov 0   ;;  %s3340_s30 = smov 0  }
  0x10 LB: > { %3902 = sst [smem:[#allocation6_spill]] %s3168_s6  ;;  %s3355_s7 = sadd.s32 4294967295, %s3172_s30   ;;  %s3172_s30 = sphi %s3340_s30, %s3923_s30   ;;  %s3168_s6 = sphi %s3338_s6, %s3925_s6   ;;  %s3164_s2 = sphi %s3336_s2, %s3927_s2   ;;  %s3160_s29 = sphi %s3334_s29, %s3926_s29  }
  0x11   : > { %s2603_s3 = sadd.s32 4294967294, %s3172_s30   ;;  %s3359_s26 = sadd.s32 1, %s3172_s30  }
  0x12   : > { %3903 = sst [smem:[#allocation7_spill]] %s3359_s26  ;;  %s575_s1 = sadd.s32 1, %s3168_s6 }
  0x13   : > { %s572_s8 = ssub.s32 %s3172_s30, %s3359_s26  ;;  %p585_p0 = scmp.ne.s32.totalorder %s3168_s6, %s3164_s2 }
  0x14   : > { %p573_p1 = scmp.eq.s32.totalorder %s572_s8, 0  ;;  %p586_p2 = scmp.eq.s32.totalorder %s3355_s7, 1 }
  0x15   : > { %p591_p3 = scmp.ne.s32.totalorder %s3164_s2, %s3160_s29  ;;  %p592_p4 = scmp.eq.s32.totalorder %s2603_s3, 1 }
  0x16   : > { %s3370_s27 = scalar_select %p573_p1, %s3168_s6, %s575_s1  }
  0x17   : > { %p3372_p5 = por %p586_p2, %p585_p0  ;;  %p3376_p6 = por %p592_p4, %p591_p3 }
  0x18   : > { %3904 = sst [smem:[#allocation8_spill]] %s3370_s27  ;;  %p2606_p7 = scmp.ge.s32.totalorder %s3172_s30, 1 }
  0x19   : > { %s3906_s28 = scalar_select %p3376_p6, 1, 0 }
  0x1a   : > { %p689_p8 = scmp.lt.s32.totalorder %s3172_s30, 3 }
  0x1b   : > { %3907 = sst [smem:[#allocation9_spill]] %s3906_s28 }
  0x1c   : > { %p690_p9 = pnand %p2606_p7, %p689_p8 }
  0x1d   : > { %p756_p10 = scmp.lt.s32.totalorder (!%p690_p9), %s3355_s7, 1  ;;  %vm764_vm0 = vcmask (!%p690_p9), 261120   ;;  %s3908_s1 = sld [smem:[#allocation10_spill]] (!%p690_p9)  ;;  %v3174_v8 = vmov (!%p690_p9), 0.0   ;;  %vm3175_vm1 = vmmov (!%p690_p9), 0   ;;  %vm864_vm2 = vcmask (!%p690_p9), 64512  }
  0x1e   : > { %693 = sbr.rel (%p690_p9) target bundleno = 4339 (0x10f3), region = 120  ;;  %s3909_s6 = sld [smem:[#allocation13_spill]] (!%p690_p9)  ;;  %2762 = vmatprep.subr.bf16.mxu0 (!%p690_p9), %v3174_v8  ;;  %2766 = vmatprep.mubr.msk.bf16.mxu0 (!%p690_p9), %vm3175_vm1, %v3174_v8  ;;  %vm1330_vm3 = vcmask (!%p690_p9), 15360   ;;  %vm929_vm4 = vcmask (!%p690_p9), 1043456   ;;  %vm1784_vm5 = vcmask (!%p690_p9), 31744   ;;  %vm1786_vm6 = vcmask (!%p690_p9), 48128  }
  0x1f   : > { %2770 = vmatprep.subr.bf16.mxu1 (!%p690_p9), %v3174_v8  ;;  %2772 = vmatprep.mubr.msk.bf16.mxu1 (!%p690_p9), %vm3175_vm1, %v3174_v8  ;;  %s3911_s3 = sld [smem:[#allocation11_spill]] (!%p690_p9)  ;;  %s3913_s28 = sld [smem:[#allocation14_spill]] (!%p690_p9)  ;;  %vm1319_vm7 = vcmask (!%p690_p9), 130048   ;;  %vm1321_vm8 = vcmask (!%p690_p9), 195584   ;;  %vm1324_vm9 = vcmask (!%p690_p9), 257024   ;;  %vm1795_vm10 = vcmask (!%p690_p9), 322816  }
  0x20   : > { %s3177_s27 = smov (!%p690_p9), 96   ;;  %s3184_s0 = smov (!%p690_p9), 72   ;;  %vm1825_vm11 = vcmask (!%p690_p9), 326656  }
  0x21   : > { %s3920_s11 = sld [smem:[#allocation21_spill]] (!%p690_p9)  ;;  %s3921_s10 = sld [smem:[#allocation20_spill]] (!%p690_p9) }
  0x24   : > { %s3910_s26 = smov (!%p690_p9), %s3909_s6  ;;  %v3028_v7 = vld [vmem:[%s3909_s6] sm:$0xff] (!%p690_p9)   ;;  %s3176_s6 = smov (!%p690_p9), 120  }
  0x25   : > { %s757_s9 = scalar_select %p756_p10, %s3355_s7, 1  ;;  %2763 = vmatpush3.bf16.msra.mxu0 %v3028_v7  ;;  %v3029_v9 = vld [vmem:[%s3910_s26 + $0x8] sm:$0xff]   ;;  %v2609_v14 = vld [vmem:[%s3911_s3] ss:$0 sm:$0xff] }
  0x26   : > { %2764 = vmatprep.subr.bf16.mxu0 %v3174_v8  ;;  %v2611_v20 = vld [vmem:[%s3913_s28] ss:$0 sm:$0xff]  ;;  %s3178_s3 = smov 22   ;;  %s3180_s26 = smov 20  }
  0x27   : > { %s2608_s5 = sshll.u32 %s757_s9, 3  ;;  %s3181_s28 = smov 80  }
  0x28   : > { %s3387_s8 = scalar_lea.vmem %s3908_s1, %s2608_s5  ;;  %s3912_s5 = sld [smem:[#allocation12_spill]] }
  0x29   : > { %v761_v0 = vld [vmem:[%s3387_s8] sm:$0xff]  ;;  %2765 = vmatpush3.bf16.msra.mxu0 %v3029_v9  ;;  %s3179_s1 = smov 88   ;;  %s3182_s9 = smov 18  }
  0x2a   : > { %v765_v1 = vsel %vm764_vm0, %v761_v0, 0.0  ;;  %2776 = vmatprep.subr.bf16.mxu0 %v3174_v8 }
  0x2b   : > { %766 = vadd.xlane.f32.xlu0 %v765_v1 }
  0x2e   : > { %v2610_v16 = vld [vmem:[%s3912_s5] ss:$0 sm:$0xff]  ;;  %s3183_s5 = smov 112  }
  0xb8   : > { %v767_v2 = vpop.xlane.xlu0 %766 }
  0xb9   : > { %v769_v3 = vmul.f32 0.03125, %v767_v2 }
  0xbb   : > { %v770_v4 = vsub.f32 %v761_v0, %v769_v3 }
  0xbd   : > { %v771_v5 = vmul.f32 %v770_v4, %v770_v4 }
  0xbf   : > { %v772_v6 = vsel %vm764_vm0, %v771_v5, 0.0 }
  0xc0   : > { %773 = vadd.xlane.f32.xlu0 %v772_v6 }
 0x14d   : > { %v774_v10 = vpop.xlane.xlu0 %773 }
 0x14e   : > { %v775_v11 = vmul.f32 0.03125, %v774_v10 }
 0x150   : > { %v776_v12 = vadd.f32 1e-05, %v775_v11 }
 0x152   : > { %3063 = vrsqrt.f32 %v776_v12 }
 0x15c   : > { %v3064_v13 = vpop.eup %3063 }
 0x15d   : > { %v778_v15 = vmul.f32 %v3064_v13, %v770_v4 }
 0x15f   : > { %v785_v17 = vmul.f32 %v2609_v14, %v778_v15 }
 0x161   : > { %v792_v18 = vadd.f32 %v2610_v16, %v785_v17 }
 0x163   : > { %v793_v19 = vpack.c.bf16 %v792_v18, %v792_v18 }
 0x165   : > { %2767 = vmatmul.mubr.msk.bf16.vlgmr.msra.gmra.mrb[0].mxu0 %vm764_vm0, %v793_v19 }
 0x166   : > { %2778 = vmatprep.mubr.msk.bf16.mxu0 %vm3175_vm1, %v3174_v8 }
 0x238   : > { %v854_v21 = vpop.f32.mrb[0].mxu0 }
 0x239   : > { %v855_v22 = vadd.f32 %v2611_v20, %v854_v21  ;;  %v2768_v23 = vpop.f32.mrb[1].mxu0 }
 0x23a   : > { %v857_v24 = vpop.f32.mrb[2].mxu0 }
 0x23b   : > { %v3418_v25 = vpack.c.bf16 %v855_v22, %v855_v22  ;;  %v2769_v26 = vpop.f32.mrb[3].mxu0 }
 0x23d   : > { %973 = vrot.lane.b32.xlu0 %v3418_v25, %s3176_s6  ;;  %862 = vrot.lane.b32.xlu1 %v3418_v25, %s3177_s27  ;;  %s3185_s6 = smov 104   ;;  %s3186_s27 = smov 24  }
 0x241   : > { %1440 = vrot.lane.b32.xlu0 %v3418_v25, %s3178_s3  ;;  %975 = vrot.lane.b32.xlu1 %v3418_v25, %s3179_s1  ;;  %s3888_s3 = smov 32   ;;  %s3188_s1 = smov 30  }
 0x245   : > { %1551 = vrot.lane.b32.xlu0 %v3418_v25, %s3180_s26  ;;  %1086 = vrot.lane.b32.xlu1 %v3418_v25, %s3181_s28  ;;  %s3189_s26 = smov 28   ;;  %s3190_s28 = smov 26  }
 0x249   : > { %1662 = vrot.lane.b32.xlu0 %v3418_v25, %s3182_s9  ;;  %1084 = vrot.lane.b32.xlu1 %v3418_v25, %s3183_s5  ;;  %s3191_s9 = smov 56   ;;  %s3192_s5 = smov 64  }
 0x24d   : > { %1197 = vrot.lane.b32.xlu1 %v3418_v25, %s3184_s0  ;;  %s3193_s0 = smov 48  }
 0x251   : > { %1195 = vrot.lane.b32.xlu1 %v3418_v25, %s3185_s6  ;;  %s3194_s6 = smov 40  }
 0x255   : > { %1328 = vrot.lane.b32.xlu1 %v3418_v25, %s3186_s27 }
 0x259   : > { %1326 = vrot.lane.b32.xlu1 %v3418_v25, %s3888_s3  ;;  %s3919_s3 = sld [smem:[#allocation18_spill]] }
 0x25d   : > { %1438 = vrot.lane.b32.xlu1 %v3418_v25, %s3188_s1  ;;  %s3195_s1 = smov 14  }
 0x261   : > { %1549 = vrot.lane.b32.xlu1 %v3418_v25, %s3189_s26  ;;  %s3196_s26 = smov 12  }
 0x265   : > { %1660 = vrot.lane.b32.xlu1 %v3418_v25, %s3190_s28  ;;  %s3197_s28 = smov 10  }
 0x2af   : > { %v863_v27 = vpop.permute.xlu1 %862  ;;  %v974_v33 = vpop.permute.xlu0 %973 }
 0x2b0   : > { %v869_v28 = vsel %vm864_vm2, %v863_v27, 0 }
 0x2b1   : > { %2771 = vmatpush3.bf16.xpose.msra.mxu1 %v869_v28 }
 0x2b2   : > { %2782 = vmatprep.subr.bf16.mxu1 %v3174_v8 }
 0x2b3   : > { %v976_v29 = vpop.permute.xlu1 %975  ;;  %v1441_v40 = vpop.permute.xlu0 %1440 }
 0x2b4   : > { %v981_v31 = vsel %vm864_vm2, %v976_v29, 0  ;;  %v1446_v42 = vsel %vm1330_vm3, %v1441_v40, 0 }
 0x2b7   : > { %v1087_v30 = vpop.permute.xlu1 %1086  ;;  %v1552_v43 = vpop.permute.xlu0 %1551 }
 0x2b8   : > { %2773 = vmatmul.mubr.msk.bf16.vlgmr.msra.gmra.mrb[0].mxu1 %vm864_vm2, %v3418_v25  ;;  %v1092_v34 = vsel %vm864_vm2, %v1087_v30, 0  ;;  %v1557_v45 = vsel %vm1330_vm3, %v1552_v43, 0 }
 0x2b9   : > { %2783 = vmatpush3.bf16.xpose.msra.mxu1 %v981_v31  ;;  %2784 = vmatprep.mubr.msk.bf16.mxu1 %vm3175_vm1, %v3174_v8 }
 0x2ba   : > { %2794 = vmatprep.subr.bf16.mxu1 %v3174_v8 }
 0x2bb   : > { %v1085_v32 = vpop.permute.xlu1 %1084  ;;  %v1663_v46 = vpop.permute.xlu0 %1662 }
 0x2bc   : > { %v1668_v48 = vsel %vm1330_vm3, %v1663_v46, 0 }
 0x2bf   : > { %v1198_v35 = vpop.permute.xlu1 %1197 }
 0x2c0   : > { %2785 = vmatmul.mubr.msk.bf16.vlgmr.msra.gmra.mrb[4].mxu1 %vm864_vm2, %v974_v33  ;;  %v1203_v37 = vsel %vm864_vm2, %v1198_v35, 0 }
 0x2c1   : > { %2795 = vmatpush3.bf16.xpose.msra.mxu1 %v1092_v34  ;;  %2796 = vmatprep.mubr.msk.bf16.mxu1 %vm3175_vm1, %v3174_v8 }
 0x2c2   : > { %2806 = vmatprep.subr.bf16.mxu1 %v3174_v8 }
 0x2c3   : > { %v1196_v36 = vpop.permute.xlu1 %1195 }
 0x2c7   : > { %v1329_v38 = vpop.permute.xlu1 %1328 }
 0x2c8   : > { %2797 = vmatmul.mubr.msk.bf16.vlgmr.msra.gmra.mrb[8].mxu1 %vm864_vm2, %v1085_v32  ;;  %v1335_v39 = vsel %vm1330_vm3, %v1329_v38, 0 }
 0x2c9   : > { %2807 = vmatpush3.bf16.xpose.msra.mxu1 %v1203_v37  ;;  %2808 = vmatprep.mubr.msk.bf16.mxu1 %vm3175_vm1, %v3174_v8 }
 0x2ca   : > { %2818 = vmatprep.subr.bf16.mxu1 %v3174_v8 }
 0x2cb   : > { %v1327_v41 = vpop.permute.xlu1 %1326 }
 0x2cf   : > { %v1439_v44 = vpop.permute.xlu1 %1438 }
 0x2d0   : > { %2809 = vmatmul.mubr.msk.bf16.vlgmr.msra.gmra.mrb[12].mxu1 %vm864_vm2, %v1196_v36 }
 0x2d1   : > { %2819 = vmatpush3.bf16.xpose.msra.mxu1 %v1335_v39  ;;  %2820 = vmatprep.mubr.msk.bf16.mxu1 %vm3175_vm1, %v3174_v8 }
 0x2d2   : > { %2830 = vmatprep.subr.bf16.mxu1 %v3174_v8 }
 0x2d3   : > { %v1550_v47 = vpop.permute.xlu1 %1549 }
 0x2d7   : > { %v1661_v49 = vpop.permute.xlu1 %1660 }
 0x2d8   : > { %2821 = vmatmul.mubr.msk.bf16.vlgmr.msra.gmra.mrb[16].mxu1 %vm1330_vm3, %v1327_v41 }
 0x2d9   : > { %2831 = vmatpush3.bf16.xpose.msra.mxu1 %v1446_v42  ;;  %2832 = vmatprep.mubr.msk.bf16.mxu1 %vm3175_vm1, %v3174_v8 }
 0x2da   : > { %2842 = vmatprep.subr.bf16.mxu1 %v3174_v8 }
 0x2e0   : > { %2833 = vmatmul.mubr.msk.bf16.vlgmr.msra.gmra.mrb[20].mxu1 %vm1330_vm3, %v1439_v44 }
 0x2e1   : > { %2843 = vmatpush3.bf16.xpose.msra.mxu1 %v1557_v45  ;;  %2844 = vmatprep.mubr.msk.bf16.mxu1 %vm3175_vm1, %v3174_v8 }
 0x2e2   : > { %2854 = vmatprep.subr.bf16.mxu1 %v3174_v8 }
 0x2e8   : > { %2845 = vmatmul.mubr.msk.bf16.vlgmr.msra.gmra.mrb[24].mxu1 %vm1330_vm3, %v1550_v47 }
 0x2e9   : > { %2855 = vmatpush3.bf16.xpose.msra.mxu1 %v1668_v48  ;;  %2856 = vmatprep.mubr.msk.bf16.mxu1 %vm3175_vm1, %v3174_v8 }
 0x2ea   : > { %2884 = vmatprep.subr.bf16.mxu1 %v3174_v8 }
 0x2f0   : > { %2857 = vmatmul.mubr.msk.bf16.vlgmr.msra.gmra.mrb[28].mxu1 %vm1330_vm3, %v1661_v49 }
 0x2f1   : > { %2900 = vmatprep.mubr.msk.bf16.mxu1 %vm3175_vm1, %v3174_v8 }
 0x38b   : > { %v905_v50 = vpop.f32.mrb[0].mxu1 }
 0x38c   : > { %v911_v51 = vmul.f32 0.35355338, %v905_v50  ;;  %v2774_v52 = vpop.f32.mrb[1].mxu1 }
 0x38d   : > { %v908_v53 = vpop.f32.mrb[2].mxu1 }
 0x38e   : > { %v2775_v54 = vpop.f32.mrb[3].mxu1  ;;  %v912_v55 = vsel %vm864_vm2, %v911_v51, -inf }
 0x38f   : > { %913 = vmax.xlane.f32.xlu0 %v912_v55 }
 0x393   : > { %v1017_v56 = vpop.f32.mrb[4].mxu1 }
 0x394   : > { %v1023_v57 = vmul.f32 0.35355338, %v1017_v56  ;;  %v2786_v58 = vpop.f32.mrb[5].mxu1 }
 0x395   : > { %v1020_v59 = vpop.f32.mrb[6].mxu1 }
 0x396   : > { %v2787_v60 = vpop.f32.mrb[7].mxu1  ;;  %v1024_v61 = vsel %vm864_vm2, %v1023_v57, -inf }
 0x397   : > { %1025 = vmax.xlane.f32.xlu1 %v1024_v61 }
 0x39b   : > { %v1128_v62 = vpop.f32.mrb[8].mxu1 }
 0x39c   : > { %v1134_v63 = vmul.f32 0.35355338, %v1128_v62  ;;  %v2798_v0 = vpop.f32.mrb[9].mxu1 }
 0x39d   : > { %v1131_v1 = vpop.f32.mrb[10].mxu1 }
 0x39e   : > { %v2799_v2 = vpop.f32.mrb[11].mxu1  ;;  %v1135_v3 = vsel %vm864_vm2, %v1134_v63, -inf }
 0x39f   : > { %1136 = vmax.xlane.f32.xlu0 %v1135_v3 }
 0x3a3   : > { %v1239_v4 = vpop.f32.mrb[12].mxu1 }
 0x3a4   : > { %v3481_v5 = vmul.f32 0.35355338, %v1239_v4  ;;  %v2810_v6 = vpop.f32.mrb[13].mxu1 }
 0x3a5   : > { %v1242_v7 = vpop.f32.mrb[14].mxu1 }
 0x3a6   : > { %v2811_v9 = vpop.f32.mrb[15].mxu1  ;;  %v1246_v10 = vsel %vm864_vm2, %v3481_v5, -inf }
 0x3a7   : > { %1247 = vmax.xlane.f32.xlu0 %v1246_v10 }
 0x3ab   : > { %v1371_v11 = vpop.f32.mrb[16].mxu1 }
 0x3ac   : > { %v3485_v12 = vmul.f32 0.35355338, %v1371_v11  ;;  %v2822_v13 = vpop.f32.mrb[17].mxu1 }
 0x3ad   : > { %v1374_v14 = vpop.f32.mrb[18].mxu1 }
 0x3ae   : > { %v2823_v15 = vpop.f32.mrb[19].mxu1  ;;  %v1378_v16 = vsel %vm864_vm2, %v3485_v12, -inf }
 0x3af   : > { %1379 = vmax.xlane.f32.xlu1 %v1378_v16 }
 0x3b3   : > { %v1482_v17 = vpop.f32.mrb[20].mxu1 }
 0x3b4   : > { %v3489_v18 = vmul.f32 0.35355338, %v1482_v17  ;;  %v2834_v19 = vpop.f32.mrb[21].mxu1 }
 0x3b5   : > { %v1485_v20 = vpop.f32.mrb[22].mxu1 }
 0x3b6   : > { %v2835_v21 = vpop.f32.mrb[23].mxu1  ;;  %v1489_v22 = vsel %vm864_vm2, %v3489_v18, -inf }
 0x3b7   : > { %1490 = vmax.xlane.f32.xlu0 %v1489_v22 }
 0x3bb   : > { %v1593_v23 = vpop.f32.mrb[24].mxu1 }
 0x3bc   : > { %v1599_v24 = vmul.f32 0.35355338, %v1593_v23  ;;  %v2846_v26 = vpop.f32.mrb[25].mxu1 }
 0x3bd   : > { %v1596_v27 = vpop.f32.mrb[26].mxu1 }
 0x3be   : > { %v2847_v28 = vpop.f32.mrb[27].mxu1  ;;  %v1600_v29 = vsel %vm864_vm2, %v1599_v24, -inf }
 0x3bf   : > { %1601 = vmax.xlane.f32.xlu1 %v1600_v29 }
 0x3c3   : > { %v1704_v30 = vpop.f32.mrb[28].mxu1 }
 0x3c4   : > { %v2858_v31 = vpop.f32.mrb[29].mxu1  ;;  %v3496_v34 = vmul.f32 0.35355338, %v1704_v30 }
 0x3c5   : > { %v1707_v32 = vpop.f32.mrb[30].mxu1 }
 0x3c6   : > { %v2859_v33 = vpop.f32.mrb[31].mxu1  ;;  %v1711_v35 = vsel %vm864_vm2, %v3496_v34, -inf }
 0x3cd   : > { %1036 = vrot.lane.b32.xlu0 %v3418_v25, %s3191_s9  ;;  %s3198_s9 = smov 16  }
 0x3d0   : > { %924 = vrot.lane.b32.xlu1 %v3418_v25, %s3192_s5  ;;  %s3199_s5 = smov 2  }
 0x3ec   : > { %1712 = vmax.xlane.f32.xlu0 %v1711_v35 }
 0x41c   : > { %v914_v36 = vpop.xlane.xlu0 %913 }
 0x41d   : > { %v915_v37 = vsub.f32 %v911_v51, %v914_v36 }
 0x41f   : > { %v916_v38 = vmul.f32 1.442695, %v915_v37 }
 0x421   : > { %3065 = vpow2.f32 %v916_v38 }
 0x424   : > { %v1026_v39 = vpop.xlane.xlu1 %1025 }
 0x425   : > { %v1027_v40 = vsub.f32 %v1023_v57, %v1026_v39 }
 0x427   : > { %v1028_v41 = vmul.f32 1.442695, %v1027_v40 }
 0x429   : > { %3067 = vpow2.f32 %v1028_v41 }
 0x42b   : > { %v3500_v42 = vpop.eup %3065 }
 0x42c   : > { %v1137_v43 = vpop.xlane.xlu0 %1136  ;;  %v918_v44 = vsel %vm864_vm2, %v3500_v42, 0.0 }
 0x42d   : > { %v1138_v45 = vsub.f32 %v1134_v63, %v1137_v43  ;;  %919 = vadd.xlane.f32.xlu1 %v918_v44 }
 0x42f   : > { %v1139_v46 = vmul.f32 1.442695, %v1138_v45 }
 0x431   : > { %3069 = vpow2.f32 %v1139_v46 }
 0x433   : > { %v3504_v47 = vpop.eup %3067 }
 0x434   : > { %v1030_v48 = vsel %vm864_vm2, %v3504_v47, 0.0  ;;  %v1248_v54 = vpop.xlane.xlu0 %1247 }
 0x435   : > { %1031 = vadd.xlane.f32.xlu0 %v1030_v48  ;;  %v1249_v56 = vsub.f32 %v3481_v5, %v1248_v54 }
 0x437   : > { %v1250_v57 = vmul.f32 1.442695, %v1249_v56 }
 0x439   : > { %3071 = vpow2.f32 %v1250_v57 }
 0x43b   : > { %v3508_v49 = vpop.eup %3069 }
 0x43c   : > { %v1141_v50 = vsel %vm864_vm2, %v3508_v49, 0.0  ;;  %v1380_v51 = vpop.xlane.xlu1 %1379 }
 0x43d   : > { %1142 = vadd.xlane.f32.xlu1 %v1141_v50  ;;  %v1381_v58 = vsub.f32 %v3485_v12, %v1380_v51 }
 0x43f   : > { %v1382_v61 = vmul.f32 1.442695, %v1381_v58 }
 0x441   : > { %3073 = vpow2.f32 %v1382_v61 }
 0x443   : > { %v3519_v1 = vpop.eup %3071 }
 0x444   : > { %v1491_v59 = vpop.xlane.xlu0 %1490  ;;  %v1252_v2 = vsel %vm864_vm2, %v3519_v1, 0.0 }
 0x445   : > { %v1492_v60 = vsub.f32 %v3489_v18, %v1491_v59 }
 0x447   : > { %v1493_v63 = vmul.f32 1.442695, %v1492_v60 }
 0x448   : > { %v1037_v10 = vpop.permute.xlu0 %1036 }
 0x449   : > { %3075 = vpow2.f32 %v1493_v63  ;;  %v1042_v21 = vsel %vm929_vm4, %v1037_v10, 0 }
 0x44b   : > { %1147 = vrot.lane.b32.xlu0 %v3418_v25, %s3193_s0  ;;  %v3523_v3 = vpop.eup %3073  ;;  %s3200_s0 = smov 4  }
 0x44c   : > { %v1602_v52 = vpop.xlane.xlu1 %1601  ;;  %v1384_v5 = vsel %vm864_vm2, %v3523_v3, 0.0 }
 0x44d   : > { %v1603_v62 = vsub.f32 %v1599_v24, %v1602_v52 }
 0x44e   : > { %1258 = vrot.lane.b32.xlu1 %v3418_v25, %s3194_s6  ;;  %s3918_s6 = sld [smem:[#allocation17_spill]] }
 0x44f   : > { %v1604_v0 = vmul.f32 1.442695, %v1603_v62 }
 0x450   : > { %v925_v53 = vpop.permute.xlu1 %924 }
 0x451   : > { %v931_v55 = vsel %vm929_vm4, %v925_v53, 0  ;;  %3077 = vpow2.f32 %v1604_v0 }
 0x452   : > { %2777 = vmatpush3.bf16.msra.mxu0 %v931_v55 }
 0x453   : > { %2788 = vmatprep.subr.bf16.mxu0 %v3174_v8  ;;  %v3525_v4 = vpop.eup %3075 }
 0x454   : > { %v1495_v7 = vsel %vm864_vm2, %v3525_v4, 0.0 }
 0x45b   : > { %v3529_v6 = vpop.eup %3077 }
 0x45c   : > { %v1606_v9 = vsel %vm864_vm2, %v3529_v6, 0.0 }
 0x46a   : > { %1253 = vadd.xlane.f32.xlu0 %v1252_v2 }
 0x46e   : > { %1385 = vadd.xlane.f32.xlu0 %v1384_v5 }
 0x472   : > { %1496 = vadd.xlane.f32.xlu1 %v1495_v7  ;;  %1607 = vadd.xlane.f32.xlu0 %v1606_v9 }
 0x479   : > { %v1713_v11 = vpop.xlane.xlu0 %1712 }
 0x47a   : > { %v1714_v12 = vsub.f32 %v3496_v34, %v1713_v11 }
 0x47c   : > { %v1715_v13 = vmul.f32 1.442695, %v1714_v12 }
 0x47e   : > { %3079 = vpow2.f32 %v1715_v13 }
 0x483   : > { %1501 = vrot.lane.b32.xlu1 %v3418_v25, %s3195_s1 }
 0x487   : > { %1612 = vrot.lane.b32.xlu1 %v3418_v25, %s3196_s26  ;;  %s3914_s26 = sld [smem:[#allocation15_spill]] }
 0x488   : > { %v3538_v14 = vpop.eup %3079 }
 0x489   : > { %v1717_v15 = vsel %vm864_vm2, %v3538_v14, 0.0 }
 0x48a   : > { %1718 = vadd.xlane.f32.xlu0 %v1717_v15 }
 0x48b   : > { %1723 = vrot.lane.b32.xlu1 %v3418_v25, %s3197_s28  ;;  %s3201_s28 = smov 8  }
 0x4a0   : > { %1390 = vrot.lane.b32.xlu0 %v3418_v25, %s3198_s9 }
 0x4ba   : > { %v920_v16 = vpop.xlane.xlu1 %919 }
 0x4bb   : > { %3081 = vrcp.f32 %v920_v16 }
 0x4c2   : > { %v1032_v17 = vpop.xlane.xlu0 %1031 }
 0x4c3   : > { %3083 = vrcp.f32 %v1032_v17 }
 0x4c5   : > { %v3082_v18 = vpop.eup %3081 }
 0x4c6   : > { %v922_v19 = vmul.f32 %v3082_v18, %v3500_v42  ;;  %v1148_v24 = vpop.permute.xlu0 %1147 }
 0x4c7   : > { %v1153_v27 = vsel %vm929_vm4, %v1148_v24, 0  ;;  %v3030_v24 = vld [vmem:[%s3914_s26] sm:$0xff]  }
 0x4c8   : > { %v923_v20 = vpack.c.bf16 %v922_v19, %v922_v19 }
 0x4ca   : > { %2779 = vmatmul.mubr.msk.bf16.vlgmr.msra.gmra.mrb[4].mxu0 %vm864_vm2, %v923_v20  ;;  %v1143_v22 = vpop.xlane.xlu1 %1142 }
 0x4cb   : > { %2789 = vmatpush3.bf16.msra.mxu0 %v1042_v21  ;;  %3085 = vrcp.f32 %v1143_v22  ;;  %2790 = vmatprep.mubr.msk.bf16.mxu0 %vm3175_vm1, %v3174_v8 }
 0x4cc   : > { %2800 = vmatprep.subr.bf16.mxu0 %v3174_v8 }
 0x4cd   : > { %v3084_v25 = vpop.eup %3083 }
 0x4ce   : > { %v1034_v23 = vmul.f32 %v3084_v25, %v3504_v47  ;;  %v1259_v30 = vpop.permute.xlu1 %1258 }
 0x4cf   : > { %v1264_v32 = vsel %vm929_vm4, %v1259_v30, 0 }
 0x4d0   : > { %v1035_v26 = vpack.c.bf16 %v1034_v23, %v1034_v23 }
 0x4d2   : > { %2791 = vmatmul.mubr.msk.bf16.vlgmr.msra.gmra.mrb[8].mxu0 %vm864_vm2, %v1035_v26 }
 0x4d3   : > { %2801 = vmatpush3.bf16.msra.mxu0 %v1153_v27  ;;  %2802 = vmatprep.mubr.msk.bf16.mxu0 %vm3175_vm1, %v3174_v8 }
 0x4d4   : > { %2812 = vmatprep.subr.bf16.mxu0 %v3174_v8 }
 0x4d5   : > { %v3086_v28 = vpop.eup %3085 }
 0x4d6   : > { %v1145_v29 = vmul.f32 %v3086_v28, %v3508_v49 }
 0x4d8   : > { %v1146_v31 = vpack.c.bf16 %v1145_v29, %v1145_v29 }
 0x4da   : > { %2803 = vmatmul.mubr.msk.bf16.vlgmr.msra.gmra.mrb[12].mxu0 %vm864_vm2, %v1146_v31 }
 0x4db   : > { %2813 = vmatpush3.bf16.msra.mxu0 %v1264_v32  ;;  %2814 = vmatprep.mubr.msk.bf16.mxu0 %vm3175_vm1, %v3174_v8  ;;  %v3031_v32 = vld [vmem:[%s3914_s26 + $0x8] sm:$0xff]  }
 0x4dc   : > { %2824 = vmatprep.subr.bf16.mxu0 %v3174_v8 }
 0x4f7   : > { %v1254_v33 = vpop.xlane.xlu0 %1253 }
 0x4f8   : > { %3087 = vrcp.f32 %v1254_v33  ;;  %v3032_v33 = vld [vmem:[%s3914_s26 + $0x10] ss:$0 sps:$4 sm:$0xff]  }
 0x4fb   : > { %v1386_v37 = vpop.xlane.xlu0 %1385 }
 0x4fc   : > { %3089 = vrcp.f32 %v1386_v37 }
 0x4ff   : > { %v1497_v38 = vpop.xlane.xlu1 %1496  ;;  %v1608_v39 = vpop.xlane.xlu0 %1607 }
 0x500   : > { %3091 = vrcp.f32 %v1497_v38 }
 0x501   : > { %3093 = vrcp.f32 %v1608_v39 }
 0x502   : > { %v3088_v34 = vpop.eup %3087 }
 0x503   : > { %v1256_v35 = vmul.f32 %v3088_v34, %v3519_v1  ;;  %v1502_v45 = vpop.permute.xlu1 %1501 }
 0x504   : > { %v1507_v48 = vsel %vm929_vm4, %v1502_v45, 0 }
 0x505   : > { %v1257_v36 = vpack.c.bf16 %v1256_v35, %v1256_v35  ;;  %v1830_v35 = vsel %vm929_vm4, %v3032_v33, 0 }
 0x506   : > { %v3090_v40 = vpop.eup %3089 }
 0x507   : > { %2815 = vmatmul.mubr.msk.bf16.vlgmr.msra.gmra.mrb[16].mxu0 %vm864_vm2, %v1257_v36  ;;  %v1388_v42 = vmul.f32 %v3090_v40, %v3523_v3  ;;  %v1613_v50 = vpop.permute.xlu1 %1612 }
 0x508   : > { %2826 = vmatprep.mubr.msk.bf16.mxu0 %vm3175_vm1, %v3174_v8  ;;  %v1618_v53 = vsel %vm929_vm4, %v1613_v50, 0 }
 0x509   : > { %v1389_v46 = vpack.c.bf16 %v1388_v42, %v1388_v42 }
 0x50a   : > { %v3092_v47 = vpop.eup %3091 }
 0x50b   : > { %v1499_v49 = vmul.f32 %v3092_v47, %v3525_v4  ;;  %v3094_v52 = vpop.eup %3093  ;;  %v1724_v55 = vpop.permute.xlu1 %1723 }
 0x50c   : > { %v1610_v54 = vmul.f32 %v3094_v52, %v3529_v6  ;;  %v1729_v58 = vsel %vm929_vm4, %v1724_v55, 0 }
 0x50d   : > { %v1500_v51 = vpack.c.bf16 %v1499_v49, %v1499_v49 }
 0x50e   : > { %v1611_v56 = vpack.c.bf16 %v1610_v54, %v1610_v54 }
 0x517   : > { %v1719_v41 = vpop.xlane.xlu0 %1718 }
 0x518   : > { %3095 = vrcp.f32 %v1719_v41 }
 0x51b   : > { %v1391_v43 = vpop.permute.xlu0 %1390 }
 0x51c   : > { %v1396_v44 = vsel %vm929_vm4, %v1391_v43, 0 }
 0x51d   : > { %2825 = vmatpush3.bf16.msra.mxu0 %v1396_v44 }
 0x51e   : > { %2836 = vmatprep.subr.bf16.mxu0 %v3174_v8 }
 0x520   : > { %2827 = vmatmul.mubr.msk.bf16.vlgmr.msra.gmra.mrb[20].mxu0 %vm864_vm2, %v1389_v46 }
 0x521   : > { %2837 = vmatpush3.bf16.msra.mxu0 %v1507_v48  ;;  %2838 = vmatprep.mubr.msk.bf16.mxu0 %vm3175_vm1, %v3174_v8 }
 0x522   : > { %2848 = vmatprep.subr.bf16.mxu0 %v3174_v8  ;;  %v3096_v57 = vpop.eup %3095 }
 0x523   : > { %v1721_v59 = vmul.f32 %v3096_v57, %v3538_v14 }
 0x525   : > { %v1722_v60 = vpack.c.bf16 %v1721_v59, %v1721_v59 }
 0x528   : > { %2839 = vmatmul.mubr.msk.bf16.vlgmr.msra.gmra.mrb[24].mxu0 %vm864_vm2, %v1500_v51 }
 0x529   : > { %2849 = vmatpush3.bf16.msra.mxu0 %v1618_v53  ;;  %2850 = vmatprep.mubr.msk.bf16.mxu0 %vm3175_vm1, %v3174_v8 }
 0x52a   : > { %2860 = vmatprep.subr.bf16.mxu0 %v3174_v8 }
 0x530   : > { %2851 = vmatmul.mubr.msk.bf16.vlgmr.msra.gmra.mrb[28].mxu0 %vm864_vm2, %v1611_v56 }
 0x531   : > { %2861 = vmatpush3.bf16.msra.mxu0 %v1729_v58  ;;  %2862 = vmatprep.mubr.msk.bf16.mxu0 %vm3175_vm1, %v3174_v8 }
 0x532   : > { %2866 = vmatprep.subr.bf16.mxu0 %v3174_v8 }
 0x538   : > { %2863 = vmatmul.mubr.msk.bf16.vlgmr.msra.gmra.mrb[32].mxu0 %vm864_vm2, %v1722_v60 }
 0x539   : > { %2872 = vmatprep.mubr.msk.bf16.mxu0 %vm3175_vm1, %v3174_v8  ;;  %2867 = vmatpush3.bf16.msra.mxu0 %v3030_v24 }
 0x53a   : > { %2868 = vmatprep.subr.bf16.mxu0 %v3174_v8 }
 0x53d   : > { %2869 = vmatpush3.bf16.msra.mxu0 %v3031_v32 }
 0x53e   : > { %2870 = vmatprep.subr.bf16.mxu0 %v3174_v8 }
 0x541   : > { %2871 = vmatpush3.bf16.msra.mxu0 %v1830_v35  ;;  %v2643_v35 = vld [vmem:[%s3872_s18] ss:$0 sm:$0xff] }
 0x542   : > { %2876 = vmatprep.subr.bf16.mxu0 %v3174_v8 }
 0x59d   : > { %v3591_v61 = vpop.f32.mrb[4].mxu0 }
 0x59e   : > { %v2780_v62 = vpop.f32.mrb[5].mxu0 }
 0x59f   : > { %v970_v63 = vpop.f32.mrb[6].mxu0  ;;  %v3033_v62 = vld [vmem:[%s3869_s15] sm:$0xff]  }
 0x5a0   : > { %v2781_v0 = vpop.f32.mrb[7].mxu0  ;;  %v3034_v63 = vld [vmem:[%s3869_s15 + $0x8] sm:$0xff]  }
 0x5a1   : > { %v3035_v0 = vld [vmem:[%s3871_s17] sm:$0xff]  }
 0x5a2   : > { %2885 = vmatpush3.bf16.msra.mxu1 %v3035_v0  ;;  %v3046_v0 = vld [vmem:[%s3920_s11 + $0x8] sm:$0xff]  }
 0x5a3   : > { %2886 = vmatprep.subr.bf16.mxu1 %v3174_v8 }
 0x5a5   : > { %v1078_v1 = vpop.f32.mrb[8].mxu0 }
 0x5a6   : > { %v2792_v2 = vpop.f32.mrb[9].mxu0 }
 0x5a7   : > { %v1081_v3 = vpop.f32.mrb[10].mxu0 }
 0x5a8   : > { %v2793_v4 = vpop.f32.mrb[11].mxu0 }
 0x5ad   : > { %v1189_v5 = vpop.f32.mrb[12].mxu0 }
 0x5ae   : > { %v2804_v6 = vpop.f32.mrb[13].mxu0 }
 0x5af   : > { %v1192_v7 = vpop.f32.mrb[14].mxu0 }
 0x5b0   : > { %v2805_v9 = vpop.f32.mrb[15].mxu0  ;;  %v2638_v7 = vld [vmem:[%s3868_s14] ss:$0 sm:$0xff] }
 0x5da   : > { %v1300_v10 = vpop.f32.mrb[16].mxu0 }
 0x5db   : > { %v2816_v11 = vpop.f32.mrb[17].mxu0 }
 0x5dc   : > { %v1303_v12 = vpop.f32.mrb[18].mxu0 }
 0x5dd   : > { %v2817_v13 = vpop.f32.mrb[19].mxu0  ;;  %v3036_v12 = vld [vmem:[%s3871_s17 + $0x8] sm:$0xff]  }
 0x5de   : > { %2887 = vmatpush3.bf16.msra.mxu1 %v3036_v12  ;;  %v3037_v13 = vld [vmem:[%s3871_s17 + $0x10] sm:$0xff]  }
 0x5df   : > { %2888 = vmatprep.subr.bf16.mxu1 %v3174_v8 }
 0x5e2   : > { %2889 = vmatpush3.bf16.msra.mxu1 %v3037_v13 }
 0x5e3   : > { %2890 = vmatprep.subr.bf16.mxu1 %v3174_v8 }
 0x5f3   : > { %v1432_v14 = vpop.f32.mrb[20].mxu0 }
 0x5f4   : > { %v2828_v15 = vpop.f32.mrb[21].mxu0 }
 0x5f5   : > { %v1435_v16 = vpop.f32.mrb[22].mxu0  ;;  %v3039_v15 = vld [vmem:[%s3871_s17 + $0x20] sm:$0xff]  }
 0x5f6   : > { %v2829_v17 = vpop.f32.mrb[23].mxu0  ;;  %v3040_v16 = vld [vmem:[%s3871_s17 + $0x28] sm:$0xff]  }
 0x5f7   : > { %v3041_v17 = vld [vmem:[%s3871_s17 + $0x30] sm:$0xff]  }
 0x5fb   : > { %v1543_v18 = vpop.f32.mrb[24].mxu0 }
 0x5fc   : > { %1772 = vrot.lane.b32.xlu1 %v1543_v18, %s3199_s5  ;;  %v2840_v19 = vpop.f32.mrb[25].mxu0  ;;  %s3202_s5 = smov 6   ;;  %v3042_v18 = vld [vmem:[%s3871_s17 + $0x38] sm:$0xff]  }
 0x5fd   : > { %v1546_v20 = vpop.f32.mrb[26].mxu0  ;;  %v2639_v19 = vld [vmem:[%s3870_s16] ss:$0 sm:$0xff] }
 0x5fe   : > { %v2841_v21 = vpop.f32.mrb[27].mxu0 }
 0x603   : > { %v1654_v22 = vpop.f32.mrb[28].mxu0 }
 0x604   : > { %1776 = vrot.lane.b32.xlu1 %v1654_v22, %s3200_s0  ;;  %v2852_v25 = vpop.f32.mrb[29].mxu0 }
 0x605   : > { %v1657_v23 = vpop.f32.mrb[30].mxu0 }
 0x606   : > { %v2853_v26 = vpop.f32.mrb[31].mxu0 }
 0x608   : > { %1307 = vrot.lane.b32.xlu1 %v1078_v1, %s3201_s28  ;;  %s3916_s28 = sld [smem:[#allocation16_spill]] }
 0x60b   : > { %v1765_v27 = vpop.f32.mrb[32].mxu0 }
 0x60c   : > { %1315 = vrot.lane.b32.xlu1 %v1300_v10, %s3186_s27  ;;  %1780 = vrot.lane.b32.xlu0 %v1765_v27, %s3202_s5  ;;  %v2864_v28 = vpop.f32.mrb[33].mxu0  ;;  %s3915_s27 = smov 32   ;;  %s2683_s5 = sshll.u32 %s3355_s7, 7 }
 0x60d   : > { %v1768_v29 = vpop.f32.mrb[34].mxu0 }
 0x60e   : > { %v2865_v30 = vpop.f32.mrb[35].mxu0  ;;  %v2632_v50 = vld [vmem:[%s3916_s28] ss:$0 sm:$0xff] }
 0x610   : > { %1311 = vrot.lane.b32.xlu0 %v1189_v5, %s3198_s9  ;;  %v2637_v5 = vld [vmem:[%s3867_s13] ss:$0 sm:$0xff]  ;;  %s3917_s9 = sld [smem:[#allocation19_spill]] }
 0x66e   : > { %v1773_v31 = vpop.permute.xlu1 %1772 }
 0x66f   : > { %v1783_v36 = vsel %vm1330_vm3, %v1432_v14, %v1773_v31  ;;  %v3038_v14 = vld [vmem:[%s3871_s17 + $0x18] sm:$0xff]  }
 0x670   : > { %2891 = vmatpush3.bf16.msra.mxu1 %v3038_v14 }
 0x671   : > { %2892 = vmatprep.subr.bf16.mxu1 %v3174_v8 }
 0x674   : > { %2893 = vmatpush3.bf16.msra.mxu1 %v3039_v15 }
 0x675   : > { %2894 = vmatprep.subr.bf16.mxu1 %v3174_v8 }
 0x676   : > { %v1777_v34 = vpop.permute.xlu1 %1776 }
 0x677   : > { %v1785_v38 = vsel %vm1784_vm5, %v1783_v36, %v1777_v34 }
 0x678   : > { %2895 = vmatpush3.bf16.msra.mxu1 %v3040_v16 }
 0x679   : > { %2896 = vmatprep.subr.bf16.mxu1 %v3174_v8 }
 0x67a   : > { %v1308_v37 = vpop.permute.xlu1 %1307 }
 0x67b   : > { %v1318_v42 = vsel %vm864_vm2, %v3591_v61, %v1308_v37 }
 0x67c   : > { %2897 = vmatpush3.bf16.msra.mxu1 %v3041_v17 }
 0x67d   : > { %2898 = vmatprep.subr.bf16.mxu1 %v3174_v8 }
 0x67e   : > { %v1781_v39 = vpop.permute.xlu0 %1780  ;;  %v1316_v44 = vpop.permute.xlu1 %1315 }
 0x67f   : > { %v1787_v40 = vsel %vm1786_vm6, %v1785_v38, %v1781_v39 }
 0x680   : > { %v2686_v41 = vpack.c.bf16 %v1787_v40, %v1787_v40  ;;  %2899 = vmatpush3.bf16.msra.mxu1 %v3042_v18 }
 0x681   : > { %2932 = vmatprep.subr.bf16.mxu1 %v3174_v8 }
 0x682   : > { %1792 = vrot.lane.b32.xlu0 %v2686_v41, %s3915_s27  ;;  %v1312_v43 = vpop.permute.xlu0 %1311  ;;  %s753_s27 = sand.u32 1, %s3164_s2  }
 0x683   : > { %v1320_v45 = vsel %vm1319_vm7, %v1318_v42, %v1312_v43  ;;  %v3109_v43 = vld [vmem:[%s3387_s8] sm:$0xff]  ;;  %s2607_s28 = sshll.u32 %s753_s27, 3  ;;  %s2531_s8 = scalar_lea.sflag [#allocation4], %s753_s27 }
 0x684   : > { %v1322_v46 = vsel %vm1321_vm8, %v1320_v45, %v1316_v44  ;;  %s755_s0 = scalar_lea.vmem [#allocation3], %s2607_s28  ;;  %s3203_s28 = smov [#allocation3]  }
 0x685   : > { %v1323_v47 = vpack.c.bf16 %v1322_v46, %v1322_v46 }
 0x687   : > { %1325 = vst.msk [vmem:[#allocation2] sm:$0xf] %vm1324_vm9, %v1323_v47 }
 0x6f4   : > { %v1793_v48 = vpop.permute.xlu0 %1792 }
 0x6f5   : > { %1796 = vst.msk [vmem:[#allocation2] sm:$0xf] %vm1795_vm10, %v1793_v48 }
 0x6fc   : > { %v1797_v49 = vld [vmem:[#allocation2] sm:$0xf] }
 0x6fd   : > { %2873 = vmatmul.mubr.msk.bf16.vlgmr.msra.gmra.mrb[36].mxu0 %vm1825_vm11, %v1797_v49 }
 0x6fe   : > { %2880 = vmatprep.mubr.msk.bf16.mxu0 %vm3175_vm1, %v3174_v8  ;;  %2877 = vmatpush3.bf16.msra.mxu0 %v3033_v62  ;;  %v3045_v62 = vld [vmem:[%s3920_s11] sm:$0xff]  }
 0x6ff   : > { %2878 = vmatprep.subr.bf16.mxu0 %v3174_v8 }
 0x702   : > { %2879 = vmatpush3.bf16.msra.mxu0 %v3034_v63 }
 0x703   : > { %2904 = vmatprep.subr.bf16.mxu0 %v3174_v8 }
 0x7d0   : > { %v1866_v51 = vpop.f32.mrb[36].mxu0 }
 0x7d1   : > { %v3617_v52 = vadd.f32 %v2632_v50, %v1866_v51  ;;  %v2874_v53 = vpop.f32.mrb[37].mxu0  ;;  %v3043_v51 = vld [vmem:[%s3917_s9] sm:$0xff]  }
 0x7d2   : > { %v1869_v54 = vpop.f32.mrb[38].mxu0 }
 0x7d3   : > { %v2875_v55 = vpop.f32.mrb[39].mxu0  ;;  %v1896_v56 = vsel %vm764_vm0, %v3617_v52, 0.0 }
 0x7d4   : > { %1897 = vadd.xlane.f32.xlu1 %v1896_v56 }
 0x861   : > { %v1898_v57 = vpop.xlane.xlu1 %1897 }
 0x862   : > { %v1899_v58 = vmul.f32 0.03125, %v1898_v57  ;;  %v2652_v57 = vld [vmem:[%s3918_s6] ss:$0 sm:$0xff]  ;;  %s2544_s6 = sshll.u32 %s755_s0, 4  ;;  %s3813_s6 = int_to_ptr.vmem [resolvable:$true] %s2544_s6 }
 0x863   : > { %s3110_s7 = scalar_lea.vmem %s3813_s6, 128 }
 0x864   : > { %v1900_v59 = vsub.f32 %v3617_v52, %v1899_v58  ;;  %p3111_p11 = scmp.ne.s32.totalorder %s3813_s6, %s3110_s7 }
 0x866   : > { %v1901_v60 = vmul.f32 %v1900_v59, %v1900_v59  ;;  %p3112_p12 = pnand %p3111_p11, %p3372_p5 }
 0x868   : > { %v1902_v61 = vsel %vm764_vm0, %v1901_v60, 0.0  ;;  %p3113_p13 = pneg %p3112_p12 }
 0x869   : > { %1903 = vadd.xlane.f32.xlu0 %v1902_v61 }
 0x8f6   : > { %v1904_v1 = vpop.xlane.xlu0 %1903 }
 0x8f7   : > { %v1905_v2 = vmul.f32 0.03125, %v1904_v1  ;;  %v3047_v1 = vld [vmem:[%s3920_s11 + $0x10] sm:$0xff]  }
 0x8f9   : > { %v1906_v3 = vadd.f32 1e-05, %v1905_v2  ;;  %v3048_v2 = vld [vmem:[%s3920_s11 + $0x18] sm:$0xff]  }
 0x8fb   : > { %3097 = vrsqrt.f32 %v1906_v3  ;;  %v3049_v3 = vld [vmem:[%s3920_s11 + $0x20] sm:$0xff]  }
 0x905   : > { %v3098_v4 = vpop.eup %3097 }
 0x906   : > { %v1908_v6 = vmul.f32 %v3098_v4, %v1900_v59  ;;  %v2653_v59 = vld [vmem:[%s3919_s3] ss:$0 sm:$0xff]  ;;  %v3050_v4 = vld [vmem:[%s3920_s11 + $0x28] sm:$0xff]   ;;  %s3811_s3 = scalar_lea.hbm %s3879_s25, %s2683_s5 }
 0x908   : > { %v1915_v9 = vmul.f32 %v2637_v5, %v1908_v6  ;;  %v3051_v5 = vld [vmem:[%s3920_s11 + $0x30] sm:$0xff]   ;;  %v3052_v6 = vld [vmem:[%s3920_s11 + $0x38] sm:$0xff]  }
 0x90a   : > { %v1922_v10 = vadd.f32 %v2638_v7, %v1915_v9  ;;  %v2654_v7 = vld [vmem:[%s3921_s10] ss:$0 sm:$0xff]  ;;  %s3114_s10 = sshll.u32 %s3203_s28, 4  ;;  %s3115_s10 = int_to_ptr.vmem [resolvable:$false] %s3114_s10 }
 0x90b   : > { %s3116_s11 = scalar_lea.vmem %s3115_s10, 256  ;;  %p3117_p0 = scmp.lt.s32.totalorder %s3813_s6, %s3115_s10 }
 0x90c   : > { %v1923_v11 = vpack.c.bf16 %v1922_v10, %v1922_v10  ;;  %p3118_p1 = scmp.lt.s32.totalorder %s3116_s11, %s3110_s7 }
 0x90e   : > { %2881 = vmatmul.mubr.msk.bf16.vlgmr.msra.gmra.mrb[40].mxu0 %vm764_vm0, %v1923_v11  ;;  %p3119_p2 = por %p3118_p1, %p3117_p0 }
 0x90f   : > { %2908 = vmatprep.mubr.msk.bf16.mxu0 %vm3175_vm1, %v3174_v8  ;;  %2905 = vmatpush3.bf16.msra.mxu0 %v3043_v51  ;;  %v3057_v51 = vld [vmem:[%s3877_s23 + $0x10] sm:$0xff]  }
 0x910   : > { %2906 = vmatprep.subr.bf16.mxu0 %v3174_v8  ;;  %p3120_p3 = pnand %p3119_p2, %p3113_p13 }
 0x9e1   : > { %v1979_v20 = vpop.f32.mrb[40].mxu0 }
 0x9e2   : > { %v1980_v21 = vadd.f32 %v2639_v19, %v1979_v20  ;;  %v2882_v22 = vpop.f32.mrb[41].mxu0 }
 0x9e3   : > { %v1982_v25 = vpop.f32.mrb[42].mxu0 }
 0x9e4   : > { %v1986_v23 = vmul.f32 0.044715, %v1980_v21  ;;  %v2883_v24 = vpop.f32.mrb[43].mxu0  ;;  %v1985_v31 = vmul.f32 0.5, %v1980_v21 }
 0x9e6   : > { %v1987_v26 = vmul.f32 %v1986_v23, %v1980_v21  ;;  %v2658_v23 = vld [vmem:[%s3866_s12] ss:$0 sm:$0xff] }
 0x9e8   : > { %v1988_v27 = vmul.f32 %v1987_v26, %v1980_v21 }
 0x9ea   : > { %v1989_v28 = vadd.f32 %v1988_v27, %v1980_v21 }
 0x9ec   : > { %v1990_v29 = vmul.f32 0.7978846, %v1989_v28 }
 0x9ee   : > { %3099 = vtanh.f32 %v1990_v29 }
 0x9f8   : > { %v3100_v30 = vpop.eup %3099 }
 0x9f9   : > { %v1992_v32 = vadd.f32 1.0, %v3100_v30 }
 0x9fb   : > { %v1993_v33 = vmul.f32 %v1992_v32, %v1985_v31 }
 0x9fd   : > { %v1994_v34 = vpack.c.bf16 %v1993_v33, %v1993_v33 }
 0x9ff   : > { %2901 = vmatmul.mubr.bf16.vlgmr.msra.gmra.mrb[32].mxu1 %v1994_v34 }
 0xa00   : > { %2936 = vmatprep.mubr.msk.bf16.mxu1 %vm3175_vm1, %v3174_v8 }
 0xad2   : > { %v2083_v36 = vpop.f32.mrb[32].mxu1 }
 0xad3   : > { %v2084_v37 = vadd.f32 %v2643_v35, %v2083_v36  ;;  %v2902_v38 = vpop.f32.mrb[33].mxu1  ;;  %v3053_v36 = vld [vmem:[%s3875_s21] sm:$0xff]  }
 0xad4   : > { %v2086_v39 = vpop.f32.mrb[34].mxu1  ;;  %2933 = vmatpush3.bf16.msra.mxu1 %v3053_v36 }
 0xad5   : > { %v2089_v40 = vadd.f32 %v2084_v37, %v3617_v52  ;;  %v2903_v41 = vpop.f32.mrb[35].mxu1  ;;  %v3054_v37 = vld [vmem:[%s3875_s21 + $0x8] sm:$0xff]   ;;  %2934 = vmatprep.subr.bf16.mxu1 %v3174_v8 }
 0xad7   : > { %v2090_v42 = vadd.f32 %v2089_v40, %v3617_v52  ;;  %v3044_v52 = vld [vmem:[%s3917_s9 + $0x8] sm:$0xff]  }
 0xad8   : > { %2907 = vmatpush3.bf16.msra.mxu0 %v3044_v52  ;;  %2935 = vmatpush3.bf16.msra.mxu1 %v3054_v37  ;;  %v3058_v52 = vld [vmem:[%s3877_s23 + $0x18] sm:$0xff]  }
 0xad9   : > { %v3683_v44 = vadd.f32 %v3109_v43, %v2090_v42  ;;  %2912 = vmatprep.subr.bf16.mxu0 %v3174_v8  ;;  %2940 = vmatprep.subr.bf16.mxu1 %v3174_v8  ;;  %v2667_v42 = vld [vmem:[%s3873_s19] ss:$0 sm:$0xff] }
 0xadb   : > { %v2094_v45 = vsel %vm764_vm0, %v3683_v44, 0.0 }
 0xadc   : > { %2095 = vadd.xlane.f32.xlu0 %v2094_v45  ;;  %v2668_v45 = vld [vmem:[%s3874_s20] ss:$0 sm:$0xff] }
 0xb69   : > { %v2096_v46 = vpop.xlane.xlu0 %2095 }
 0xb6a   : > { %v2097_v47 = vmul.f32 0.03125, %v2096_v46 }
 0xb6c   : > { %v2098_v48 = vsub.f32 %v3683_v44, %v2097_v47 }
 0xb6e   : > { %v2099_v49 = vmul.f32 %v2098_v48, %v2098_v48 }
 0xb70   : > { %v2100_v50 = vsel %vm764_vm0, %v2099_v49, 0.0 }
 0xb71   : > { %2101 = vadd.xlane.f32.xlu1 %v2100_v50  ;;  %v3056_v50 = vld [vmem:[%s3877_s23 + $0x8] sm:$0xff]  }
 0xbfe   : > { %v2102_v53 = vpop.xlane.xlu1 %2101 }
 0xbff   : > { %v2103_v54 = vmul.f32 0.03125, %v2102_v53  ;;  %v3059_v53 = vld [vmem:[%s3877_s23 + $0x20] sm:$0xff]  }
 0xc01   : > { %v2104_v55 = vadd.f32 1e-05, %v2103_v54  ;;  %v3060_v54 = vld [vmem:[%s3877_s23 + $0x28] sm:$0xff]  }
 0xc03   : > { %3101 = vrsqrt.f32 %v2104_v55  ;;  %v3061_v55 = vld [vmem:[%s3877_s23 + $0x30] sm:$0xff]  }
 0xc0d   : > { %v3102_v56 = vpop.eup %3101 }
 0xc0e   : > { %v2106_v58 = vmul.f32 %v3102_v56, %v2098_v48  ;;  %v3055_v48 = vld [vmem:[%s3877_s23] sm:$0xff]   ;;  %v3062_v56 = vld [vmem:[%s3877_s23 + $0x38] sm:$0xff]  }
 0xc10   : > { %v2113_v60 = vmul.f32 %v2652_v57, %v2106_v58  ;;  %v2669_v57 = vld [vmem:[%s3876_s22] ss:$0 sm:$0xff] }
 0xc12   : > { %v2120_v61 = vadd.f32 %v2653_v59, %v2113_v60 }
 0xc14   : > { %v2121_v63 = vpack.c.bf16 %v2120_v61, %v2120_v61 }
 0xc16   : > { %2909 = vmatmul.mubr.msk.bf16.vlgmr.msra.gmra.mrb[44].mxu0 %vm764_vm0, %v2121_v63 }
 0xc17   : > { %2913 = vmatpush3.bf16.msra.mxu0 %v3045_v62  ;;  %2928 = vmatprep.mubr.msk.bf16.mxu0 %vm3175_vm1, %v3174_v8 }
 0xc18   : > { %2914 = vmatprep.subr.bf16.mxu0 %v3174_v8 }
 0xc1b   : > { %2915 = vmatpush3.bf16.msra.mxu0 %v3046_v0 }
 0xc1c   : > { %2916 = vmatprep.subr.bf16.mxu0 %v3174_v8 }
 0xc1f   : > { %2917 = vmatpush3.bf16.msra.mxu0 %v3047_v1 }
 0xc20   : > { %2918 = vmatprep.subr.bf16.mxu0 %v3174_v8 }
 0xc23   : > { %2919 = vmatpush3.bf16.msra.mxu0 %v3048_v2 }
 0xc24   : > { %2920 = vmatprep.subr.bf16.mxu0 %v3174_v8 }
 0xc27   : > { %2921 = vmatpush3.bf16.msra.mxu0 %v3049_v3 }
 0xc28   : > { %2922 = vmatprep.subr.bf16.mxu0 %v3174_v8 }
 0xc2b   : > { %2923 = vmatpush3.bf16.msra.mxu0 %v3050_v4 }
 0xc2c   : > { %2924 = vmatprep.subr.bf16.mxu0 %v3174_v8 }
 0xc2f   : > { %2925 = vmatpush3.bf16.msra.mxu0 %v3051_v5 }
 0xc30   : > { %2926 = vmatprep.subr.bf16.mxu0 %v3174_v8 }
 0xc33   : > { %2927 = vmatpush3.bf16.msra.mxu0 %v3052_v6 }
 0xce9   : > { %v2182_v9 = vpop.f32.mrb[44].mxu0 }
 0xcea   : > { %v2183_v10 = vadd.f32 %v2654_v7, %v2182_v9  ;;  %v2910_v11 = vpop.f32.mrb[45].mxu0  ;;  %v2673_v9 = vld [vmem:[%s3878_s24] ss:$0 sm:$0xff] }
 0xceb   : > { %v2185_v12 = vpop.f32.mrb[46].mxu0 }
 0xcec   : > { %v2189_v13 = vmul.f32 0.044715, %v2183_v10  ;;  %v2911_v14 = vpop.f32.mrb[47].mxu0  ;;  %v2188_v20 = vmul.f32 0.5, %v2183_v10 }
 0xcee   : > { %v2190_v15 = vmul.f32 %v2189_v13, %v2183_v10 }
 0xcf0   : > { %v2191_v16 = vmul.f32 %v2190_v15, %v2183_v10 }
 0xcf2   : > { %v2192_v17 = vadd.f32 %v2191_v16, %v2183_v10 }
 0xcf4   : > { %v2193_v18 = vmul.f32 0.7978846, %v2192_v17 }
 0xcf6   : > { %3103 = vtanh.f32 %v2193_v18 }
 0xd00   : > { %v3104_v19 = vpop.eup %3103 }
 0xd01   : > { %v2195_v21 = vadd.f32 1.0, %v3104_v19 }
 0xd03   : > { %v2196_v22 = vmul.f32 %v2195_v21, %v2188_v20 }
 0xd05   : > { %v2197_v25 = vpack.c.bf16 %v2196_v22, %v2196_v22 }
 0xd07   : > { %2929 = vmatmul.mubr.bf16.vlgmr.msra.gmra.mrb[48].mxu0 %v2197_v25 }
 0xdda   : > { %v2303_v24 = vpop.f32.mrb[48].mxu0 }
 0xddb   : > { %v3743_v26 = vadd.f32 %v2658_v23, %v2303_v24  ;;  %v2930_v27 = vpop.f32.mrb[49].mxu0 }
 0xddc   : > { %v2306_v28 = vpop.f32.mrb[50].mxu0 }
 0xddd   : > { %v2931_v29 = vpop.f32.mrb[51].mxu0  ;;  %v2333_v30 = vsel %vm764_vm0, %v3743_v26, 0.0 }
 0xdde   : > { %2334 = vadd.xlane.f32.xlu0 %v2333_v30 }
 0xe6b   : > { %v2335_v31 = vpop.xlane.xlu0 %2334 }
 0xe6c   : > { %v2336_v32 = vmul.f32 0.03125, %v2335_v31 }
 0xe6e   : > { %v2337_v33 = vsub.f32 %v3743_v26, %v2336_v32 }
 0xe70   : > { %v2338_v34 = vmul.f32 %v2337_v33, %v2337_v33 }
 0xe72   : > { %v2339_v35 = vsel %vm764_vm0, %v2338_v34, 0.0 }
 0xe73   : > { %2340 = vadd.xlane.f32.xlu1 %v2339_v35 }
 0xf00   : > { %v2341_v38 = vpop.xlane.xlu1 %2340 }
 0xf01   : > { %v2342_v39 = vmul.f32 0.03125, %v2341_v38 }
 0xf03   : > { %v2343_v40 = vadd.f32 1e-05, %v2342_v39 }
 0xf05   : > { %3105 = vrsqrt.f32 %v2343_v40 }
 0xf0f   : > { %v3106_v41 = vpop.eup %3105 }
 0xf10   : > { %v2345_v43 = vmul.f32 %v3106_v41, %v2337_v33 }
 0xf12   : > { %v2352_v46 = vmul.f32 %v2667_v42, %v2345_v43 }
 0xf14   : > { %v2359_v47 = vadd.f32 %v2668_v45, %v2352_v46 }
 0xf16   : > { %v2360_v49 = vpack.c.bf16 %v2359_v47, %v2359_v47 }
 0xf18   : > { %2937 = vmatmul.mubr.msk.bf16.vlgmr.msra.gmra.mrb[36].mxu1 %vm764_vm0, %v2360_v49 }
 0xf19   : > { %2941 = vmatpush3.bf16.msra.mxu1 %v3055_v48  ;;  %2956 = vmatprep.mubr.msk.bf16.mxu1 %vm3175_vm1, %v3174_v8 }
 0xf1a   : > { %2942 = vmatprep.subr.bf16.mxu1 %v3174_v8 }
 0xf1d   : > { %2943 = vmatpush3.bf16.msra.mxu1 %v3056_v50 }
 0xf1e   : > { %2944 = vmatprep.subr.bf16.mxu1 %v3174_v8 }
 0xf21   : > { %2945 = vmatpush3.bf16.msra.mxu1 %v3057_v51 }
 0xf22   : > { %2946 = vmatprep.subr.bf16.mxu1 %v3174_v8 }
 0xf25   : > { %2947 = vmatpush3.bf16.msra.mxu1 %v3058_v52 }
 0xf26   : > { %2948 = vmatprep.subr.bf16.mxu1 %v3174_v8 }
 0xf29   : > { %2949 = vmatpush3.bf16.msra.mxu1 %v3059_v53 }
 0xf2a   : > { %2950 = vmatprep.subr.bf16.mxu1 %v3174_v8 }
 0xf2d   : > { %2951 = vmatpush3.bf16.msra.mxu1 %v3060_v54 }
 0xf2e   : > { %2952 = vmatprep.subr.bf16.mxu1 %v3174_v8 }
 0xf31   : > { %2953 = vmatpush3.bf16.msra.mxu1 %v3061_v55 }
 0xf32   : > { %2954 = vmatprep.subr.bf16.mxu1 %v3174_v8 }
 0xf35   : > { %2955 = vmatpush3.bf16.msra.mxu1 %v3062_v56 }
 0xfeb   : > { %v2416_v58 = vpop.f32.mrb[36].mxu1 }
 0xfec   : > { %v2417_v59 = vadd.f32 %v2669_v57, %v2416_v58  ;;  %v2938_v60 = vpop.f32.mrb[37].mxu1 }
 0xfed   : > { %v2419_v61 = vpop.f32.mrb[38].mxu1 }
 0xfee   : > { %v2423_v62 = vmul.f32 0.044715, %v2417_v59  ;;  %v2939_v63 = vpop.f32.mrb[39].mxu1  ;;  %v2422_v8 = vmul.f32 0.5, %v2417_v59 }
 0xff0   : > { %v2424_v0 = vmul.f32 %v2423_v62, %v2417_v59 }
 0xff2   : > { %v2425_v1 = vmul.f32 %v2424_v0, %v2417_v59 }
 0xff4   : > { %v2426_v2 = vadd.f32 %v2425_v1, %v2417_v59 }
 0xff6   : > { %v2427_v3 = vmul.f32 0.7978846, %v2426_v2 }
 0xff8   : > { %3107 = vtanh.f32 %v2427_v3 }
0x1002   : > { %v3108_v4 = vpop.eup %3107 }
0x1003   : > { %v2429_v5 = vadd.f32 1.0, %v3108_v4 }
0x1005   : > { %v2430_v6 = vmul.f32 %v2429_v5, %v2422_v8 }
0x1007   : > { %v2431_v7 = vpack.c.bf16 %v2430_v6, %v2430_v6 }
0x1009   : > { %2957 = vmatmul.mubr.bf16.vlgmr.msra.gmra.mrb[40].mxu1 %v2431_v7 }
0x10dc   : > { %v2520_v10 = vpop.f32.mrb[40].mxu1 }
0x10dd   : > { %v2521_v11 = vadd.f32 %v2673_v9, %v2520_v10  ;;  %v2958_v12 = vpop.f32.mrb[41].mxu1 }
0x10de   : > { %v2523_v13 = vpop.f32.mrb[42].mxu1 }
0x10df   : > { %v2526_v14 = vadd.f32 %v2521_v11, %v3743_v26  ;;  %v2959_v15 = vpop.f32.mrb[43].mxu1 }
0x10e1   : > { %v2527_v16 = vadd.f32 %v2526_v14, %v3743_v26 }
0x10e3   : > { %v2528_v17 = vadd.f32 %v2527_v16, %v3683_v44 }
0x10e5   : > { %2529 = vst.msk [vmem:[%s755_s0] sm:$0xff] %vm764_vm0, %v2528_v17 }
0x10e6   : > { %3123 = shalt.err (!%p3120_p3)
}
0x10e7   : > { %s3124_s9 = scalar_lea.hbm %s3811_s3, 128  ;;  %s3128_s0 = scalar_lea.hbm %s3879_s25, 256 }
0x10e8   : > { %p3125_p4 = scmp.ne.s32.totalorder %s3811_s3, %s3124_s9  ;;  %p3129_p9 = scmp.lt.u32.totalorder %s3811_s3, %s3879_s25 }
0x10e9   : > { %p3130_p10 = scmp.lt.u32.totalorder %s3128_s0, %s3124_s9  ;;  %p3132_p12 = scmp.lt.u32.totalorder %s3124_s9, %s3811_s3 }
0x10ea   : > { %p3126_p7 = pnand %p3125_p4, %p3372_p5 }
0x10eb   : > { %p3131_p11 = por %p3130_p10, %p3129_p9 }
0x10ec   : > { %p3127_p8 = pneg %p3126_p7 }
0x10ed   : > { %p3133_p13 = por %p3132_p12, %p3131_p11 }
0x10ef   : > { %p3134_p0 = pnand %p3133_p13, %p3127_p8 }
0x10f1   : > { %3137 = shalt.err (!%p3134_p0)
}
0x10f2   : > { %2960 = dma.vmem_to_hbm [thread:$0]  (%p3372_p5), %s3813_s6, 128, %s3811_s3, %s2531_s8  }
0x10f3 PF: > { %p2966_p1 = scmp.ge.s32.totalorder %s3172_s30, 2  ;;  %s2556_s7 = sand.u32 1, %s3160_s29  }
0x10f4   : > { %s2557_s28 = scalar_lea.sflag [#allocation4], %s2556_s7 }
0x10f5   : > { %p2963_p2 = pnand %p2966_p1, %p3376_p6 }
0x10f7   : > { %3155 = dma.done.wait (!%p2963_p2), %s2557_s28, 128  }
0x10f8   : > { %3157 = vsyncadd (!%p2963_p2), %s2557_s28, 4294967168  ;;  %s3923_s30 = sld [smem:[#allocation7_spill]]  ;;  %s3924_s9 = sld [smem:[#allocation6_spill]] }
0x10f9   : > { %s3925_s6 = sld [smem:[#allocation8_spill]]  ;;  %s3926_s29 = smov %s3164_s2 }
0x10fe   : > { %p35_p3 = scmp.ge.s32.totalorder %s3923_s30, 4   ;;  %s3927_s2 = smov %s3924_s9 }
0x1100   :  { %37 = sbr.rel (!%p35_p3) target bundleno = 16 (0x10), region = 155 }
0x1107   :  { %2562 = vsyncpa [#allocation4], 1 }
0x1108   :  { %2564 = vsyncpa [#allocation4 + $0x1], 1 }

// kernel: tpu_custom_call.1
= control target key start
LH: loop header
LB: loop body
LE: loop exit
PB: predicated region body
PF: predicated region fallthrough
CT: control target
= control target key end

     0   :  { %s3854_s0 = inlined_call_operand.vmem [shape: f32[2,8,32], index: 0, kind: input, shape index: {}]   ;;  %s3855_s1 = inlined_call_operand.vmem [shape: f32[1,32], index: 1, kind: input, shape index: {}]   ;;  %s3856_s2 = inlined_call_operand.vmem [shape: f32[1,32], index: 2, kind: input, shape index: {}]   ;;  %s3857_s3 = inlined_call_operand.vmem [shape: bf16[32,120], index: 3, kind: input, shape index: {}]   ;;  %s3858_s4 = inlined_call_operand.vmem [shape: f32[1,120], index: 4, kind: input, shape index: {}]   ;;  %s3859_s5 = inlined_call_operand.vmem [shape: bf16[40,32], index: 5, kind: input, shape index: {}]   ;;  %s3860_s6 = inlined_call_operand.vmem [shape: f32[1,32], index: 6, kind: input, shape index: {}]   ;;  %s3861_s7 = inlined_call_operand.vmem [shape: f32[1,32], index: 7, kind: input, shape index: {}]   ;;  %s3862_s8 = inlined_call_operand.vmem [shape: f32[1,32], index: 8, kind: input, shape index: {}]   ;;  %s3863_s9 = inlined_call_operand.vmem [shape: bf16[32,128], index: 9, kind: input, shape index: {}]   ;;  %s3864_s10 = inlined_call_operand.vmem [shape: f32[1,128], index: 10, kind: input, shape index: {}]   ;;  %s3865_s11 = inlined_call_operand.vmem [shape: bf16[128,32], index: 11, kind: input, shape index: {}]   ;;  %s3866_s12 = inlined_call_operand.vmem [shape: f32[1,32], index: 12, kind: input, shape index: {}]   ;;  %s3867_s13 = inlined_call_operand.vmem [shape: f32[1,32], index: 13, kind: input, shape index: {}]   ;;  %s3868_s14 = inlined_call_operand.vmem [shape: f32[1,32], index: 14, kind: input, shape index: {}]   ;;  %s3869_s15 = inlined_call_operand.vmem [shape: bf16[32,128], index: 15, kind: input, shape index: {}]   ;;  %s3870_s16 = inlined_call_operand.vmem [shape: f32[1,128], index: 16, kind: input, shape index: {}]   ;;  %s3871_s17 = inlined_call_operand.vmem [shape: bf16[128,32], index: 17, kind: input, shape index: {}]   ;;  %s3872_s18 = inlined_call_operand.vmem [shape: f32[1,32], index: 18, kind: input, shape index: {}]   ;;  %s3873_s19 = inlined_call_operand.vmem [shape: f32[1,32], index: 19, kind: input, shape index: {}]   ;;  %s3874_s20 = inlined_call_operand.vmem [shape: f32[1,32], index: 20, kind: input, shape index: {}]   ;;  %s3875_s21 = inlined_call_operand.vmem [shape: bf16[32,128], index: 21, kind: input, shape index: {}]   ;;  %s3876_s22 = inlined_call_operand.vmem [shape: f32[1,128], index: 22, kind: input, shape index: {}]   ;;  %s3877_s23 = inlined_call_operand.vmem [shape: bf16[128,32], index: 23, kind: input, shape index: {}]   ;;  %s3878_s24 = inlined_call_operand.vmem [shape: f32[1,32], index: 24, kind: input, shape index: {}]   ;;  %s3879_s25 = inlined_call_operand.hbm [shape: f32[2,8,32], index: 25, kind: output, shape index: {}]  }
   0x1   :  { %3890 = sst [smem:[#allocation10_spill]] %s3854_s0 }
   0x2   :  { %3891 = sst [smem:[#allocation11_spill]] %s3855_s1 }
   0x3   :  { %3892 = sst [smem:[#allocation12_spill]] %s3856_s2 }
   0x4   :  { %3893 = sst [smem:[#allocation13_spill]] %s3857_s3 }
   0x5   :  { %3894 = sst [smem:[#allocation14_spill]] %s3858_s4 }
   0x6   :  { %3895 = sst [smem:[#allocation15_spill]] %s3859_s5 }
   0x7   :  { %3896 = sst [smem:[#allocation16_spill]] %s3860_s6 }
   0x8   :  { %3897 = sst [smem:[#allocation17_spill]] %s3861_s7 }
   0x9   :  { %3898 = sst [smem:[#allocation18_spill]] %s3862_s8 }
   0xa   :  { %3899 = sst [smem:[#allocation19_spill]] %s3863_s9 }
   0xb   :  { %3900 = sst [smem:[#allocation20_spill]] %s3864_s10 }
   0xc   :  { %3901 = sst [smem:[#allocation21_spill]] %s3865_s11 }
   0xd   :  { %30 = vsyncpa [#allocation4], 0 }
   0xe   :  { %32 = vsyncpa [#allocation4 + $0x1], 0  ;;  %s3334_s29 = smov 0   ;;  %s3336_s2 = smov 0  }
   0xf   :  { %s3338_s6 = smov 0   ;;  %s3340_s30 = smov 0  }
  0x10 LB: > { %3902 = sst [smem:[#allocation6_spill]] %s3168_s6  ;;  %s3355_s7 = sadd.s32 4294967295, %s3172_s30   ;;  %s3172_s30 = sphi %s3340_s30, %s3923_s30   ;;  %s3168_s6 = sphi %s3338_s6, %s3925_s6   ;;  %s3164_s2 = sphi %s3336_s2, %s3927_s2   ;;  %s3160_s29 = sphi %s3334_s29, %s3926_s29  }
  0x11   : > { %s2603_s3 = sadd.s32 4294967294, %s3172_s30   ;;  %s3359_s26 = sadd.s32 1, %s3172_s30  }
  0x12   : > { %3903 = sst [smem:[#allocation7_spill]] %s3359_s26  ;;  %s575_s1 = sadd.s32 1, %s3168_s6 }
  0x13   : > { %s572_s8 = ssub.s32 %s3172_s30, %s3359_s26  ;;  %p585_p0 = scmp.ne.s32.totalorder %s3168_s6, %s3164_s2 }
  0x14   : > { %p573_p1 = scmp.eq.s32.totalorder %s572_s8, 0  ;;  %p586_p2 = scmp.eq.s32.totalorder %s3355_s7, 1 }
  0x15   : > { %p591_p3 = scmp.ne.s32.totalorder %s3164_s2, %s3160_s29  ;;  %p592_p4 = scmp.eq.s32.totalorder %s2603_s3, 1 }
  0x16   : > { %s3370_s27 = scalar_select %p573_p1, %s3168_s6, %s575_s1  }
  0x17   : > { %p3372_p5 = por %p586_p2, %p585_p0  ;;  %p3376_p6 = por %p592_p4, %p591_p3 }
  0x18   : > { %3904 = sst [smem:[#allocation8_spill]] %s3370_s27  ;;  %p2606_p7 = scmp.ge.s32.totalorder %s3172_s30, 1 }
  0x19   : > { %s3906_s28 = scalar_select %p3376_p6, 1, 0 }
  0x1a   : > { %p689_p8 = scmp.lt.s32.totalorder %s3172_s30, 3 }
  0x1b   : > { %3907 = sst [smem:[#allocation9_spill]] %s3906_s28 }
  0x1c   : > { %p690_p9 = pnand %p2606_p7, %p689_p8 }
  0x1d   : > { %p756_p10 = scmp.lt.s32.totalorder (!%p690_p9), %s3355_s7, 1  ;;  %vm764_vm0 = vcmask (!%p690_p9), 261120   ;;  %s3908_s1 = sld [smem:[#allocation10_spill]] (!%p690_p9)  ;;  %v3174_v8 = vmov (!%p690_p9), 0.0   ;;  %vm3175_vm1 = vmmov (!%p690_p9), 0   ;;  %vm864_vm2 = vcmask (!%p690_p9), 64512  }
  0x1e   : > { %693 = sbr.rel (%p690_p9) target bundleno = 4339 (0x10f3), region = 120  ;;  %s3909_s6 = sld [smem:[#allocation13_spill]] (!%p690_p9)  ;;  %2762 = vmatprep.subr.bf16.mxu0 (!%p690_p9), %v3174_v8  ;;  %2766 = vmatprep.mubr.msk.bf16.mxu0 (!%p690_p9), %vm3175_vm1, %v3174_v8  ;;  %vm1330_vm3 = vcmask (!%p690_p9), 15360   ;;  %vm929_vm4 = vcmask (!%p690_p9), 1043456   ;;  %vm1784_vm5 = vcmask (!%p690_p9), 31744   ;;  %vm1786_vm6 = vcmask (!%p690_p9), 48128  }
  0x1f   : > { %2770 = vmatprep.subr.bf16.mxu1 (!%p690_p9), %v3174_v8  ;;  %2772 = vmatprep.mubr.msk.bf16.mxu1 (!%p690_p9), %vm3175_vm1, %v3174_v8  ;;  %s3911_s3 = sld [smem:[#allocation11_spill]] (!%p690_p9)  ;;  %s3913_s28 = sld [smem:[#allocation14_spill]] (!%p690_p9)  ;;  %vm1319_vm7 = vcmask (!%p690_p9), 130048   ;;  %vm1321_vm8 = vcmask (!%p690_p9), 195584   ;;  %vm1324_vm9 = vcmask (!%p690_p9), 257024   ;;  %vm1795_vm10 = vcmask (!%p690_p9), 322816  }
  0x20   : > { %s3177_s27 = smov (!%p690_p9), 96   ;;  %s3184_s0 = smov (!%p690_p9), 72   ;;  %vm1825_vm11 = vcmask (!%p690_p9), 326656  }
  0x21   : > { %s3920_s11 = sld [smem:[#allocation21_spill]] (!%p690_p9)  ;;  %s3921_s10 = sld [smem:[#allocation20_spill]] (!%p690_p9) }
  0x24   : > { %s3910_s26 = smov (!%p690_p9), %s3909_s6  ;;  %v3028_v7 = vld [vmem:[%s3909_s6] sm:$0xff] (!%p690_p9)   ;;  %s3176_s6 = smov (!%p690_p9), 120  }
  0x25   : > { %s757_s9 = scalar_select %p756_p10, %s3355_s7, 1  ;;  %2763 = vmatpush3.bf16.msra.mxu0 %v3028_v7  ;;  %v3029_v9 = vld [vmem:[%s3910_s26 + $0x8] sm:$0xff]   ;;  %v2609_v14 = vld [vmem:[%s3911_s3] ss:$0 sm:$0xff] }
  0x26   : > { %2764 = vmatprep.subr.bf16.mxu0 %v3174_v8  ;;  %v2611_v20 = vld [vmem:[%s3913_s28] ss:$0 sm:$0xff]  ;;  %s3178_s3 = smov 22   ;;  %s3180_s26 = smov 20  }
  0x27   : > { %s2608_s5 = sshll.u32 %s757_s9, 3  ;;  %s3181_s28 = smov 80  }
  0x28   : > { %s3387_s8 = scalar_lea.vmem %s3908_s1, %s2608_s5  ;;  %s3912_s5 = sld [smem:[#allocation12_spill]] }
  0x29   : > { %v761_v0 = vld [vmem:[%s3387_s8] sm:$0xff]  ;;  %2765 = vmatpush3.bf16.msra.mxu0 %v3029_v9  ;;  %s3179_s1 = smov 88   ;;  %s3182_s9 = smov 18  }
  0x2a   : > { %v765_v1 = vsel %vm764_vm0, %v761_v0, 0.0  ;;  %2776 = vmatprep.subr.bf16.mxu0 %v3174_v8 }
  0x2b   : > { %766 = vadd.xlane.f32.xlu0 %v765_v1 }
  0x2e   : > { %v2610_v16 = vld [vmem:[%s3912_s5] ss:$0 sm:$0xff]  ;;  %s3183_s5 = smov 112  }
  0xb8   : > { %v767_v2 = vpop.xlane.xlu0 %766 }
  0xb9   : > { %v769_v3 = vmul.f32 0.03125, %v767_v2 }
  0xbb   : > { %v770_v4 = vsub.f32 %v761_v0, %v769_v3 }
  0xbd   : > { %v771_v5 = vmul.f32 %v770_v4, %v770_v4 }
  0xbf   : > { %v772_v6 = vsel %vm764_vm0, %v771_v5, 0.0 }
  0xc0   : > { %773 = vadd.xlane.f32.xlu0 %v772_v6 }
 0x14d   : > { %v774_v10 = vpop.xlane.xlu0 %773 }
 0x14e   : > { %v775_v11 = vmul.f32 0.03125, %v774_v10 }
 0x150   : > { %v776_v12 = vadd.f32 1e-05, %v775_v11 }
 0x152   : > { %3063 = vrsqrt.f32 %v776_v12 }
 0x15c   : > { %v3064_v13 = vpop.eup %3063 }
 0x15d   : > { %v778_v15 = vmul.f32 %v3064_v13, %v770_v4 }
 0x15f   : > { %v785_v17 = vmul.f32 %v2609_v14, %v778_v15 }
 0x161   : > { %v792_v18 = vadd.f32 %v2610_v16, %v785_v17 }
 0x163   : > { %v793_v19 = vpack.c.bf16 %v792_v18, %v792_v18 }
 0x165   : > { %2767 = vmatmul.mubr.msk.bf16.vlgmr.msra.gmra.mrb[0].mxu0 %vm764_vm0, %v793_v19 }
 0x166   : > { %2778 = vmatprep.mubr.msk.bf16.mxu0 %vm3175_vm1, %v3174_v8 }
 0x238   : > { %v854_v21 = vpop.f32.mrb[0].mxu0 }
 0x239   : > { %v855_v22 = vadd.f32 %v2611_v20, %v854_v21  ;;  %v2768_v23 = vpop.f32.mrb[1].mxu0 }
 0x23a   : > { %v857_v24 = vpop.f32.mrb[2].mxu0 }
 0x23b   : > { %v3418_v25 = vpack.c.bf16 %v855_v22, %v855_v22  ;;  %v2769_v26 = vpop.f32.mrb[3].mxu0 }
 0x23d   : > { %973 = vrot.lane.b32.xlu0 %v3418_v25, %s3176_s6  ;;  %862 = vrot.lane.b32.xlu1 %v3418_v25, %s3177_s27  ;;  %s3185_s6 = smov 104   ;;  %s3186_s27 = smov 24  }
 0x241   : > { %1440 = vrot.lane.b32.xlu0 %v3418_v25, %s3178_s3  ;;  %975 = vrot.lane.b32.xlu1 %v3418_v25, %s3179_s1  ;;  %s3888_s3 = smov 32   ;;  %s3188_s1 = smov 30  }
 0x245   : > { %1551 = vrot.lane.b32.xlu0 %v3418_v25, %s3180_s26  ;;  %1086 = vrot.lane.b32.xlu1 %v3418_v25, %s3181_s28  ;;  %s3189_s26 = smov 28   ;;  %s3190_s28 = smov 26  }
 0x249   : > { %1662 = vrot.lane.b32.xlu0 %v3418_v25, %s3182_s9  ;;  %1084 = vrot.lane.b32.xlu1 %v3418_v25, %s3183_s5  ;;  %s3191_s9 = smov 56   ;;  %s3192_s5 = smov 64  }
 0x24d   : > { %1197 = vrot.lane.b32.xlu1 %v3418_v25, %s3184_s0  ;;  %s3193_s0 = smov 48  }
 0x251   : > { %1195 = vrot.lane.b32.xlu1 %v3418_v25, %s3185_s6  ;;  %s3194_s6 = smov 40  }
 0x255   : > { %1328 = vrot.lane.b32.xlu1 %v3418_v25, %s3186_s27 }
 0x259   : > { %1326 = vrot.lane.b32.xlu1 %v3418_v25, %s3888_s3  ;;  %s3919_s3 = sld [smem:[#allocation18_spill]] }
 0x25d   : > { %1438 = vrot.lane.b32.xlu1 %v3418_v25, %s3188_s1  ;;  %s3195_s1 = smov 14  }
 0x261   : > { %1549 = vrot.lane.b32.xlu1 %v3418_v25, %s3189_s26  ;;  %s3196_s26 = smov 12  }
 0x265   : > { %1660 = vrot.lane.b32.xlu1 %v3418_v25, %s3190_s28  ;;  %s3197_s28 = smov 10  }
 0x2af   : > { %v863_v27 = vpop.permute.xlu1 %862  ;;  %v974_v33 = vpop.permute.xlu0 %973 }
 0x2b0   : > { %v869_v28 = vsel %vm864_vm2, %v863_v27, 0 }
 0x2b1   : > { %2771 = vmatpush3.bf16.xpose.msra.mxu1 %v869_v28 }
 0x2b2   : > { %2782 = vmatprep.subr.bf16.mxu1 %v3174_v8 }
 0x2b3   : > { %v976_v29 = vpop.permute.xlu1 %975  ;;  %v1441_v40 = vpop.permute.xlu0 %1440 }
 0x2b4   : > { %v981_v31 = vsel %vm864_vm2, %v976_v29, 0  ;;  %v1446_v42 = vsel %vm1330_vm3, %v1441_v40, 0 }
 0x2b7   : > { %v1087_v30 = vpop.permute.xlu1 %1086  ;;  %v1552_v43 = vpop.permute.xlu0 %1551 }
 0x2b8   : > { %2773 = vmatmul.mubr.msk.bf16.vlgmr.msra.gmra.mrb[0].mxu1 %vm864_vm2, %v3418_v25  ;;  %v1092_v34 = vsel %vm864_vm2, %v1087_v30, 0  ;;  %v1557_v45 = vsel %vm1330_vm3, %v1552_v43, 0 }
 0x2b9   : > { %2783 = vmatpush3.bf16.xpose.msra.mxu1 %v981_v31  ;;  %2784 = vmatprep.mubr.msk.bf16.mxu1 %vm3175_vm1, %v3174_v8 }
 0x2ba   : > { %2794 = vmatprep.subr.bf16.mxu1 %v3174_v8 }
 0x2bb   : > { %v1085_v32 = vpop.permute.xlu1 %1084  ;;  %v1663_v46 = vpop.permute.xlu0 %1662 }
 0x2bc   : > { %v1668_v48 = vsel %vm1330_vm3, %v1663_v46, 0 }
 0x2bf   : > { %v1198_v35 = vpop.permute.xlu1 %1197 }
 0x2c0   : > { %2785 = vmatmul.mubr.msk.bf16.vlgmr.msra.gmra.mrb[4].mxu1 %vm864_vm2, %v974_v33  ;;  %v1203_v37 = vsel %vm864_vm2, %v1198_v35, 0 }
 0x2c1   : > { %2795 = vmatpush3.bf16.xpose.msra.mxu1 %v1092_v34  ;;  %2796 = vmatprep.mubr.msk.bf16.mxu1 %vm3175_vm1, %v3174_v8 }
 0x2c2   : > { %2806 = vmatprep.subr.bf16.mxu1 %v3174_v8 }
 0x2c3   : > { %v1196_v36 = vpop.permute.xlu1 %1195 }
 0x2c7   : > { %v1329_v38 = vpop.permute.xlu1 %1328 }
 0x2c8   : > { %2797 = vmatmul.mubr.msk.bf16.vlgmr.msra.gmra.mrb[8].mxu1 %vm864_vm2, %v1085_v32  ;;  %v1335_v39 = vsel %vm1330_vm3, %v1329_v38, 0 }
 0x2c9   : > { %2807 = vmatpush3.bf16.xpose.msra.mxu1 %v1203_v37  ;;  %2808 = vmatprep.mubr.msk.bf16.mxu1 %vm3175_vm1, %v3174_v8 }
 0x2ca   : > { %2818 = vmatprep.subr.bf16.mxu1 %v3174_v8 }
 0x2cb   : > { %v1327_v41 = vpop.permute.xlu1 %1326 }
 0x2cf   : > { %v1439_v44 = vpop.permute.xlu1 %1438 }
 0x2d0   : > { %2809 = vmatmul.mubr.msk.bf16.vlgmr.msra.gmra.mrb[12].mxu1 %vm864_vm2, %v1196_v36 }
 0x2d1   : > { %2819 = vmatpush3.bf16.xpose.msra.mxu1 %v1335_v39  ;;  %2820 = vmatprep.mubr.msk.bf16.mxu1 %vm3175_vm1, %v3174_v8 }
 0x2d2   : > { %2830 = vmatprep.subr.bf16.mxu1 %v3174_v8 }
 0x2d3   : > { %v1550_v47 = vpop.permute.xlu1 %1549 }
 0x2d7   : > { %v1661_v49 = vpop.permute.xlu1 %1660 }
 0x2d8   : > { %2821 = vmatmul.mubr.msk.bf16.vlgmr.msra.gmra.mrb[16].mxu1 %vm1330_vm3, %v1327_v41 }
 0x2d9   : > { %2831 = vmatpush3.bf16.xpose.msra.mxu1 %v1446_v42  ;;  %2832 = vmatprep.mubr.msk.bf16.mxu1 %vm3175_vm1, %v3174_v8 }
 0x2da   : > { %2842 = vmatprep.subr.bf16.mxu1 %v3174_v8 }
 0x2e0   : > { %2833 = vmatmul.mubr.msk.bf16.vlgmr.msra.gmra.mrb[20].mxu1 %vm1330_vm3, %v1439_v44 }
 0x2e1   : > { %2843 = vmatpush3.bf16.xpose.msra.mxu1 %v1557_v45  ;;  %2844 = vmatprep.mubr.msk.bf16.mxu1 %vm3175_vm1, %v3174_v8 }
 0x2e2   : > { %2854 = vmatprep.subr.bf16.mxu1 %v3174_v8 }
 0x2e8   : > { %2845 = vmatmul.mubr.msk.bf16.vlgmr.msra.gmra.mrb[24].mxu1 %vm1330_vm3, %v1550_v47 }
 0x2e9   : > { %2855 = vmatpush3.bf16.xpose.msra.mxu1 %v1668_v48  ;;  %2856 = vmatprep.mubr.msk.bf16.mxu1 %vm3175_vm1, %v3174_v8 }
 0x2ea   : > { %2884 = vmatprep.subr.bf16.mxu1 %v3174_v8 }
 0x2f0   : > { %2857 = vmatmul.mubr.msk.bf16.vlgmr.msra.gmra.mrb[28].mxu1 %vm1330_vm3, %v1661_v49 }
 0x2f1   : > { %2900 = vmatprep.mubr.msk.bf16.mxu1 %vm3175_vm1, %v3174_v8 }
 0x38b   : > { %v905_v50 = vpop.f32.mrb[0].mxu1 }
 0x38c   : > { %v911_v51 = vmul.f32 0.35355338, %v905_v50  ;;  %v2774_v52 = vpop.f32.mrb[1].mxu1 }
 0x38d   : > { %v908_v53 = vpop.f32.mrb[2].mxu1 }
 0x38e   : > { %v2775_v54 = vpop.f32.mrb[3].mxu1  ;;  %v912_v55 = vsel %vm864_vm2, %v911_v51, -inf }
 0x38f   : > { %913 = vmax.xlane.f32.xlu0 %v912_v55 }
 0x393   : > { %v1017_v56 = vpop.f32.mrb[4].mxu1 }
 0x394   : > { %v1023_v57 = vmul.f32 0.35355338, %v1017_v56  ;;  %v2786_v58 = vpop.f32.mrb[5].mxu1 }
 0x395   : > { %v1020_v59 = vpop.f32.mrb[6].mxu1 }
 0x396   : > { %v2787_v60 = vpop.f32.mrb[7].mxu1  ;;  %v1024_v61 = vsel %vm864_vm2, %v1023_v57, -inf }
 0x397   : > { %1025 = vmax.xlane.f32.xlu1 %v1024_v61 }
 0x39b   : > { %v1128_v62 = vpop.f32.mrb[8].mxu1 }
 0x39c   : > { %v1134_v63 = vmul.f32 0.35355338, %v1128_v62  ;;  %v2798_v0 = vpop.f32.mrb[9].mxu1 }
 0x39d   : > { %v1131_v1 = vpop.f32.mrb[10].mxu1 }
 0x39e   : > { %v2799_v2 = vpop.f32.mrb[11].mxu1  ;;  %v1135_v3 = vsel %vm864_vm2, %v1134_v63, -inf }
 0x39f   : > { %1136 = vmax.xlane.f32.xlu0 %v1135_v3 }
 0x3a3   : > { %v1239_v4 = vpop.f32.mrb[12].mxu1 }
 0x3a4   : > { %v3481_v5 = vmul.f32 0.35355338, %v1239_v4  ;;  %v2810_v6 = vpop.f32.mrb[13].mxu1 }
 0x3a5   : > { %v1242_v7 = vpop.f32.mrb[14].mxu1 }
 0x3a6   : > { %v2811_v9 = vpop.f32.mrb[15].mxu1  ;;  %v1246_v10 = vsel %vm864_vm2, %v3481_v5, -inf }
 0x3a7   : > { %1247 = vmax.xlane.f32.xlu0 %v1246_v10 }
 0x3ab   : > { %v1371_v11 = vpop.f32.mrb[16].mxu1 }
 0x3ac   : > { %v3485_v12 = vmul.f32 0.35355338, %v1371_v11  ;;  %v2822_v13 = vpop.f32.mrb[17].mxu1 }
 0x3ad   : > { %v1374_v14 = vpop.f32.mrb[18].mxu1 }
 0x3ae   : > { %v2823_v15 = vpop.f32.mrb[19].mxu1  ;;  %v1378_v16 = vsel %vm864_vm2, %v3485_v12, -inf }
 0x3af   : > { %1379 = vmax.xlane.f32.xlu1 %v1378_v16 }
 0x3b3   : > { %v1482_v17 = vpop.f32.mrb[20].mxu1 }
 0x3b4   : > { %v3489_v18 = vmul.f32 0.35355338, %v1482_v17  ;;  %v2834_v19 = vpop.f32.mrb[21].mxu1 }
 0x3b5   : > { %v1485_v20 = vpop.f32.mrb[22].mxu1 }
 0x3b6   : > { %v2835_v21 = vpop.f32.mrb[23].mxu1  ;;  %v1489_v22 = vsel %vm864_vm2, %v3489_v18, -inf }
 0x3b7   : > { %1490 = vmax.xlane.f32.xlu0 %v1489_v22 }
 0x3bb   : > { %v1593_v23 = vpop.f32.mrb[24].mxu1 }
 0x3bc   : > { %v1599_v24 = vmul.f32 0.35355338, %v1593_v23  ;;  %v2846_v26 = vpop.f32.mrb[25].mxu1 }
 0x3bd   : > { %v1596_v27 = vpop.f32.mrb[26].mxu1 }
 0x3be   : > { %v2847_v28 = vpop.f32.mrb[27].mxu1  ;;  %v1600_v29 = vsel %vm864_vm2, %v1599_v24, -inf }
 0x3bf   : > { %1601 = vmax.xlane.f32.xlu1 %v1600_v29 }
 0x3c3   : > { %v1704_v30 = vpop.f32.mrb[28].mxu1 }
 0x3c4   : > { %v2858_v31 = vpop.f32.mrb[29].mxu1  ;;  %v3496_v34 = vmul.f32 0.35355338, %v1704_v30 }
 0x3c5   : > { %v1707_v32 = vpop.f32.mrb[30].mxu1 }
 0x3c6   : > { %v2859_v33 = vpop.f32.mrb[31].mxu1  ;;  %v1711_v35 = vsel %vm864_vm2, %v3496_v34, -inf }
 0x3cd   : > { %1036 = vrot.lane.b32.xlu0 %v3418_v25, %s3191_s9  ;;  %s3198_s9 = smov 16  }
 0x3d0   : > { %924 = vrot.lane.b32.xlu1 %v3418_v25, %s3192_s5  ;;  %s3199_s5 = smov 2  }
 0x3ec   : > { %1712 = vmax.xlane.f32.xlu0 %v1711_v35 }
 0x41c   : > { %v914_v36 = vpop.xlane.xlu0 %913 }
 0x41d   : > { %v915_v37 = vsub.f32 %v911_v51, %v914_v36 }
 0x41f   : > { %v916_v38 = vmul.f32 1.442695, %v915_v37 }
 0x421   : > { %3065 = vpow2.f32 %v916_v38 }
 0x424   : > { %v1026_v39 = vpop.xlane.xlu1 %1025 }
 0x425   : > { %v1027_v40 = vsub.f32 %v1023_v57, %v1026_v39 }
 0x427   : > { %v1028_v41 = vmul.f32 1.442695, %v1027_v40 }
 0x429   : > { %3067 = vpow2.f32 %v1028_v41 }
 0x42b   : > { %v3500_v42 = vpop.eup %3065 }
 0x42c   : > { %v1137_v43 = vpop.xlane.xlu0 %1136  ;;  %v918_v44 = vsel %vm864_vm2, %v3500_v42, 0.0 }
 0x42d   : > { %v1138_v45 = vsub.f32 %v1134_v63, %v1137_v43  ;;  %919 = vadd.xlane.f32.xlu1 %v918_v44 }
 0x42f   : > { %v1139_v46 = vmul.f32 1.442695, %v1138_v45 }
 0x431   : > { %3069 = vpow2.f32 %v1139_v46 }
 0x433   : > { %v3504_v47 = vpop.eup %3067 }
 0x434   : > { %v1030_v48 = vsel %vm864_vm2, %v3504_v47, 0.0  ;;  %v1248_v54 = vpop.xlane.xlu0 %1247 }
 0x435   : > { %1031 = vadd.xlane.f32.xlu0 %v1030_v48  ;;  %v1249_v56 = vsub.f32 %v3481_v5, %v1248_v54 }
 0x437   : > { %v1250_v57 = vmul.f32 1.442695, %v1249_v56 }
 0x439   : > { %3071 = vpow2.f32 %v1250_v57 }
 0x43b   : > { %v3508_v49 = vpop.eup %3069 }
 0x43c   : > { %v1141_v50 = vsel %vm864_vm2, %v3508_v49, 0.0  ;;  %v1380_v51 = vpop.xlane.xlu1 %1379 }
 0x43d   : > { %1142 = vadd.xlane.f32.xlu1 %v1141_v50  ;;  %v1381_v58 = vsub.f32 %v3485_v12, %v1380_v51 }
 0x43f   : > { %v1382_v61 = vmul.f32 1.442695, %v1381_v58 }
 0x441   : > { %3073 = vpow2.f32 %v1382_v61 }
 0x443   : > { %v3519_v1 = vpop.eup %3071 }
 0x444   : > { %v1491_v59 = vpop.xlane.xlu0 %1490  ;;  %v1252_v2 = vsel %vm864_vm2, %v3519_v1, 0.0 }
 0x445   : > { %v1492_v60 = vsub.f32 %v3489_v18, %v1491_v59 }
 0x447   : > { %v1493_v63 = vmul.f32 1.442695, %v1492_v60 }
 0x448   : > { %v1037_v10 = vpop.permute.xlu0 %1036 }
 0x449   : > { %3075 = vpow2.f32 %v1493_v63  ;;  %v1042_v21 = vsel %vm929_vm4, %v1037_v10, 0 }
 0x44b   : > { %1147 = vrot.lane.b32.xlu0 %v3418_v25, %s3193_s0  ;;  %v3523_v3 = vpop.eup %3073  ;;  %s3200_s0 = smov 4  }
 0x44c   : > { %v1602_v52 = vpop.xlane.xlu1 %1601  ;;  %v1384_v5 = vsel %vm864_vm2, %v3523_v3, 0.0 }
 0x44d   : > { %v1603_v62 = vsub.f32 %v1599_v24, %v1602_v52 }
 0x44e   : > { %1258 = vrot.lane.b32.xlu1 %v3418_v25, %s3194_s6  ;;  %s3918_s6 = sld [smem:[#allocation17_spill]] }
 0x44f   : > { %v1604_v0 = vmul.f32 1.442695, %v1603_v62 }
 0x450   : > { %v925_v53 = vpop.permute.xlu1 %924 }
 0x451   : > { %v931_v55 = vsel %vm929_vm4, %v925_v53, 0  ;;  %3077 = vpow2.f32 %v1604_v0 }
 0x452   : > { %2777 = vmatpush3.bf16.msra.mxu0 %v931_v55 }
 0x453   : > { %2788 = vmatprep.subr.bf16.mxu0 %v3174_v8  ;;  %v3525_v4 = vpop.eup %3075 }
 0x454   : > { %v1495_v7 = vsel %vm864_vm2, %v3525_v4, 0.0 }
 0x45b   : > { %v3529_v6 = vpop.eup %3077 }
 0x45c   : > { %v1606_v9 = vsel %vm864_vm2, %v3529_v6, 0.0 }
 0x46a   : > { %1253 = vadd.xlane.f32.xlu0 %v1252_v2 }
 0x46e   : > { %1385 = vadd.xlane.f32.xlu0 %v1384_v5 }
 0x472   : > { %1496 = vadd.xlane.f32.xlu1 %v1495_v7  ;;  %1607 = vadd.xlane.f32.xlu0 %v1606_v9 }
 0x479   : > { %v1713_v11 = vpop.xlane.xlu0 %1712 }
 0x47a   : > { %v1714_v12 = vsub.f32 %v3496_v34, %v1713_v11 }
 0x47c   : > { %v1715_v13 = vmul.f32 1.442695, %v1714_v12 }
 0x47e   : > { %3079 = vpow2.f32 %v1715_v13 }
 0x483   : > { %1501 = vrot.lane.b32.xlu1 %v3418_v25, %s3195_s1 }
 0x487   : > { %1612 = vrot.lane.b32.xlu1 %v3418_v25, %s3196_s26  ;;  %s3914_s26 = sld [smem:[#allocation15_spill]] }
 0x488   : > { %v3538_v14 = vpop.eup %3079 }
 0x489   : > { %v1717_v15 = vsel %vm864_vm2, %v3538_v14, 0.0 }
 0x48a   : > { %1718 = vadd.xlane.f32.xlu0 %v1717_v15 }
 0x48b   : > { %1723 = vrot.lane.b32.xlu1 %v3418_v25, %s3197_s28  ;;  %s3201_s28 = smov 8  }
 0x4a0   : > { %1390 = vrot.lane.b32.xlu0 %v3418_v25, %s3198_s9 }
 0x4ba   : > { %v920_v16 = vpop.xlane.xlu1 %919 }
 0x4bb   : > { %3081 = vrcp.f32 %v920_v16 }
 0x4c2   : > { %v1032_v17 = vpop.xlane.xlu0 %1031 }
 0x4c3   : > { %3083 = vrcp.f32 %v1032_v17 }
 0x4c5   : > { %v3082_v18 = vpop.eup %3081 }
 0x4c6   : > { %v922_v19 = vmul.f32 %v3082_v18, %v3500_v42  ;;  %v1148_v24 = vpop.permute.xlu0 %1147 }
 0x4c7   : > { %v1153_v27 = vsel %vm929_vm4, %v1148_v24, 0  ;;  %v3030_v24 = vld [vmem:[%s3914_s26] sm:$0xff]  }
 0x4c8   : > { %v923_v20 = vpack.c.bf16 %v922_v19, %v922_v19 }
 0x4ca   : > { %2779 = vmatmul.mubr.msk.bf16.vlgmr.msra.gmra.mrb[4].mxu0 %vm864_vm2, %v923_v20  ;;  %v1143_v22 = vpop.xlane.xlu1 %1142 }
 0x4cb   : > { %2789 = vmatpush3.bf16.msra.mxu0 %v1042_v21  ;;  %3085 = vrcp.f32 %v1143_v22  ;;  %2790 = vmatprep.mubr.msk.bf16.mxu0 %vm3175_vm1, %v3174_v8 }
 0x4cc   : > { %2800 = vmatprep.subr.bf16.mxu0 %v3174_v8 }
 0x4cd   : > { %v3084_v25 = vpop.eup %3083 }
 0x4ce   : > { %v1034_v23 = vmul.f32 %v3084_v25, %v3504_v47  ;;  %v1259_v30 = vpop.permute.xlu1 %1258 }
 0x4cf   : > { %v1264_v32 = vsel %vm929_vm4, %v1259_v30, 0 }
 0x4d0   : > { %v1035_v26 = vpack.c.bf16 %v1034_v23, %v1034_v23 }
 0x4d2   : > { %2791 = vmatmul.mubr.msk.bf16.vlgmr.msra.gmra.mrb[8].mxu0 %vm864_vm2, %v1035_v26 }
 0x4d3   : > { %2801 = vmatpush3.bf16.msra.mxu0 %v1153_v27  ;;  %2802 = vmatprep.mubr.msk.bf16.mxu0 %vm3175_vm1, %v3174_v8 }
 0x4d4   : > { %2812 = vmatprep.subr.bf16.mxu0 %v3174_v8 }
 0x4d5   : > { %v3086_v28 = vpop.eup %3085 }
 0x4d6   : > { %v1145_v29 = vmul.f32 %v3086_v28, %v3508_v49 }
 0x4d8   : > { %v1146_v31 = vpack.c.bf16 %v1145_v29, %v1145_v29 }
 0x4da   : > { %2803 = vmatmul.mubr.msk.bf16.vlgmr.msra.gmra.mrb[12].mxu0 %vm864_vm2, %v1146_v31 }
 0x4db   : > { %2813 = vmatpush3.bf16.msra.mxu0 %v1264_v32  ;;  %2814 = vmatprep.mubr.msk.bf16.mxu0 %vm3175_vm1, %v3174_v8  ;;  %v3031_v32 = vld [vmem:[%s3914_s26 + $0x8] sm:$0xff]  }
 0x4dc   : > { %2824 = vmatprep.subr.bf16.mxu0 %v3174_v8 }
 0x4f7   : > { %v1254_v33 = vpop.xlane.xlu0 %1253 }
 0x4f8   : > { %3087 = vrcp.f32 %v1254_v33  ;;  %v3032_v33 = vld [vmem:[%s3914_s26 + $0x10] ss:$0 sps:$4 sm:$0xff]  }
 0x4fb   : > { %v1386_v37 = vpop.xlane.xlu0 %1385 }
 0x4fc   : > { %3089 = vrcp.f32 %v1386_v37 }
 0x4ff   : > { %v1497_v38 = vpop.xlane.xlu1 %1496  ;;  %v1608_v39 = vpop.xlane.xlu0 %1607 }
 0x500   : > { %3091 = vrcp.f32 %v1497_v38 }
 0x501   : > { %3093 = vrcp.f32 %v1608_v39 }
 0x502   : > { %v3088_v34 = vpop.eup %3087 }
 0x503   : > { %v1256_v35 = vmul.f32 %v3088_v34, %v3519_v1  ;;  %v1502_v45 = vpop.permute.xlu1 %1501 }
 0x504   : > { %v1507_v48 = vsel %vm929_vm4, %v1502_v45, 0 }
 0x505   : > { %v1257_v36 = vpack.c.bf16 %v1256_v35, %v1256_v35  ;;  %v1830_v35 = vsel %vm929_vm4, %v3032_v33, 0 }
 0x506   : > { %v3090_v40 = vpop.eup %3089 }
 0x507   : > { %2815 = vmatmul.mubr.msk.bf16.vlgmr.msra.gmra.mrb[16].mxu0 %vm864_vm2, %v1257_v36  ;;  %v1388_v42 = vmul.f32 %v3090_v40, %v3523_v3  ;;  %v1613_v50 = vpop.permute.xlu1 %1612 }
 0x508   : > { %2826 = vmatprep.mubr.msk.bf16.mxu0 %vm3175_vm1, %v3174_v8  ;;  %v1618_v53 = vsel %vm929_vm4, %v1613_v50, 0 }
 0x509   : > { %v1389_v46 = vpack.c.bf16 %v1388_v42, %v1388_v42 }
 0x50a   : > { %v3092_v47 = vpop.eup %3091 }
 0x50b   : > { %v1499_v49 = vmul.f32 %v3092_v47, %v3525_v4  ;;  %v3094_v52 = vpop.eup %3093  ;;  %v1724_v55 = vpop.permute.xlu1 %1723 }
 0x50c   : > { %v1610_v54 = vmul.f32 %v3094_v52, %v3529_v6  ;;  %v1729_v58 = vsel %vm929_vm4, %v1724_v55, 0 }
 0x50d   : > { %v1500_v51 = vpack.c.bf16 %v1499_v49, %v1499_v49 }
 0x50e   : > { %v1611_v56 = vpack.c.bf16 %v1610_v54, %v1610_v54 }
 0x517   : > { %v1719_v41 = vpop.xlane.xlu0 %1718 }
 0x518   : > { %3095 = vrcp.f32 %v1719_v41 }
 0x51b   : > { %v1391_v43 = vpop.permute.xlu0 %1390 }
 0x51c   : > { %v1396_v44 = vsel %vm929_vm4, %v1391_v43, 0 }
 0x51d   : > { %2825 = vmatpush3.bf16.msra.mxu0 %v1396_v44 }
 0x51e   : > { %2836 = vmatprep.subr.bf16.mxu0 %v3174_v8 }
 0x520   : > { %2827 = vmatmul.mubr.msk.bf16.vlgmr.msra.gmra.mrb[20].mxu0 %vm864_vm2, %v1389_v46 }
 0x521   : > { %2837 = vmatpush3.bf16.msra.mxu0 %v1507_v48  ;;  %2838 = vmatprep.mubr.msk.bf16.mxu0 %vm3175_vm1, %v3174_v8 }
 0x522   : > { %2848 = vmatprep.subr.bf16.mxu0 %v3174_v8  ;;  %v3096_v57 = vpop.eup %3095 }
 0x523   : > { %v1721_v59 = vmul.f32 %v3096_v57, %v3538_v14 }
 0x525   : > { %v1722_v60 = vpack.c.bf16 %v1721_v59, %v1721_v59 }
 0x528   : > { %2839 = vmatmul.mubr.msk.bf16.vlgmr.msra.gmra.mrb[24].mxu0 %vm864_vm2, %v1500_v51 }
 0x529   : > { %2849 = vmatpush3.bf16.msra.mxu0 %v1618_v53  ;;  %2850 = vmatprep.mubr.msk.bf16.mxu0 %vm3175_vm1, %v3174_v8 }
 0x52a   : > { %2860 = vmatprep.subr.bf16.mxu0 %v3174_v8 }
 0x530   : > { %2851 = vmatmul.mubr.msk.bf16.vlgmr.msra.gmra.mrb[28].mxu0 %vm864_vm2, %v1611_v56 }
 0x531   : > { %2861 = vmatpush3.bf16.msra.mxu0 %v1729_v58  ;;  %2862 = vmatprep.mubr.msk.bf16.mxu0 %vm3175_vm1, %v3174_v8 }
 0x532   : > { %2866 = vmatprep.subr.bf16.mxu0 %v3174_v8 }
 0x538   : > { %2863 = vmatmul.mubr.msk.bf16.vlgmr.msra.gmra.mrb[32].mxu0 %vm864_vm2, %v1722_v60 }
 0x539   : > { %2872 = vmatprep.mubr.msk.bf16.mxu0 %vm3175_vm1, %v3174_v8  ;;  %2867 = vmatpush3.bf16.msra.mxu0 %v3030_v24 }
 0x53a   : > { %2868 = vmatprep.subr.bf16.mxu0 %v3174_v8 }
 0x53d   : > { %2869 = vmatpush3.bf16.msra.mxu0 %v3031_v32 }
 0x53e   : > { %2870 = vmatprep.subr.bf16.mxu0 %v3174_v8 }
 0x541   : > { %2871 = vmatpush3.bf16.msra.mxu0 %v1830_v35  ;;  %v2643_v35 = vld [vmem:[%s3872_s18] ss:$0 sm:$0xff] }
 0x542   : > { %2876 = vmatprep.subr.bf16.mxu0 %v3174_v8 }
 0x59d   : > { %v3591_v61 = vpop.f32.mrb[4].mxu0 }
 0x59e   : > { %v2780_v62 = vpop.f32.mrb[5].mxu0 }
 0x59f   : > { %v970_v63 = vpop.f32.mrb[6].mxu0  ;;  %v3033_v62 = vld [vmem:[%s3869_s15] sm:$0xff]  }
 0x5a0   : > { %v2781_v0 = vpop.f32.mrb[7].mxu0  ;;  %v3034_v63 = vld [vmem:[%s3869_s15 + $0x8] sm:$0xff]  }
 0x5a1   : > { %v3035_v0 = vld [vmem:[%s3871_s17] sm:$0xff]  }
 0x5a2   : > { %2885 = vmatpush3.bf16.msra.mxu1 %v3035_v0  ;;  %v3046_v0 = vld [vmem:[%s3920_s11 + $0x8] sm:$0xff]  }
 0x5a3   : > { %2886 = vmatprep.subr.bf16.mxu1 %v3174_v8 }
 0x5a5   : > { %v1078_v1 = vpop.f32.mrb[8].mxu0 }
 0x5a6   : > { %v2792_v2 = vpop.f32.mrb[9].mxu0 }
 0x5a7   : > { %v1081_v3 = vpop.f32.mrb[10].mxu0 }
 0x5a8   : > { %v2793_v4 = vpop.f32.mrb[11].mxu0 }
 0x5ad   : > { %v1189_v5 = vpop.f32.mrb[12].mxu0 }
 0x5ae   : > { %v2804_v6 = vpop.f32.mrb[13].mxu0 }
 0x5af   : > { %v1192_v7 = vpop.f32.mrb[14].mxu0 }
 0x5b0   : > { %v2805_v9 = vpop.f32.mrb[15].mxu0  ;;  %v2638_v7 = vld [vmem:[%s3868_s14] ss:$0 sm:$0xff] }
 0x5da   : > { %v1300_v10 = vpop.f32.mrb[16].mxu0 }
 0x5db   : > { %v2816_v11 = vpop.f32.mrb[17].mxu0 }
 0x5dc   : > { %v1303_v12 = vpop.f32.mrb[18].mxu0 }
 0x5dd   : > { %v2817_v13 = vpop.f32.mrb[19].mxu0  ;;  %v3036_v12 = vld [vmem:[%s3871_s17 + $0x8] sm:$0xff]  }
 0x5de   : > { %2887 = vmatpush3.bf16.msra.mxu1 %v3036_v12  ;;  %v3037_v13 = vld [vmem:[%s3871_s17 + $0x10] sm:$0xff]  }
 0x5df   : > { %2888 = vmatprep.subr.bf16.mxu1 %v3174_v8 }
 0x5e2   : > { %2889 = vmatpush3.bf16.msra.mxu1 %v3037_v13 }
 0x5e3   : > { %2890 = vmatprep.subr.bf16.mxu1 %v3174_v8 }
 0x5f3   : > { %v1432_v14 = vpop.f32.mrb[20].mxu0 }
 0x5f4   : > { %v2828_v15 = vpop.f32.mrb[21].mxu0 }
 0x5f5   : > { %v1435_v16 = vpop.f32.mrb[22].mxu0  ;;  %v3039_v15 = vld [vmem:[%s3871_s17 + $0x20] sm:$0xff]  }
 0x5f6   : > { %v2829_v17 = vpop.f32.mrb[23].mxu0  ;;  %v3040_v16 = vld [vmem:[%s3871_s17 + $0x28] sm:$0xff]  }
 0x5f7   : > { %v3041_v17 = vld [vmem:[%s3871_s17 + $0x30] sm:$0xff]  }
 0x5fb   : > { %v1543_v18 = vpop.f32.mrb[24].mxu0 }
 0x5fc   : > { %1772 = vrot.lane.b32.xlu1 %v1543_v18, %s3199_s5  ;;  %v2840_v19 = vpop.f32.mrb[25].mxu0  ;;  %s3202_s5 = smov 6   ;;  %v3042_v18 = vld [vmem:[%s3871_s17 + $0x38] sm:$0xff]  }
 0x5fd   : > { %v1546_v20 = vpop.f32.mrb[26].mxu0  ;;  %v2639_v19 = vld [vmem:[%s3870_s16] ss:$0 sm:$0xff] }
 0x5fe   : > { %v2841_v21 = vpop.f32.mrb[27].mxu0 }
 0x603   : > { %v1654_v22 = vpop.f32.mrb[28].mxu0 }
 0x604   : > { %1776 = vrot.lane.b32.xlu1 %v1654_v22, %s3200_s0  ;;  %v2852_v25 = vpop.f32.mrb[29].mxu0 }
 0x605   : > { %v1657_v23 = vpop.f32.mrb[30].mxu0 }
 0x606   : > { %v2853_v26 = vpop.f32.mrb[31].mxu0 }
 0x608   : > { %1307 = vrot.lane.b32.xlu1 %v1078_v1, %s3201_s28  ;;  %s3916_s28 = sld [smem:[#allocation16_spill]] }
 0x60b   : > { %v1765_v27 = vpop.f32.mrb[32].mxu0 }
 0x60c   : > { %1315 = vrot.lane.b32.xlu1 %v1300_v10, %s3186_s27  ;;  %1780 = vrot.lane.b32.xlu0 %v1765_v27, %s3202_s5  ;;  %v2864_v28 = vpop.f32.mrb[33].mxu0  ;;  %s3915_s27 = smov 32   ;;  %s2683_s5 = sshll.u32 %s3355_s7, 7 }
 0x60d   : > { %v1768_v29 = vpop.f32.mrb[34].mxu0 }
 0x60e   : > { %v2865_v30 = vpop.f32.mrb[35].mxu0  ;;  %v2632_v50 = vld [vmem:[%s3916_s28] ss:$0 sm:$0xff] }
 0x610   : > { %1311 = vrot.lane.b32.xlu0 %v1189_v5, %s3198_s9  ;;  %v2637_v5 = vld [vmem:[%s3867_s13] ss:$0 sm:$0xff]  ;;  %s3917_s9 = sld [smem:[#allocation19_spill]] }
 0x66e   : > { %v1773_v31 = vpop.permute.xlu1 %1772 }
 0x66f   : > { %v1783_v36 = vsel %vm1330_vm3, %v1432_v14, %v1773_v31  ;;  %v3038_v14 = vld [vmem:[%s3871_s17 + $0x18] sm:$0xff]  }
 0x670   : > { %2891 = vmatpush3.bf16.msra.mxu1 %v3038_v14 }
 0x671   : > { %2892 = vmatprep.subr.bf16.mxu1 %v3174_v8 }
 0x674   : > { %2893 = vmatpush3.bf16.msra.mxu1 %v3039_v15 }
 0x675   : > { %2894 = vmatprep.subr.bf16.mxu1 %v3174_v8 }
 0x676   : > { %v1777_v34 = vpop.permute.xlu1 %1776 }
 0x677   : > { %v1785_v38 = vsel %vm1784_vm5, %v1783_v36, %v1777_v34 }
 0x678   : > { %2895 = vmatpush3.bf16.msra.mxu1 %v3040_v16 }
 0x679   : > { %2896 = vmatprep.subr.bf16.mxu1 %v3174_v8 }
 0x67a   : > { %v1308_v37 = vpop.permute.xlu1 %1307 }
 0x67b   : > { %v1318_v42 = vsel %vm864_vm2, %v3591_v61, %v1308_v37 }
 0x67c   : > { %2897 = vmatpush3.bf16.msra.mxu1 %v3041_v17 }
 0x67d   : > { %2898 = vmatprep.subr.bf16.mxu1 %v3174_v8 }
 0x67e   : > { %v1781_v39 = vpop.permute.xlu0 %1780  ;;  %v1316_v44 = vpop.permute.xlu1 %1315 }
 0x67f   : > { %v1787_v40 = vsel %vm1786_vm6, %v1785_v38, %v1781_v39 }
 0x680   : > { %v2686_v41 = vpack.c.bf16 %v1787_v40, %v1787_v40  ;;  %2899 = vmatpush3.bf16.msra.mxu1 %v3042_v18 }
 0x681   : > { %2932 = vmatprep.subr.bf16.mxu1 %v3174_v8 }
 0x682   : > { %1792 = vrot.lane.b32.xlu0 %v2686_v41, %s3915_s27  ;;  %v1312_v43 = vpop.permute.xlu0 %1311  ;;  %s753_s27 = sand.u32 1, %s3164_s2  }
 0x683   : > { %v1320_v45 = vsel %vm1319_vm7, %v1318_v42, %v1312_v43  ;;  %v3109_v43 = vld [vmem:[%s3387_s8] sm:$0xff]  ;;  %s2607_s28 = sshll.u32 %s753_s27, 3  ;;  %s2531_s8 = scalar_lea.sflag [#allocation4], %s753_s27 }
 0x684   : > { %v1322_v46 = vsel %vm1321_vm8, %v1320_v45, %v1316_v44  ;;  %s755_s0 = scalar_lea.vmem [#allocation3], %s2607_s28  ;;  %s3203_s28 = smov [#allocation3]  }
 0x685   : > { %v1323_v47 = vpack.c.bf16 %v1322_v46, %v1322_v46 }
 0x687   : > { %1325 = vst.msk [vmem:[#allocation2] sm:$0xf] %vm1324_vm9, %v1323_v47 }
 0x6f4   : > { %v1793_v48 = vpop.permute.xlu0 %1792 }
 0x6f5   : > { %1796 = vst.msk [vmem:[#allocation2] sm:$0xf] %vm1795_vm10, %v1793_v48 }
 0x6fc   : > { %v1797_v49 = vld [vmem:[#allocation2] sm:$0xf] }
 0x6fd   : > { %2873 = vmatmul.mubr.msk.bf16.vlgmr.msra.gmra.mrb[36].mxu0 %vm1825_vm11, %v1797_v49 }
 0x6fe   : > { %2880 = vmatprep.mubr.msk.bf16.mxu0 %vm3175_vm1, %v3174_v8  ;;  %2877 = vmatpush3.bf16.msra.mxu0 %v3033_v62  ;;  %v3045_v62 = vld [vmem:[%s3920_s11] sm:$0xff]  }
 0x6ff   : > { %2878 = vmatprep.subr.bf16.mxu0 %v3174_v8 }
 0x702   : > { %2879 = vmatpush3.bf16.msra.mxu0 %v3034_v63 }
 0x703   : > { %2904 = vmatprep.subr.bf16.mxu0 %v3174_v8 }
 0x7d0   : > { %v1866_v51 = vpop.f32.mrb[36].mxu0 }
 0x7d1   : > { %v3617_v52 = vadd.f32 %v2632_v50, %v1866_v51  ;;  %v2874_v53 = vpop.f32.mrb[37].mxu0  ;;  %v3043_v51 = vld [vmem:[%s3917_s9] sm:$0xff]  }
 0x7d2   : > { %v1869_v54 = vpop.f32.mrb[38].mxu0 }
 0x7d3   : > { %v2875_v55 = vpop.f32.mrb[39].mxu0  ;;  %v1896_v56 = vsel %vm764_vm0, %v3617_v52, 0.0 }
 0x7d4   : > { %1897 = vadd.xlane.f32.xlu1 %v1896_v56 }
 0x861   : > { %v1898_v57 = vpop.xlane.xlu1 %1897 }
 0x862   : > { %v1899_v58 = vmul.f32 0.03125, %v1898_v57  ;;  %v2652_v57 = vld [vmem:[%s3918_s6] ss:$0 sm:$0xff]  ;;  %s2544_s6 = sshll.u32 %s755_s0, 4  ;;  %s3813_s6 = int_to_ptr.vmem [resolvable:$true] %s2544_s6 }
 0x863   : > { %s3110_s7 = scalar_lea.vmem %s3813_s6, 128 }
 0x864   : > { %v1900_v59 = vsub.f32 %v3617_v52, %v1899_v58  ;;  %p3111_p11 = scmp.ne.s32.totalorder %s3813_s6, %s3110_s7 }
 0x866   : > { %v1901_v60 = vmul.f32 %v1900_v59, %v1900_v59  ;;  %p3112_p12 = pnand %p3111_p11, %p3372_p5 }
 0x868   : > { %v1902_v61 = vsel %vm764_vm0, %v1901_v60, 0.0  ;;  %p3113_p13 = pneg %p3112_p12 }
 0x869   : > { %1903 = vadd.xlane.f32.xlu0 %v1902_v61 }
 0x8f6   : > { %v1904_v1 = vpop.xlane.xlu0 %1903 }
 0x8f7   : > { %v1905_v2 = vmul.f32 0.03125, %v1904_v1  ;;  %v3047_v1 = vld [vmem:[%s3920_s11 + $0x10] sm:$0xff]  }
 0x8f9   : > { %v1906_v3 = vadd.f32 1e-05, %v1905_v2  ;;  %v3048_v2 = vld [vmem:[%s3920_s11 + $0x18] sm:$0xff]  }
 0x8fb   : > { %3097 = vrsqrt.f32 %v1906_v3  ;;  %v3049_v3 = vld [vmem:[%s3920_s11 + $0x20] sm:$0xff]  }
 0x905   : > { %v3098_v4 = vpop.eup %3097 }
 0x906   : > { %v1908_v6 = vmul.f32 %v3098_v4, %v1900_v59  ;;  %v2653_v59 = vld [vmem:[%s3919_s3] ss:$0 sm:$0xff]  ;;  %v3050_v4 = vld [vmem:[%s3920_s11 + $0x28] sm:$0xff]   ;;  %s3811_s3 = scalar_lea.hbm %s3879_s25, %s2683_s5 }
 0x908   : > { %v1915_v9 = vmul.f32 %v2637_v5, %v1908_v6  ;;  %v3051_v5 = vld [vmem:[%s3920_s11 + $0x30] sm:$0xff]   ;;  %v3052_v6 = vld [vmem:[%s3920_s11 + $0x38] sm:$0xff]  }
 0x90a   : > { %v1922_v10 = vadd.f32 %v2638_v7, %v1915_v9  ;;  %v2654_v7 = vld [vmem:[%s3921_s10] ss:$0 sm:$0xff]  ;;  %s3114_s10 = sshll.u32 %s3203_s28, 4  ;;  %s3115_s10 = int_to_ptr.vmem [resolvable:$false] %s3114_s10 }
 0x90b   : > { %s3116_s11 = scalar_lea.vmem %s3115_s10, 256  ;;  %p3117_p0 = scmp.lt.s32.totalorder %s3813_s6, %s3115_s10 }
 0x90c   : > { %v1923_v11 = vpack.c.bf16 %v1922_v10, %v1922_v10  ;;  %p3118_p1 = scmp.lt.s32.totalorder %s3116_s11, %s3110_s7 }
 0x90e   : > { %2881 = vmatmul.mubr.msk.bf16.vlgmr.msra.gmra.mrb[40].mxu0 %vm764_vm0, %v1923_v11  ;;  %p3119_p2 = por %p3118_p1, %p3117_p0 }
 0x90f   : > { %2908 = vmatprep.mubr.msk.bf16.mxu0 %vm3175_vm1, %v3174_v8  ;;  %2905 = vmatpush3.bf16.msra.mxu0 %v3043_v51  ;;  %v3057_v51 = vld [vmem:[%s3877_s23 + $0x10] sm:$0xff]  }
 0x910   : > { %2906 = vmatprep.subr.bf16.mxu0 %v3174_v8  ;;  %p3120_p3 = pnand %p3119_p2, %p3113_p13 }
 0x9e1   : > { %v1979_v20 = vpop.f32.mrb[40].mxu0 }
 0x9e2   : > { %v1980_v21 = vadd.f32 %v2639_v19, %v1979_v20  ;;  %v2882_v22 = vpop.f32.mrb[41].mxu0 }
 0x9e3   : > { %v1982_v25 = vpop.f32.mrb[42].mxu0 }
 0x9e4   : > { %v1986_v23 = vmul.f32 0.044715, %v1980_v21  ;;  %v2883_v24 = vpop.f32.mrb[43].mxu0  ;;  %v1985_v31 = vmul.f32 0.5, %v1980_v21 }
 0x9e6   : > { %v1987_v26 = vmul.f32 %v1986_v23, %v1980_v21  ;;  %v2658_v23 = vld [vmem:[%s3866_s12] ss:$0 sm:$0xff] }
 0x9e8   : > { %v1988_v27 = vmul.f32 %v1987_v26, %v1980_v21 }
 0x9ea   : > { %v1989_v28 = vadd.f32 %v1988_v27, %v1980_v21 }
 0x9ec   : > { %v1990_v29 = vmul.f32 0.7978846, %v1989_v28 }
 0x9ee   : > { %3099 = vtanh.f32 %v1990_v29 }
 0x9f8   : > { %v3100_v30 = vpop.eup %3099 }
 0x9f9   : > { %v1992_v32 = vadd.f32 1.0, %v3100_v30 }
 0x9fb   : > { %v1993_v33 = vmul.f32 %v1992_v32, %v1985_v31 }
 0x9fd   : > { %v1994_v34 = vpack.c.bf16 %v1993_v33, %v1993_v33 }
 0x9ff   : > { %2901 = vmatmul.mubr.bf16.vlgmr.msra.gmra.mrb[32].mxu1 %v1994_v34 }
 0xa00   : > { %2936 = vmatprep.mubr.msk.bf16.mxu1 %vm3175_vm1, %v3174_v8 }
 0xad2   : > { %v2083_v36 = vpop.f32.mrb[32].mxu1 }
 0xad3   : > { %v2084_v37 = vadd.f32 %v2643_v35, %v2083_v36  ;;  %v2902_v38 = vpop.f32.mrb[33].mxu1  ;;  %v3053_v36 = vld [vmem:[%s3875_s21] sm:$0xff]  }
 0xad4   : > { %v2086_v39 = vpop.f32.mrb[34].mxu1  ;;  %2933 = vmatpush3.bf16.msra.mxu1 %v3053_v36 }
 0xad5   : > { %v2089_v40 = vadd.f32 %v2084_v37, %v3617_v52  ;;  %v2903_v41 = vpop.f32.mrb[35].mxu1  ;;  %v3054_v37 = vld [vmem:[%s3875_s21 + $0x8] sm:$0xff]   ;;  %2934 = vmatprep.subr.bf16.mxu1 %v3174_v8 }
 0xad7   : > { %v2090_v42 = vadd.f32 %v2089_v40, %v3617_v52  ;;  %v3044_v52 = vld [vmem:[%s3917_s9 + $0x8] sm:$0xff]  }
 0xad8   : > { %2907 = vmatpush3.bf16.msra.mxu0 %v3044_v52  ;;  %2935 = vmatpush3.bf16.msra.mxu1 %v3054_v37  ;;  %v3058_v52 = vld [vmem:[%s3877_s23 + $0x18] sm:$0xff]  }
 0xad9   : > { %v3683_v44 = vadd.f32 %v3109_v43, %v2090_v42  ;;  %2912 = vmatprep.subr.bf16.mxu0 %v3174_v8  ;;  %2940 = vmatprep.subr.bf16.mxu1 %v3174_v8  ;;  %v2667_v42 = vld [vmem:[%s3873_s19] ss:$0 sm:$0xff] }
 0xadb   : > { %v2094_v45 = vsel %vm764_vm0, %v3683_v44, 0.0 }
 0xadc   : > { %2095 = vadd.xlane.f32.xlu0 %v2094_v45  ;;  %v2668_v45 = vld [vmem:[%s3874_s20] ss:$0 sm:$0xff] }
 0xb69   : > { %v2096_v46 = vpop.xlane.xlu0 %2095 }
 0xb6a   : > { %v2097_v47 = vmul.f32 0.03125, %v2096_v46 }
 0xb6c   : > { %v2098_v48 = vsub.f32 %v3683_v44, %v2097_v47 }
 0xb6e   : > { %v2099_v49 = vmul.f32 %v2098_v48, %v2098_v48 }
 0xb70   : > { %v2100_v50 = vsel %vm764_vm0, %v2099_v49, 0.0 }
 0xb71   : > { %2101 = vadd.xlane.f32.xlu1 %v2100_v50  ;;  %v3056_v50 = vld [vmem:[%s3877_s23 + $0x8] sm:$0xff]  }
 0xbfe   : > { %v2102_v53 = vpop.xlane.xlu1 %2101 }
 0xbff   : > { %v2103_v54 = vmul.f32 0.03125, %v2102_v53  ;;  %v3059_v53 = vld [vmem:[%s3877_s23 + $0x20] sm:$0xff]  }
 0xc01   : > { %v2104_v55 = vadd.f32 1e-05, %v2103_v54  ;;  %v3060_v54 = vld [vmem:[%s3877_s23 + $0x28] sm:$0xff]  }
 0xc03   : > { %3101 = vrsqrt.f32 %v2104_v55  ;;  %v3061_v55 = vld [vmem:[%s3877_s23 + $0x30] sm:$0xff]  }
 0xc0d   : > { %v3102_v56 = vpop.eup %3101 }
 0xc0e   : > { %v2106_v58 = vmul.f32 %v3102_v56, %v2098_v48  ;;  %v3055_v48 = vld [vmem:[%s3877_s23] sm:$0xff]   ;;  %v3062_v56 = vld [vmem:[%s3877_s23 + $0x38] sm:$0xff]  }
 0xc10   : > { %v2113_v60 = vmul.f32 %v2652_v57, %v2106_v58  ;;  %v2669_v57 = vld [vmem:[%s3876_s22] ss:$0 sm:$0xff] }
 0xc12   : > { %v2120_v61 = vadd.f32 %v2653_v59, %v2113_v60 }
 0xc14   : > { %v2121_v63 = vpack.c.bf16 %v2120_v61, %v2120_v61 }
 0xc16   : > { %2909 = vmatmul.mubr.msk.bf16.vlgmr.msra.gmra.mrb[44].mxu0 %vm764_vm0, %v2121_v63 }
 0xc17   : > { %2913 = vmatpush3.bf16.msra.mxu0 %v3045_v62  ;;  %2928 = vmatprep.mubr.msk.bf16.mxu0 %vm3175_vm1, %v3174_v8 }
 0xc18   : > { %2914 = vmatprep.subr.bf16.mxu0 %v3174_v8 }
 0xc1b   : > { %2915 = vmatpush3.bf16.msra.mxu0 %v3046_v0 }
 0xc1c   : > { %2916 = vmatprep.subr.bf16.mxu0 %v3174_v8 }
 0xc1f   : > { %2917 = vmatpush3.bf16.msra.mxu0 %v3047_v1 }
 0xc20   : > { %2918 = vmatprep.subr.bf16.mxu0 %v3174_v8 }
 0xc23   : > { %2919 = vmatpush3.bf16.msra.mxu0 %v3048_v2 }
 0xc24   : > { %2920 = vmatprep.subr.bf16.mxu0 %v3174_v8 }
 0xc27   : > { %2921 = vmatpush3.bf16.msra.mxu0 %v3049_v3 }
 0xc28   : > { %2922 = vmatprep.subr.bf16.mxu0 %v3174_v8 }
 0xc2b   : > { %2923 = vmatpush3.bf16.msra.mxu0 %v3050_v4 }
 0xc2c   : > { %2924 = vmatprep.subr.bf16.mxu0 %v3174_v8 }
 0xc2f   : > { %2925 = vmatpush3.bf16.msra.mxu0 %v3051_v5 }
 0xc30   : > { %2926 = vmatprep.subr.bf16.mxu0 %v3174_v8 }
 0xc33   : > { %2927 = vmatpush3.bf16.msra.mxu0 %v3052_v6 }
 0xce9   : > { %v2182_v9 = vpop.f32.mrb[44].mxu0 }
 0xcea   : > { %v2183_v10 = vadd.f32 %v2654_v7, %v2182_v9  ;;  %v2910_v11 = vpop.f32.mrb[45].mxu0  ;;  %v2673_v9 = vld [vmem:[%s3878_s24] ss:$0 sm:$0xff] }
 0xceb   : > { %v2185_v12 = vpop.f32.mrb[46].mxu0 }
 0xcec   : > { %v2189_v13 = vmul.f32 0.044715, %v2183_v10  ;;  %v2911_v14 = vpop.f32.mrb[47].mxu0  ;;  %v2188_v20 = vmul.f32 0.5, %v2183_v10 }
 0xcee   : > { %v2190_v15 = vmul.f32 %v2189_v13, %v2183_v10 }
 0xcf0   : > { %v2191_v16 = vmul.f32 %v2190_v15, %v2183_v10 }
 0xcf2   : > { %v2192_v17 = vadd.f32 %v2191_v16, %v2183_v10 }
 0xcf4   : > { %v2193_v18 = vmul.f32 0.7978846, %v2192_v17 }
 0xcf6   : > { %3103 = vtanh.f32 %v2193_v18 }
 0xd00   : > { %v3104_v19 = vpop.eup %3103 }
 0xd01   : > { %v2195_v21 = vadd.f32 1.0, %v3104_v19 }
 0xd03   : > { %v2196_v22 = vmul.f32 %v2195_v21, %v2188_v20 }
 0xd05   : > { %v2197_v25 = vpack.c.bf16 %v2196_v22, %v2196_v22 }
 0xd07   : > { %2929 = vmatmul.mubr.bf16.vlgmr.msra.gmra.mrb[48].mxu0 %v2197_v25 }
 0xdda   : > { %v2303_v24 = vpop.f32.mrb[48].mxu0 }
 0xddb   : > { %v3743_v26 = vadd.f32 %v2658_v23, %v2303_v24  ;;  %v2930_v27 = vpop.f32.mrb[49].mxu0 }
 0xddc   : > { %v2306_v28 = vpop.f32.mrb[50].mxu0 }
 0xddd   : > { %v2931_v29 = vpop.f32.mrb[51].mxu0  ;;  %v2333_v30 = vsel %vm764_vm0, %v3743_v26, 0.0 }
 0xdde   : > { %2334 = vadd.xlane.f32.xlu0 %v2333_v30 }
 0xe6b   : > { %v2335_v31 = vpop.xlane.xlu0 %2334 }
 0xe6c   : > { %v2336_v32 = vmul.f32 0.03125, %v2335_v31 }
 0xe6e   : > { %v2337_v33 = vsub.f32 %v3743_v26, %v2336_v32 }
 0xe70   : > { %v2338_v34 = vmul.f32 %v2337_v33, %v2337_v33 }
 0xe72   : > { %v2339_v35 = vsel %vm764_vm0, %v2338_v34, 0.0 }
 0xe73   : > { %2340 = vadd.xlane.f32.xlu1 %v2339_v35 }
 0xf00   : > { %v2341_v38 = vpop.xlane.xlu1 %2340 }
 0xf01   : > { %v2342_v39 = vmul.f32 0.03125, %v2341_v38 }
 0xf03   : > { %v2343_v40 = vadd.f32 1e-05, %v2342_v39 }
 0xf05   : > { %3105 = vrsqrt.f32 %v2343_v40 }
 0xf0f   : > { %v3106_v41 = vpop.eup %3105 }
 0xf10   : > { %v2345_v43 = vmul.f32 %v3106_v41, %v2337_v33 }
 0xf12   : > { %v2352_v46 = vmul.f32 %v2667_v42, %v2345_v43 }
 0xf14   : > { %v2359_v47 = vadd.f32 %v2668_v45, %v2352_v46 }
 0xf16   : > { %v2360_v49 = vpack.c.bf16 %v2359_v47, %v2359_v47 }
 0xf18   : > { %2937 = vmatmul.mubr.msk.bf16.vlgmr.msra.gmra.mrb[36].mxu1 %vm764_vm0, %v2360_v49 }
 0xf19   : > { %2941 = vmatpush3.bf16.msra.mxu1 %v3055_v48  ;;  %2956 = vmatprep.mubr.msk.bf16.mxu1 %vm3175_vm1, %v3174_v8 }
 0xf1a   : > { %2942 = vmatprep.subr.bf16.mxu1 %v3174_v8 }
 0xf1d   : > { %2943 = vmatpush3.bf16.msra.mxu1 %v3056_v50 }
 0xf1e   : > { %2944 = vmatprep.subr.bf16.mxu1 %v3174_v8 }
 0xf21   : > { %2945 = vmatpush3.bf16.msra.mxu1 %v3057_v51 }
 0xf22   : > { %2946 = vmatprep.subr.bf16.mxu1 %v3174_v8 }
 0xf25   : > { %2947 = vmatpush3.bf16.msra.mxu1 %v3058_v52 }
 0xf26   : > { %2948 = vmatprep.subr.bf16.mxu1 %v3174_v8 }
 0xf29   : > { %2949 = vmatpush3.bf16.msra.mxu1 %v3059_v53 }
 0xf2a   : > { %2950 = vmatprep.subr.bf16.mxu1 %v3174_v8 }
 0xf2d   : > { %2951 = vmatpush3.bf16.msra.mxu1 %v3060_v54 }
 0xf2e   : > { %2952 = vmatprep.subr.bf16.mxu1 %v3174_v8 }
 0xf31   : > { %2953 = vmatpush3.bf16.msra.mxu1 %v3061_v55 }
 0xf32   : > { %2954 = vmatprep.subr.bf16.mxu1 %v3174_v8 }
 0xf35   : > { %2955 = vmatpush3.bf16.msra.mxu1 %v3062_v56 }
 0xfeb   : > { %v2416_v58 = vpop.f32.mrb[36].mxu1 }
 0xfec   : > { %v2417_v59 = vadd.f32 %v2669_v57, %v2416_v58  ;;  %v2938_v60 = vpop.f32.mrb[37].mxu1 }
 0xfed   : > { %v2419_v61 = vpop.f32.mrb[38].mxu1 }
 0xfee   : > { %v2423_v62 = vmul.f32 0.044715, %v2417_v59  ;;  %v2939_v63 = vpop.f32.mrb[39].mxu1  ;;  %v2422_v8 = vmul.f32 0.5, %v2417_v59 }
 0xff0   : > { %v2424_v0 = vmul.f32 %v2423_v62, %v2417_v59 }
 0xff2   : > { %v2425_v1 = vmul.f32 %v2424_v0, %v2417_v59 }
 0xff4   : > { %v2426_v2 = vadd.f32 %v2425_v1, %v2417_v59 }
 0xff6   : > { %v2427_v3 = vmul.f32 0.7978846, %v2426_v2 }
 0xff8   : > { %3107 = vtanh.f32 %v2427_v3 }
0x1002   : > { %v3108_v4 = vpop.eup %3107 }
0x1003   : > { %v2429_v5 = vadd.f32 1.0, %v3108_v4 }
0x1005   : > { %v2430_v6 = vmul.f32 %v2429_v5, %v2422_v8 }
0x1007   : > { %v2431_v7 = vpack.c.bf16 %v2430_v6, %v2430_v6 }
0x1009   : > { %2957 = vmatmul.mubr.bf16.vlgmr.msra.gmra.mrb[40].mxu1 %v2431_v7 }
0x10dc   : > { %v2520_v10 = vpop.f32.mrb[40].mxu1 }
0x10dd   : > { %v2521_v11 = vadd.f32 %v2673_v9, %v2520_v10  ;;  %v2958_v12 = vpop.f32.mrb[41].mxu1 }
0x10de   : > { %v2523_v13 = vpop.f32.mrb[42].mxu1 }
0x10df   : > { %v2526_v14 = vadd.f32 %v2521_v11, %v3743_v26  ;;  %v2959_v15 = vpop.f32.mrb[43].mxu1 }
0x10e1   : > { %v2527_v16 = vadd.f32 %v2526_v14, %v3743_v26 }
0x10e3   : > { %v2528_v17 = vadd.f32 %v2527_v16, %v3683_v44 }
0x10e5   : > { %2529 = vst.msk [vmem:[%s755_s0] sm:$0xff] %vm764_vm0, %v2528_v17 }
0x10e6   : > { %3123 = shalt.err (!%p3120_p3)
}
0x10e7   : > { %s3124_s9 = scalar_lea.hbm %s3811_s3, 128  ;;  %s3128_s0 = scalar_lea.hbm %s3879_s25, 256 }
0x10e8   : > { %p3125_p4 = scmp.ne.s32.totalorder %s3811_s3, %s3124_s9  ;;  %p3129_p9 = scmp.lt.u32.totalorder %s3811_s3, %s3879_s25 }
0x10e9   : > { %p3130_p10 = scmp.lt.u32.totalorder %s3128_s0, %s3124_s9  ;;  %p3132_p12 = scmp.lt.u32.totalorder %s3124_s9, %s3811_s3 }
0x10ea   : > { %p3126_p7 = pnand %p3125_p4, %p3372_p5 }
0x10eb   : > { %p3131_p11 = por %p3130_p10, %p3129_p9 }
0x10ec   : > { %p3127_p8 = pneg %p3126_p7 }
0x10ed   : > { %p3133_p13 = por %p3132_p12, %p3131_p11 }
0x10ef   : > { %p3134_p0 = pnand %p3133_p13, %p3127_p8 }
0x10f1   : > { %3137 = shalt.err (!%p3134_p0)
}
0x10f2   : > { %2960 = dma.vmem_to_hbm [thread:$0]  (%p3372_p5), %s3813_s6, 128, %s3811_s3, %s2531_s8  }
0x10f3 PF: > { %p2966_p1 = scmp.ge.s32.totalorder %s3172_s30, 2  ;;  %s2556_s7 = sand.u32 1, %s3160_s29  }
0x10f4   : > { %s2557_s28 = scalar_lea.sflag [#allocation4], %s2556_s7 }
0x10f5   : > { %p2963_p2 = pnand %p2966_p1, %p3376_p6 }
0x10f7   : > { %3155 = dma.done.wait (!%p2963_p2), %s2557_s28, 128  }
0x10f8   : > { %3157 = vsyncadd (!%p2963_p2), %s2557_s28, 4294967168  ;;  %s3923_s30 = sld [smem:[#allocation7_spill]]  ;;  %s3924_s9 = sld [smem:[#allocation6_spill]] }
0x10f9   : > { %s3925_s6 = sld [smem:[#allocation8_spill]]  ;;  %s3926_s29 = smov %s3164_s2 }
0x10fe   : > { %p35_p3 = scmp.ge.s32.totalorder %s3923_s30, 4   ;;  %s3927_s2 = smov %s3924_s9 }
0x1100   :  { %37 = sbr.rel (!%p35_p3) target bundleno = 16 (0x10), region = 155 }
0x1107   :  { %2562 = vsyncpa [#allocation4], 1 }
0x1108   :  { %2564 = vsyncpa [#allocation4 + $0x1], 1 }

</bundles_post_ra>
